<compile_context>
chip_gen: v5e
topology: v5e:2x2
jax: 0.10.0
libtpu: 0.0.40
codegen_flags: <defaults>
</compile_context>

<pallas_src>
import functools

import jax
import jax.numpy as jnp
from jax import lax
from jax.experimental import pallas as pl
from jax.experimental.pallas import tpu as pltpu


def _bottleneck_kernel(x_ref, w1_ref, w2_ref, w3_ref,
                       s1_ref, b1_ref, s2_ref, b2_ref, s3_ref, b3_ref,
                       *rest, H, W, Cin, Cmid, Cout, has_downsample):
    if has_downsample:
        wd_ref, sd_ref, bd_ref, o_ref, hpad_ref = rest
    else:
        o_ref, hpad_ref = rest

    x = x_ref[0]                                    # (H, W, Cin) f32
    xf = x.reshape(H * W, Cin)
    xf_bf = xf.astype(jnp.bfloat16)

    # ---- identity / downsample path first, staged through o_ref ---------------
    # (keeps h3, idn and out from all being live SSA values in the epilogue)
    if has_downsample:
        idn = jnp.dot(xf_bf, wd_ref[...], preferred_element_type=jnp.float32)
        idn = idn * sd_ref[...] + bd_ref[...]
        o_ref[0] = idn.reshape(H, W, Cout)
    else:
        o_ref[0] = x                                # Cin == Cout, stride == 1

    # ---- conv1 (1x1) + BN + ReLU (MXU in bf16, BN/ReLU in f32) ----------------
    h1 = jnp.dot(xf_bf, w1_ref[...], preferred_element_type=jnp.float32)
    h1 = jnp.maximum(h1 * s1_ref[...] + b1_ref[...], 0.0)          # (H*W, Cmid)

    # ---- conv2 (3x3, pad=1, stride=1) ------------------------------------------
    # Zero only the 1-element halo strips (cheap; safe even when the batch grid
    # axis is sharded across TensorCores).  The interior is fully rewritten.
    zrow = jnp.zeros((1, W + 2, Cmid), jnp.float32)
    zcol = jnp.zeros((H + 2, 1, Cmid), jnp.float32)
    hpad_ref[pl.ds(0, 1), :, :] = zrow
    hpad_ref[pl.ds(H + 1, 1), :, :] = zrow
    hpad_ref[:, pl.ds(0, 1), :] = zcol
    hpad_ref[:, pl.ds(W + 1, 1), :] = zcol
    hpad_ref[pl.ds(1, H), pl.ds(1, W), :] = h1.reshape(H, W, Cmid)

    # Per dy: one contiguous row-slab load, fuse the 3 dx taps into a single
    # matmul with K = 3*Cmid (deeper MXU contraction, 3 matmuls instead of 9,
    # no per-tap strided-slice reshape copies).
    h2 = jnp.zeros((H * W, Cmid), jnp.float32)
    for dy in range(3):
        slab = hpad_ref[pl.ds(dy, H), :, :]                        # (H, W+2, Cmid)
        win = jnp.concatenate(
            [slab[:, dx:dx + W, :] for dx in range(3)], axis=-1)   # (H, W, 3*Cmid)
        win = win.reshape(H * W, 3 * Cmid).astype(jnp.bfloat16)
        h2 = h2 + jnp.dot(win, w2_ref[dy], preferred_element_type=jnp.float32)
    h2 = jnp.maximum(h2 * s2_ref[...] + b2_ref[...], 0.0)          # (H*W, Cmid)

    # ---- conv3 (1x1) + BN -------------------------------------------------------
    h3 = jnp.dot(h2.astype(jnp.bfloat16), w3_ref[...],
                 preferred_element_type=jnp.float32)
    h3 = h3 * s3_ref[...] + b3_ref[...]                            # (H*W, Cout)

    # ---- residual add + final ReLU (identity read back from o_ref) -------------
    idn = o_ref[0].reshape(H * W, Cout)
    o_ref[0] = jnp.maximum(h3 + idn, 0.0).reshape(H, W, Cout)


def bottleneck_forward(x, params, *, stride=1):
    # TODO(synk): stride > 1 not implemented (see module spec).
    assert stride == 1, "only stride=1 supported in this kernel"
    N, H, W, Cin = x.shape
    Cmid = params["w1"].shape[1]
    Cout = params["w3"].shape[1]
    has_downsample = not (stride == 1 and Cin == Cout)

    kernel = functools.partial(
        _bottleneck_kernel, H=H, W=W, Cin=Cin, Cmid=Cmid, Cout=Cout,
        has_downsample=has_downsample)

    bf16 = jnp.bfloat16
    w1 = params["w1"].astype(bf16)                                  # (Cin, Cmid)
    # fuse the 3 dx taps of each dy into the contraction dim: (3, 3*Cmid, Cmid)
    w2 = params["w2"].reshape(3, 3 * Cmid, Cmid).astype(bf16)
    w3 = params["w3"].astype(bf16)                                  # (Cmid, Cout)

    def full(shape):
        return pl.BlockSpec(shape, lambda b: (0,) * len(shape))

    in_specs = [
        pl.BlockSpec((1, H, W, Cin), lambda b: (b, 0, 0, 0)),       # x
        full((Cin, Cmid)),                                          # w1
        full((3, 3 * Cmid, Cmid)),                                  # w2 (dx-fused)
        full((Cmid, Cout)),                                         # w3
        full((1, Cmid)), full((1, Cmid)),                           # bn1 scale/shift
        full((1, Cmid)), full((1, Cmid)),                           # bn2 scale/shift
        full((1, Cout)), full((1, Cout)),                           # bn3 scale/shift
    ]
    args = [x, w1, w2, w3,
            params["s1"], params["b1"], params["s2"], params["b2"],
            params["s3"], params["b3"]]
    if has_downsample:
        in_specs += [full((Cin, Cout)), full((1, Cout)), full((1, Cout))]
        args += [params["wd"].astype(bf16), params["sd"], params["bd"]]

    return pl.pallas_call(
        kernel,
        out_shape=jax.ShapeDtypeStruct((N, H, W, Cout), jnp.float32),
        grid_spec=pltpu.PrefetchScalarGridSpec(
            num_scalar_prefetch=0,
            grid=(N,),
            in_specs=in_specs,
            out_specs=pl.BlockSpec((1, H, W, Cout), lambda b: (b, 0, 0, 0)),
            scratch_shapes=[pltpu.VMEM((H + 2, W + 2, Cmid), jnp.float32)],
        ),
        compiler_params=pltpu.CompilerParams(
            dimension_semantics=("parallel",),        # batch steps shard across TCs on v7x
            vmem_limit_bytes=48 * 1024 * 1024,
        ),
    )(*args)


def init_params(key, inplanes, planes):
    """Deterministic synthetic parameters (BatchNorm folded to scale/shift, eps=1e-5)."""
    mid = planes // 2
    ks = jax.random.split(key, 20)

    def bn(kg, kb, km, kv, c):
        gamma = 1.0 + 0.1 * jax.random.normal(kg, (c,))
        beta = 0.1 * jax.random.normal(kb, (c,))
        mean = 0.1 * jax.random.normal(km, (c,))
        var = 1.0 + 0.1 * jnp.abs(jax.random.normal(kv, (c,)))
        scale = gamma / jnp.sqrt(var + 1e-5)
        shift = beta - mean * scale
        return (scale.reshape(1, c).astype(jnp.float32),
                shift.reshape(1, c).astype(jnp.float32))

    p = {}
    p["w1"] = (0.3 * jax.random.normal(ks[0], (inplanes, mid))).astype(jnp.float32)
    p["w2"] = (0.2 * jax.random.normal(ks[1], (9, mid, mid))).astype(jnp.float32)
    p["w3"] = (0.3 * jax.random.normal(ks[2], (mid, planes))).astype(jnp.float32)
    p["wd"] = (0.3 * jax.random.normal(ks[3], (inplanes, planes))).astype(jnp.float32)
    p["s1"], p["b1"] = bn(ks[4], ks[5], ks[6], ks[7], mid)
    p["s2"], p["b2"] = bn(ks[8], ks[9], ks[10], ks[11], mid)
    p["s3"], p["b3"] = bn(ks[12], ks[13], ks[14], ks[15], planes)
    p["sd"], p["bd"] = bn(ks[16], ks[17], ks[18], ks[19], planes)
    return p


def bottleneck_reference(x, params):
    """Pure-JAX reference using the same bf16-input / f32-accumulate matmul math."""
    f32, bf16 = jnp.float32, jnp.bfloat16
    N, H, W, Cin = x.shape
    Cmid = params["w1"].shape[1]

    def affine(h, s, b):
        return h * s.reshape(1, 1, 1, -1) + b.reshape(1, 1, 1, -1)

    xb = x.astype(bf16)
    h = jnp.einsum('nhwc,cm->nhwm', xb, params["w1"].astype(bf16),
                   preferred_element_type=f32)
    h = jnp.maximum(affine(h, params["s1"], params["b1"]), 0.0)

    hp = jnp.pad(h, ((0, 0), (1, 1), (1, 1), (0, 0))).astype(bf16)
    w2 = params["w2"].astype(bf16)                     # (9, Cmid, Cmid)
    acc = jnp.zeros((N, H, W, Cmid), f32)
    for dy in range(3):
        for dx in range(3):
            acc = acc + jnp.einsum('nhwc,co->nhwo',
                                   hp[:, dy:dy + H, dx:dx + W, :], w2[dy * 3 + dx],
                                   preferred_element_type=f32)
    h = jnp.maximum(affine(acc, params["s2"], params["b2"]), 0.0)

    h = jnp.einsum('nhwm,mo->nhwo', h.astype(bf16), params["w3"].astype(bf16),
                   preferred_element_type=f32)
    h = affine(h, params["s3"], params["b3"])

    idn = jnp.einsum('nhwc,co->nhwo', xb, params["wd"].astype(bf16),
                     preferred_element_type=f32)
    idn = affine(idn, params["sd"], params["bd"])
    return jnp.maximum(h + idn, 0.0)


if __name__ == "__main__":
    key = jax.random.PRNGKey(0)
    kx, kp = jax.random.split(key)

    N, H, W = 2, 16, 16
    inplanes, planes, stride = 4, 8, 1   # inplanes != planes -> downsample branch active

    x = jax.random.normal(kx, (N, H, W, inplanes), dtype=jnp.float32)
    params = init_params(kp, inplanes, planes)

    out = bottleneck_forward(x, params, stride=stride)
    out = jax.block_until_ready(out)

    ref = bottleneck_reference(x, params)
    assert out.shape == (N, H, W, planes), out.shape
    if not bool(jnp.allclose(out, ref, atol=5e-3, rtol=5e-3)):
        err = float(jnp.max(jnp.abs(out - ref)))
        raise AssertionError(f"Pallas kernel output does not match reference (max abs err {err})")

    print("KERNEL_OK")
</pallas_src>

<mosaic_0001>
module attributes {stable_mosaic.version = 11 : i64} {
  func.func @_bottleneck_kernel(%arg0: i32, %arg1: memref<1x16x16x4xf32, #tpu.memory_space<vmem>>, %arg2: memref<4x4xbf16, #tpu.memory_space<vmem>>, %arg3: memref<3x12x4xbf16, #tpu.memory_space<vmem>>, %arg4: memref<4x8xbf16, #tpu.memory_space<vmem>>, %arg5: memref<1x4xf32, #tpu.memory_space<vmem>>, %arg6: memref<1x4xf32, #tpu.memory_space<vmem>>, %arg7: memref<1x4xf32, #tpu.memory_space<vmem>>, %arg8: memref<1x4xf32, #tpu.memory_space<vmem>>, %arg9: memref<1x8xf32, #tpu.memory_space<vmem>>, %arg10: memref<1x8xf32, #tpu.memory_space<vmem>>, %arg11: memref<4x8xbf16, #tpu.memory_space<vmem>>, %arg12: memref<1x8xf32, #tpu.memory_space<vmem>>, %arg13: memref<1x8xf32, #tpu.memory_space<vmem>>, %arg14: memref<1x16x16x8xf32, #tpu.memory_space<vmem>>, %arg15: memref<18x18x4xf32, #tpu.memory_space<vmem>>) attributes {dimension_semantics = [#tpu.dimension_semantics<parallel>], iteration_bounds = array<i64: 2>, scalar_prefetch = 0 : i64, scratch_operands = 1 : i64, tpu.core_type = #tpu.core_type<tc>, window_params = [{transform_indices = @transform_0, window_bounds = array<i64: 1, 16, 16, 4>}, {pipeline_mode = #tpu.pipeline_mode<synchronous>, transform_indices = @transform_1, window_bounds = array<i64: 4, 4>}, {pipeline_mode = #tpu.pipeline_mode<synchronous>, transform_indices = @transform_2, window_bounds = array<i64: 3, 12, 4>}, {pipeline_mode = #tpu.pipeline_mode<synchronous>, transform_indices = @transform_3, window_bounds = array<i64: 4, 8>}, {pipeline_mode = #tpu.pipeline_mode<synchronous>, transform_indices = @transform_4, window_bounds = array<i64: 1, 4>}, {pipeline_mode = #tpu.pipeline_mode<synchronous>, transform_indices = @transform_5, window_bounds = array<i64: 1, 4>}, {pipeline_mode = #tpu.pipeline_mode<synchronous>, transform_indices = @transform_6, window_bounds = array<i64: 1, 4>}, {pipeline_mode = #tpu.pipeline_mode<synchronous>, transform_indices = @transform_7, window_bounds = array<i64: 1, 4>}, {pipeline_mode = #tpu.pipeline_mode<synchronous>, transform_indices = @transform_8, window_bounds = array<i64: 1, 8>}, {pipeline_mode = #tpu.pipeline_mode<synchronous>, transform_indices = @transform_9, window_bounds = array<i64: 1, 8>}, {pipeline_mode = #tpu.pipeline_mode<synchronous>, transform_indices = @transform_10, window_bounds = array<i64: 4, 8>}, {pipeline_mode = #tpu.pipeline_mode<synchronous>, transform_indices = @transform_11, window_bounds = array<i64: 1, 8>}, {pipeline_mode = #tpu.pipeline_mode<synchronous>, transform_indices = @transform_12, window_bounds = array<i64: 1, 8>}, {transform_indices = @transform_13, window_bounds = array<i64: 1, 16, 16, 8>}]} {
    %c0 = arith.constant 0 : index
    %c0_0 = arith.constant 0 : index
    %c0_1 = arith.constant 0 : index
    %c0_2 = arith.constant 0 : index
    %0 = vector.load %arg1[%c0, %c0_0, %c0_1, %c0_2] : memref<1x16x16x4xf32, #tpu.memory_space<vmem>>, vector<1x16x16x4xf32>
    %1 = vector.shape_cast %0 : vector<1x16x16x4xf32> to vector<16x16x4xf32>
    %2 = vector.shape_cast %1 : vector<16x16x4xf32> to vector<256x4xf32>
    %3 = arith.truncf %2 : vector<256x4xf32> to vector<256x4xbf16>
    %c0_3 = arith.constant 0 : index
    %c0_4 = arith.constant 0 : index
    %4 = vector.load %arg11[%c0_3, %c0_4] : memref<4x8xbf16, #tpu.memory_space<vmem>>, vector<4x8xbf16>
    %cst = arith.constant dense<0.000000e+00> : vector<256x8xf32>
    %5 = tpu.matmul %3, %4, %cst {dimension_numbers = #tpu.dot_dimension_numbers<[1], [0], [0], [1], [0, 0, 1, 1], [], []>} : vector<256x4xbf16>, vector<4x8xbf16>, vector<256x8xf32> -> vector<256x8xf32>
    %c0_5 = arith.constant 0 : index
    %c0_6 = arith.constant 0 : index
    %6 = vector.load %arg12[%c0_5, %c0_6] : memref<1x8xf32, #tpu.memory_space<vmem>>, vector<1x8xf32>
    %7 = vector.broadcast %6 : vector<1x8xf32> to vector<256x8xf32>
    %8 = arith.mulf %5, %7 : vector<256x8xf32>
    %c0_7 = arith.constant 0 : index
    %c0_8 = arith.constant 0 : index
    %9 = vector.load %arg13[%c0_7, %c0_8] : memref<1x8xf32, #tpu.memory_space<vmem>>, vector<1x8xf32>
    %10 = vector.broadcast %9 : vector<1x8xf32> to vector<256x8xf32>
    %11 = arith.addf %8, %10 : vector<256x8xf32>
    %12 = vector.shape_cast %11 : vector<256x8xf32> to vector<16x16x8xf32>
    %c0_9 = arith.constant 0 : index
    %c0_10 = arith.constant 0 : index
    %c0_11 = arith.constant 0 : index
    %c0_12 = arith.constant 0 : index
    %13 = vector.load %arg14[%c0_9, %c0_10, %c0_11, %c0_12] : memref<1x16x16x8xf32, #tpu.memory_space<vmem>>, vector<1x16x16x8xf32>
    %14 = vector.shape_cast %13 : vector<1x16x16x8xf32> to vector<16x16x8xf32>
    %15 = vector.shape_cast %12 : vector<16x16x8xf32> to vector<1x16x16x8xf32>
    tpu.vector_store %arg14[%c0_9, %c0_10, %c0_11, %c0_12], %15 {strides = array<i32>} : memref<1x16x16x8xf32, #tpu.memory_space<vmem>>, vector<1x16x16x8xf32>,
    %c0_13 = arith.constant 0 : index
    %c0_14 = arith.constant 0 : index
    %16 = vector.load %arg2[%c0_13, %c0_14] : memref<4x4xbf16, #tpu.memory_space<vmem>>, vector<4x4xbf16>
    %cst_15 = arith.constant dense<0.000000e+00> : vector<256x4xf32>
    %17 = tpu.matmul %3, %16, %cst_15 {dimension_numbers = #tpu.dot_dimension_numbers<[1], [0], [0], [1], [0, 0, 1, 1], [], []>} : vector<256x4xbf16>, vector<4x4xbf16>, vector<256x4xf32> -> vector<256x4xf32>
    %c0_16 = arith.constant 0 : index
    %c0_17 = arith.constant 0 : index
    %18 = vector.load %arg5[%c0_16, %c0_17] : memref<1x4xf32, #tpu.memory_space<vmem>>, vector<1x4xf32>
    %19 = vector.broadcast %18 : vector<1x4xf32> to vector<256x4xf32>
    %20 = arith.mulf %17, %19 : vector<256x4xf32>
    %c0_18 = arith.constant 0 : index
    %c0_19 = arith.constant 0 : index
    %21 = vector.load %arg6[%c0_18, %c0_19] : memref<1x4xf32, #tpu.memory_space<vmem>>, vector<1x4xf32>
    %22 = vector.broadcast %21 : vector<1x4xf32> to vector<256x4xf32>
    %23 = arith.addf %20, %22 : vector<256x4xf32>
    %cst_20 = arith.constant 0.000000e+00 : f32
    %24 = vector.broadcast %cst_20 : f32 to vector<256x4xf32>
    %25 = arith.maximumf %23, %24 : vector<256x4xf32>
    %cst_21 = arith.constant 0.000000e+00 : f32
    %26 = vector.broadcast %cst_21 : f32 to vector<1x18x4xf32>
    %cst_22 = arith.constant 0.000000e+00 : f32
    %27 = vector.broadcast %cst_22 : f32 to vector<18x1x4xf32>
    %c0_23 = arith.constant 0 : index
    %c0_24 = arith.constant 0 : index
    %c0_25 = arith.constant 0 : index
    %28 = vector.load %arg15[%c0_23, %c0_24, %c0_25] : memref<18x18x4xf32, #tpu.memory_space<vmem>>, vector<1x18x4xf32>
    tpu.vector_store %arg15[%c0_23, %c0_24, %c0_25], %26 {strides = array<i32>} : memref<18x18x4xf32, #tpu.memory_space<vmem>>, vector<1x18x4xf32>,
    %c17 = arith.constant 17 : index
    %c0_26 = arith.constant 0 : index
    %c0_27 = arith.constant 0 : index
    %29 = vector.load %arg15[%c17, %c0_26, %c0_27] : memref<18x18x4xf32, #tpu.memory_space<vmem>>, vector<1x18x4xf32>
    tpu.vector_store %arg15[%c17, %c0_26, %c0_27], %26 {strides = array<i32>} : memref<18x18x4xf32, #tpu.memory_space<vmem>>, vector<1x18x4xf32>,
    %c0_28 = arith.constant 0 : index
    %c0_29 = arith.constant 0 : index
    %c0_30 = arith.constant 0 : index
    %30 = vector.load %arg15[%c0_28, %c0_29, %c0_30] : memref<18x18x4xf32, #tpu.memory_space<vmem>>, vector<18x1x4xf32>
    tpu.vector_store %arg15[%c0_28, %c0_29, %c0_30], %27 {strides = array<i32>} : memref<18x18x4xf32, #tpu.memory_space<vmem>>, vector<18x1x4xf32>,
    %c0_31 = arith.constant 0 : index
    %c17_32 = arith.constant 17 : index
    %c0_33 = arith.constant 0 : index
    %31 = vector.load %arg15[%c0_31, %c17_32, %c0_33] : memref<18x18x4xf32, #tpu.memory_space<vmem>>, vector<18x1x4xf32>
    tpu.vector_store %arg15[%c0_31, %c17_32, %c0_33], %27 {strides = array<i32>} : memref<18x18x4xf32, #tpu.memory_space<vmem>>, vector<18x1x4xf32>,
    %32 = vector.shape_cast %25 : vector<256x4xf32> to vector<16x16x4xf32>
    %c1 = arith.constant 1 : index
    %c1_34 = arith.constant 1 : index
    %c0_35 = arith.constant 0 : index
    %33 = vector.load %arg15[%c1, %c1_34, %c0_35] : memref<18x18x4xf32, #tpu.memory_space<vmem>>, vector<16x16x4xf32>
    tpu.vector_store %arg15[%c1, %c1_34, %c0_35], %32 {strides = array<i32>} : memref<18x18x4xf32, #tpu.memory_space<vmem>>, vector<16x16x4xf32>,
    %cst_36 = arith.constant 0.000000e+00 : f32
    %34 = vector.broadcast %cst_36 : f32 to vector<256x4xf32>
    %c0_37 = arith.constant 0 : index
    %c0_38 = arith.constant 0 : index
    %c0_39 = arith.constant 0 : index
    %35 = vector.load %arg15[%c0_37, %c0_38, %c0_39] : memref<18x18x4xf32, #tpu.memory_space<vmem>>, vector<16x18x4xf32>
    %36 = vector.extract_strided_slice %35 {offsets = [0, 0, 0], sizes = [16, 16, 4], strides = [1, 1, 1]} : vector<16x18x4xf32> to vector<16x16x4xf32>
    %37 = vector.extract_strided_slice %35 {offsets = [0, 1, 0], sizes = [16, 16, 4], strides = [1, 1, 1]} : vector<16x18x4xf32> to vector<16x16x4xf32>
    %38 = vector.extract_strided_slice %35 {offsets = [0, 2, 0], sizes = [16, 16, 4], strides = [1, 1, 1]} : vector<16x18x4xf32> to vector<16x16x4xf32>
    %39 = tpu.concatenate %36, %37, %38 in 2 : vector<16x16x4xf32>, vector<16x16x4xf32>, vector<16x16x4xf32> -> vector<16x16x12xf32>
    %40 = vector.shape_cast %39 : vector<16x16x12xf32> to vector<256x12xf32>
    %41 = arith.truncf %40 : vector<256x12xf32> to vector<256x12xbf16>
    %c0_40 = arith.constant 0 : index
    %c0_41 = arith.constant 0 : index
    %c0_42 = arith.constant 0 : index
    %42 = vector.load %arg3[%c0_40, %c0_41, %c0_42] : memref<3x12x4xbf16, #tpu.memory_space<vmem>>, vector<1x12x4xbf16>
    %43 = vector.shape_cast %42 : vector<1x12x4xbf16> to vector<12x4xbf16>
    %cst_43 = arith.constant dense<0.000000e+00> : vector<256x4xf32>
    %44 = tpu.matmul %41, %43, %cst_43 {dimension_numbers = #tpu.dot_dimension_numbers<[1], [0], [0], [1], [0, 0, 1, 1], [], []>} : vector<256x12xbf16>, vector<12x4xbf16>, vector<256x4xf32> -> vector<256x4xf32>
    %45 = arith.addf %34, %44 : vector<256x4xf32>
    %c1_44 = arith.constant 1 : index
    %c0_45 = arith.constant 0 : index
    %c0_46 = arith.constant 0 : index
    %46 = vector.load %arg15[%c1_44, %c0_45, %c0_46] : memref<18x18x4xf32, #tpu.memory_space<vmem>>, vector<16x18x4xf32>
    %47 = vector.extract_strided_slice %46 {offsets = [0, 0, 0], sizes = [16, 16, 4], strides = [1, 1, 1]} : vector<16x18x4xf32> to vector<16x16x4xf32>
    %48 = vector.extract_strided_slice %46 {offsets = [0, 1, 0], sizes = [16, 16, 4], strides = [1, 1, 1]} : vector<16x18x4xf32> to vector<16x16x4xf32>
    %49 = vector.extract_strided_slice %46 {offsets = [0, 2, 0], sizes = [16, 16, 4], strides = [1, 1, 1]} : vector<16x18x4xf32> to vector<16x16x4xf32>
    %50 = tpu.concatenate %47, %48, %49 in 2 : vector<16x16x4xf32>, vector<16x16x4xf32>, vector<16x16x4xf32> -> vector<16x16x12xf32>
    %51 = vector.shape_cast %50 : vector<16x16x12xf32> to vector<256x12xf32>
    %52 = arith.truncf %51 : vector<256x12xf32> to vector<256x12xbf16>
    %c1_47 = arith.constant 1 : index
    %c0_48 = arith.constant 0 : index
    %c0_49 = arith.constant 0 : index
    %53 = vector.load %arg3[%c1_47, %c0_48, %c0_49] : memref<3x12x4xbf16, #tpu.memory_space<vmem>>, vector<1x12x4xbf16>
    %54 = vector.shape_cast %53 : vector<1x12x4xbf16> to vector<12x4xbf16>
    %cst_50 = arith.constant dense<0.000000e+00> : vector<256x4xf32>
    %55 = tpu.matmul %52, %54, %cst_50 {dimension_numbers = #tpu.dot_dimension_numbers<[1], [0], [0], [1], [0, 0, 1, 1], [], []>} : vector<256x12xbf16>, vector<12x4xbf16>, vector<256x4xf32> -> vector<256x4xf32>
    %56 = arith.addf %45, %55 : vector<256x4xf32>
    %c2 = arith.constant 2 : index
    %c0_51 = arith.constant 0 : index
    %c0_52 = arith.constant 0 : index
    %57 = vector.load %arg15[%c2, %c0_51, %c0_52] : memref<18x18x4xf32, #tpu.memory_space<vmem>>, vector<16x18x4xf32>
    %58 = vector.extract_strided_slice %57 {offsets = [0, 0, 0], sizes = [16, 16, 4], strides = [1, 1, 1]} : vector<16x18x4xf32> to vector<16x16x4xf32>
    %59 = vector.extract_strided_slice %57 {offsets = [0, 1, 0], sizes = [16, 16, 4], strides = [1, 1, 1]} : vector<16x18x4xf32> to vector<16x16x4xf32>
    %60 = vector.extract_strided_slice %57 {offsets = [0, 2, 0], sizes = [16, 16, 4], strides = [1, 1, 1]} : vector<16x18x4xf32> to vector<16x16x4xf32>
    %61 = tpu.concatenate %58, %59, %60 in 2 : vector<16x16x4xf32>, vector<16x16x4xf32>, vector<16x16x4xf32> -> vector<16x16x12xf32>
    %62 = vector.shape_cast %61 : vector<16x16x12xf32> to vector<256x12xf32>
    %63 = arith.truncf %62 : vector<256x12xf32> to vector<256x12xbf16>
    %c2_53 = arith.constant 2 : index
    %c0_54 = arith.constant 0 : index
    %c0_55 = arith.constant 0 : index
    %64 = vector.load %arg3[%c2_53, %c0_54, %c0_55] : memref<3x12x4xbf16, #tpu.memory_space<vmem>>, vector<1x12x4xbf16>
    %65 = vector.shape_cast %64 : vector<1x12x4xbf16> to vector<12x4xbf16>
    %cst_56 = arith.constant dense<0.000000e+00> : vector<256x4xf32>
    %66 = tpu.matmul %63, %65, %cst_56 {dimension_numbers = #tpu.dot_dimension_numbers<[1], [0], [0], [1], [0, 0, 1, 1], [], []>} : vector<256x12xbf16>, vector<12x4xbf16>, vector<256x4xf32> -> vector<256x4xf32>
    %67 = arith.addf %56, %66 : vector<256x4xf32>
    %c0_57 = arith.constant 0 : index
    %c0_58 = arith.constant 0 : index
    %68 = vector.load %arg7[%c0_57, %c0_58] : memref<1x4xf32, #tpu.memory_space<vmem>>, vector<1x4xf32>
    %69 = vector.broadcast %68 : vector<1x4xf32> to vector<256x4xf32>
    %70 = arith.mulf %67, %69 : vector<256x4xf32>
    %c0_59 = arith.constant 0 : index
    %c0_60 = arith.constant 0 : index
    %71 = vector.load %arg8[%c0_59, %c0_60] : memref<1x4xf32, #tpu.memory_space<vmem>>, vector<1x4xf32>
    %72 = vector.broadcast %71 : vector<1x4xf32> to vector<256x4xf32>
    %73 = arith.addf %70, %72 : vector<256x4xf32>
    %cst_61 = arith.constant 0.000000e+00 : f32
    %74 = vector.broadcast %cst_61 : f32 to vector<256x4xf32>
    %75 = arith.maximumf %73, %74 : vector<256x4xf32>
    %76 = arith.truncf %75 : vector<256x4xf32> to vector<256x4xbf16>
    %c0_62 = arith.constant 0 : index
    %c0_63 = arith.constant 0 : index
    %77 = vector.load %arg4[%c0_62, %c0_63] : memref<4x8xbf16, #tpu.memory_space<vmem>>, vector<4x8xbf16>
    %cst_64 = arith.constant dense<0.000000e+00> : vector<256x8xf32>
    %78 = tpu.matmul %76, %77, %cst_64 {dimension_numbers = #tpu.dot_dimension_numbers<[1], [0], [0], [1], [0, 0, 1, 1], [], []>} : vector<256x4xbf16>, vector<4x8xbf16>, vector<256x8xf32> -> vector<256x8xf32>
    %c0_65 = arith.constant 0 : index
    %c0_66 = arith.constant 0 : index
    %79 = vector.load %arg9[%c0_65, %c0_66] : memref<1x8xf32, #tpu.memory_space<vmem>>, vector<1x8xf32>
    %80 = vector.broadcast %79 : vector<1x8xf32> to vector<256x8xf32>
    %81 = arith.mulf %78, %80 : vector<256x8xf32>
    %c0_67 = arith.constant 0 : index
    %c0_68 = arith.constant 0 : index
    %82 = vector.load %arg10[%c0_67, %c0_68] : memref<1x8xf32, #tpu.memory_space<vmem>>, vector<1x8xf32>
    %83 = vector.broadcast %82 : vector<1x8xf32> to vector<256x8xf32>
    %84 = arith.addf %81, %83 : vector<256x8xf32>
    %c0_69 = arith.constant 0 : index
    %c0_70 = arith.constant 0 : index
    %c0_71 = arith.constant 0 : index
    %c0_72 = arith.constant 0 : index
    %85 = vector.load %arg14[%c0_69, %c0_70, %c0_71, %c0_72] : memref<1x16x16x8xf32, #tpu.memory_space<vmem>>, vector<1x16x16x8xf32>
    %86 = vector.shape_cast %85 : vector<1x16x16x8xf32> to vector<16x16x8xf32>
    %87 = vector.shape_cast %86 : vector<16x16x8xf32> to vector<256x8xf32>
    %88 = arith.addf %84, %87 : vector<256x8xf32>
    %cst_73 = arith.constant 0.000000e+00 : f32
    %89 = vector.broadcast %cst_73 : f32 to vector<256x8xf32>
    %90 = arith.maximumf %88, %89 : vector<256x8xf32>
    %91 = vector.shape_cast %90 : vector<256x8xf32> to vector<16x16x8xf32>
    %c0_74 = arith.constant 0 : index
    %c0_75 = arith.constant 0 : index
    %c0_76 = arith.constant 0 : index
    %c0_77 = arith.constant 0 : index
    %92 = vector.load %arg14[%c0_74, %c0_75, %c0_76, %c0_77] : memref<1x16x16x8xf32, #tpu.memory_space<vmem>>, vector<1x16x16x8xf32>
    %93 = vector.shape_cast %92 : vector<1x16x16x8xf32> to vector<16x16x8xf32>
    %94 = vector.shape_cast %91 : vector<16x16x8xf32> to vector<1x16x16x8xf32>
    tpu.vector_store %arg14[%c0_74, %c0_75, %c0_76, %c0_77], %94 {strides = array<i32>} : memref<1x16x16x8xf32, #tpu.memory_space<vmem>>, vector<1x16x16x8xf32>,
    return
  }
  func.func @transform_0(%arg0: i32) -> (i32, i32, i32, i32) {
    %c0_i32 = arith.constant 0 : i32
    %c0_i32_0 = arith.constant 0 : i32
    %c0_i32_1 = arith.constant 0 : i32
    %c0_i32_2 = arith.constant 0 : i32
    return %arg0, %c0_i32, %c0_i32_0, %c0_i32_1 : i32, i32, i32, i32
  }
  func.func @transform_1(%arg0: i32) -> (i32, i32) {
    %c0_i32 = arith.constant 0 : i32
    %c0_i32_0 = arith.constant 0 : i32
    %c0_i32_1 = arith.constant 0 : i32
    return %c0_i32, %c0_i32_0 : i32, i32
  }
  func.func @transform_2(%arg0: i32) -> (i32, i32, i32) {
    %c0_i32 = arith.constant 0 : i32
    %c0_i32_0 = arith.constant 0 : i32
    %c0_i32_1 = arith.constant 0 : i32
    %c0_i32_2 = arith.constant 0 : i32
    return %c0_i32, %c0_i32_0, %c0_i32_1 : i32, i32, i32
  }
  func.func @transform_3(%arg0: i32) -> (i32, i32) {
    %c0_i32 = arith.constant 0 : i32
    %c0_i32_0 = arith.constant 0 : i32
    %c0_i32_1 = arith.constant 0 : i32
    return %c0_i32, %c0_i32_0 : i32, i32
  }
  func.func @transform_4(%arg0: i32) -> (i32, i32) {
    %c0_i32 = arith.constant 0 : i32
    %c0_i32_0 = arith.constant 0 : i32
    %c0_i32_1 = arith.constant 0 : i32
    return %c0_i32, %c0_i32_0 : i32, i32
  }
  func.func @transform_5(%arg0: i32) -> (i32, i32) {
    %c0_i32 = arith.constant 0 : i32
    %c0_i32_0 = arith.constant 0 : i32
    %c0_i32_1 = arith.constant 0 : i32
    return %c0_i32, %c0_i32_0 : i32, i32
  }
  func.func @transform_6(%arg0: i32) -> (i32, i32) {
    %c0_i32 = arith.constant 0 : i32
    %c0_i32_0 = arith.constant 0 : i32
    %c0_i32_1 = arith.constant 0 : i32
    return %c0_i32, %c0_i32_0 : i32, i32
  }
  func.func @transform_7(%arg0: i32) -> (i32, i32) {
    %c0_i32 = arith.constant 0 : i32
    %c0_i32_0 = arith.constant 0 : i32
    %c0_i32_1 = arith.constant 0 : i32
    return %c0_i32, %c0_i32_0 : i32, i32
  }
  func.func @transform_8(%arg0: i32) -> (i32, i32) {
    %c0_i32 = arith.constant 0 : i32
    %c0_i32_0 = arith.constant 0 : i32
    %c0_i32_1 = arith.constant 0 : i32
    return %c0_i32, %c0_i32_0 : i32, i32
  }
  func.func @transform_9(%arg0: i32) -> (i32, i32) {
    %c0_i32 = arith.constant 0 : i32
    %c0_i32_0 = arith.constant 0 : i32
    %c0_i32_1 = arith.constant 0 : i32
    return %c0_i32, %c0_i32_0 : i32, i32
  }
  func.func @transform_10(%arg0: i32) -> (i32, i32) {
    %c0_i32 = arith.constant 0 : i32
    %c0_i32_0 = arith.constant 0 : i32
    %c0_i32_1 = arith.constant 0 : i32
    return %c0_i32, %c0_i32_0 : i32, i32
  }
  func.func @transform_11(%arg0: i32) -> (i32, i32) {
    %c0_i32 = arith.constant 0 : i32
    %c0_i32_0 = arith.constant 0 : i32
    %c0_i32_1 = arith.constant 0 : i32
    return %c0_i32, %c0_i32_0 : i32, i32
  }
  func.func @transform_12(%arg0: i32) -> (i32, i32) {
    %c0_i32 = arith.constant 0 : i32
    %c0_i32_0 = arith.constant 0 : i32
    %c0_i32_1 = arith.constant 0 : i32
    return %c0_i32, %c0_i32_0 : i32, i32
  }
  func.func @transform_13(%arg0: i32) -> (i32, i32, i32, i32) {
    %c0_i32 = arith.constant 0 : i32
    %c0_i32_0 = arith.constant 0 : i32
    %c0_i32_1 = arith.constant 0 : i32
    %c0_i32_2 = arith.constant 0 : i32
    return %arg0, %c0_i32, %c0_i32_0, %c0_i32_1 : i32, i32, i32, i32
  }
}

</mosaic_0001>

<bundles_post_ra>
// kernel: tpu_custom_call.1
= control target key start
LH: loop header
LB: loop body
LE: loop exit
PB: predicated region body
PF: predicated region fallthrough
CT: control target
= control target key end

     0   :  { %s4336_s25 = smov 0   ;;  %s6196_s0 = inlined_call_operand.vmem [shape: f32[2,16,16,4], index: 0, kind: input, shape index: {}]   ;;  %s6197_s1 = inlined_call_operand.vmem [shape: bf16[4,4], index: 1, kind: input, shape index: {}]   ;;  %s6198_s2 = inlined_call_operand.vmem [shape: bf16[3,12,4], index: 2, kind: input, shape index: {}]   ;;  %s6199_s3 = inlined_call_operand.vmem [shape: bf16[4,8], index: 3, kind: input, shape index: {}]   ;;  %s6200_s4 = inlined_call_operand.vmem [shape: f32[1,4], index: 4, kind: input, shape index: {}]   ;;  %s6201_s5 = inlined_call_operand.vmem [shape: f32[1,4], index: 5, kind: input, shape index: {}]   ;;  %s6202_s6 = inlined_call_operand.vmem [shape: f32[1,4], index: 6, kind: input, shape index: {}]   ;;  %s6203_s7 = inlined_call_operand.vmem [shape: f32[1,4], index: 7, kind: input, shape index: {}]   ;;  %s6204_s8 = inlined_call_operand.vmem [shape: f32[1,8], index: 8, kind: input, shape index: {}]   ;;  %s6205_s9 = inlined_call_operand.vmem [shape: f32[1,8], index: 9, kind: input, shape index: {}]   ;;  %s6206_s10 = inlined_call_operand.vmem [shape: bf16[4,8], index: 10, kind: input, shape index: {}]   ;;  %s6207_s11 = inlined_call_operand.vmem [shape: f32[1,8], index: 11, kind: input, shape index: {}]   ;;  %s6208_s12 = inlined_call_operand.vmem [shape: f32[1,8], index: 12, kind: input, shape index: {}]   ;;  %s6209_s13 = inlined_call_operand.vmem [shape: f32[2,16,16,8], index: 13, kind: output, shape index: {}]  }
   0x1 LB: > { %s3592_s26 = sadd.s32 4294967295, %s4261_s25   ;;  %p3596_p0 = scmp.ge.s32.totalorder %s4261_s25, 1  ;;  %s4261_s25 = sphi %s4336_s25, %s23_s25  }
   0x2   : > { %p387_p1 = scmp.lt.s32.totalorder %s4261_s25, 3 }
   0x4   : > { %p388_p2 = pnand %p3596_p0, %p387_p1 }
   0x5   : > { %p431_p3 = scmp.lt.s32.totalorder (!%p388_p2), %s3592_s26, 1  ;;  %s4264_s18 = smov (!%p388_p2), 8  }
   0x6   : > { %391 = sbr.rel (%p388_p2) target bundleno = 835 (0x343), region = 72  ;;  %s4265_s19 = smov (!%p388_p2), 4  }
   0xb   : > { %vm540_vm0 = vcmask 1041408   ;;  %v738_v0 = vld [vmem:[%s6197_s1] sm:$0x3]  ;;  %s6211_s26 = smov (!%p431_p3, %s3592_s26), 1  ;;  %vm491_vm1 = vcmask 31744   ;;  %vm937_vm2 = vcmask 25600  }
   0xc   : > { %v740_v1 = vsel %vm540_vm0, %v738_v0, 0  ;;  %s3715_s29 = sshll.u32 %s6211_s26, 8  ;;  %v4263_v29 = vmov 0.0   ;;  %vm943_vm3 = vcmask 24576   ;;  %v490_v34 = vld [vmem:[%s6206_s10] sm:$0x3] }
   0xd   : > { %749 = vmatpush.bf16.msra.mxu1 %v740_v1  ;;  %3721 = vmatpush.bf16.msra.mxu3 %v740_v1  ;;  %s4356_s15 = scalar_lea.vmem %s6196_s0, %s3715_s29  ;;  %935 = vst.msk [vmem:[#allocation2] sm:$0xff] %vm491_vm1, %v4263_v29  ;;  %v542_v35 = vsel %vm540_vm0, %v490_v34, 0  ;;  %vm1286_vm4 = vcmask 1045504   ;;  %vm1109_vm5 = vcmask 1046528   ;;  %v4489_v53 = vld [vmem:[%s6200_s4] ss:$0 sm:$0xff]  ;;  %s4868_s17 = scalar_lea.vmem %s6209_s13, %s3715_s29 }
   0xe   : > { %v442_v2 = vld [vmem:[%s4356_s15] sm:$0xff]  ;;  %v443_v3 = vld [vmem:[%s4356_s15 + $0x8] sm:$0xff]  ;;  %v444_v5 = vld [vmem:[%s4356_s15 + $0x10] sm:$0xff]  ;;  %936 = vst.msk [vmem:[#allocation2 + $0x8] sm:$0xff] %vm491_vm1, %v4263_v29  ;;  %551 = vmatpush.bf16.msra.mxu0 %v542_v35  ;;  %3720 = vmatpush.bf16.msra.mxu2 %v542_v35  ;;  %vm705_vm6 = vcmask 64512   ;;  %vm2081_vm7 = vcmask 97280  }
   0xf   : > { %v4360_v4 = vpack.c.bf16 %v443_v3, %v442_v2  ;;  %v445_v6 = vld [vmem:[%s4356_s15 + $0x18] sm:$0xff]  ;;  %v446_v8 = vld [vmem:[%s4356_s15 + $0x20] sm:$0xff]  ;;  %v447_v9 = vld [vmem:[%s4356_s15 + $0x28] sm:$0xff]  ;;  %938 = vst.msk [vmem:[#allocation2 + $0x10] sm:$0x3] %vm937_vm2, %v4263_v29 }
  0x10   : > { %v4366_v7 = vpack.c.bf16 %v445_v6, %v444_v5  ;;  %v4372_v10 = vpack.c.bf16 %v447_v9, %v446_v8  ;;  %v448_v11 = vld [vmem:[%s4356_s15 + $0x30] sm:$0xff]  ;;  %v449_v12 = vld [vmem:[%s4356_s15 + $0x38] sm:$0xff]  ;;  %v450_v14 = vld [vmem:[%s4356_s15 + $0x40] sm:$0xff]  ;;  %942 = vst.msk [vmem:[#allocation2 + $0x1a8] sm:$0x3] %vm937_vm2, %v4263_v29 }
  0x11   : > { %3617 = vmatmul.msk.bf16.vlgmr.msra.gmra.mxu1 %vm491_vm1, %v4360_v4  ;;  %v4378_v13 = vpack.c.bf16 %v449_v12, %v448_v11  ;;  %v451_v15 = vld [vmem:[%s4356_s15 + $0x48] sm:$0xff]  ;;  %v452_v17 = vld [vmem:[%s4356_s15 + $0x50] sm:$0xff]  ;;  %v453_v18 = vld [vmem:[%s4356_s15 + $0x58] sm:$0xff]  ;;  %944 = vst.msk [vmem:[#allocation2] sm:$0x1] %vm943_vm3, %v4263_v29  ;;  %3601 = vmatmul.msk.bf16.vlgmr.msra.gmra.mxu0 %vm491_vm1, %v4360_v4 }
  0x12   : > { %v4384_v16 = vpack.c.bf16 %v451_v15, %v450_v14  ;;  %v4390_v19 = vpack.c.bf16 %v453_v18, %v452_v17  ;;  %v458_v20 = vld [vmem:[%s4356_s15 + $0x80] sm:$0xff]  ;;  %v459_v21 = vld [vmem:[%s4356_s15 + $0x88] sm:$0xff]  ;;  %v460_v26 = vld [vmem:[%s4356_s15 + $0x90] sm:$0xff]  ;;  %962 = vst.msk [vmem:[#allocation2 + $0x11] sm:$0x1] %vm943_vm3, %v4263_v29 }
  0x13   : > { %v482_v22 = vpack.c.bf16 %v459_v21, %v458_v20  ;;  %v454_v23 = vld [vmem:[%s4356_s15 + $0x60] sm:$0xff]  ;;  %v455_v24 = vld [vmem:[%s4356_s15 + $0x68] sm:$0xff]  ;;  %v461_v27 = vld [vmem:[%s4356_s15 + $0x98] sm:$0xff]  ;;  %940 = vst.msk [vmem:[#allocation2 + $0x198] sm:$0xff] %vm491_vm1, %v4263_v29 }
  0x14   : > { %v4399_v25 = vpack.c.bf16 %v455_v24, %v454_v23  ;;  %v4405_v28 = vpack.c.bf16 %v461_v27, %v460_v26  ;;  %v456_v30 = vld [vmem:[%s4356_s15 + $0x70] sm:$0xff]  ;;  %v457_v31 = vld [vmem:[%s4356_s15 + $0x78] sm:$0xff]  ;;  %941 = vst.msk [vmem:[#allocation2 + $0x1a0] sm:$0xff] %vm491_vm1, %v4263_v29  ;;  %v462_v44 = vld [vmem:[%s4356_s15 + $0xa0] sm:$0xff] }
  0x15   : > { %3625 = vmatmul.msk.bf16.vlgmr.msra.gmra.mxu3 %vm491_vm1, %v482_v22  ;;  %v4425_v32 = vld [vmem:[#allocation2 + $0x8] sm:$0xff]  ;;  %945 = vst.msk [vmem:[#allocation2 + $0x18] sm:$0x1] %vm943_vm3, %v4263_v29  ;;  %v4429_v33 = vpack.c.bf16 %v457_v31, %v456_v30  ;;  %3609 = vmatmul.msk.bf16.vlgmr.msra.gmra.mxu2 %vm491_vm1, %v482_v22  ;;  %v4496_v54 = vld [vmem:[%s6201_s5] ss:$0 sm:$0xff]  ;;  %v464_v2 = vld [vmem:[%s4356_s15 + $0xb0] sm:$0xff] }
  0x16   : > { %946 = vst.msk [vmem:[#allocation2 + $0x30] sm:$0x1] %vm943_vm3, %v4263_v29  ;;  %v1288_v36 = vrot.slane %v4425_v32, 2  ;;  %v1111_v37 = vrot.slane %v4425_v32, 1  ;;  %v463_v45 = vld [vmem:[%s4356_s15 + $0xa8] sm:$0xff]  ;;  %v465_v3 = vld [vmem:[%s4356_s15 + $0xb8] sm:$0xff] }
  0x17   : > { %947 = vst.msk [vmem:[#allocation2 + $0x48] sm:$0x1] %vm943_vm3, %v4263_v29  ;;  %v4462_v48 = vpack.c.bf16 %v463_v45, %v462_v44  ;;  %v3637_v55 = vld [vmem:[%s6198_s2 + $0x8] sm:$0xf]  ;;  %v3718_v56 = vld [vmem:[%s6198_s2 + $0x8] sm:$0x30]  ;;  %v4532_v4 = vpack.c.bf16 %v465_v3, %v464_v2 }
  0x18   : > { %v4441_v38 = vld [vmem:[#allocation2] sm:$0xff]  ;;  %948 = vst.msk [vmem:[#allocation2 + $0x60] sm:$0x1] %vm943_vm3, %v4263_v29  ;;  %v3638_v58 = vor.u32 %v3718_v56, %v3637_v55  ;;  %v3679_v6 = vld [vmem:[%s6198_s2 + $0x10] sm:$0xf]  ;;  %v467_v35 = vld [vmem:[%s4356_s15 + $0xc8] sm:$0xff] }
  0x19   : > { %v1015_v39 = vld [vmem:[#allocation2 + $0x10] sm:$0x3]  ;;  %v1287_v40 = vrot.slane %v4441_v38, 2  ;;  %949 = vst.msk [vmem:[#allocation2 + $0x78] sm:$0x1] %vm943_vm3, %v4263_v29  ;;  %v1110_v41 = vrot.slane %v4441_v38, 1 }
  0x1a   : > { %v1290_v42 = vrot.slane %v1015_v39, 2  ;;  %950 = vst.msk [vmem:[#allocation2 + $0x90] sm:$0x1] %vm943_vm3, %v4263_v29  ;;  %v1113_v43 = vrot.slane %v1015_v39, 1  ;;  %v3657_v59 = vld [vmem:[%s6198_s2] sm:$0xf] }
  0x1b   : > { %v1289_v46 = vsel %vm1286_vm4, %v1287_v40, %v1288_v36  ;;  %951 = vst.msk [vmem:[#allocation2 + $0xa8] sm:$0x1] %vm943_vm3, %v4263_v29  ;;  %v1112_v47 = vsel %vm1109_vm5, %v1110_v41, %v1111_v37  ;;  %v3717_v60 = vld [vmem:[%s6198_s2] sm:$0x30]  ;;  %v2131_v63 = vsel %vm1286_vm4, %v3638_v58, 0 }
  0x1c   : > { %v1291_v49 = vsel %vm1286_vm4, %v1288_v36, %v1290_v42  ;;  %952 = vst.msk [vmem:[#allocation2 + $0xc0] sm:$0x1] %vm943_vm3, %v4263_v29  ;;  %v1114_v50 = vsel %vm1109_vm5, %v1111_v37, %v1113_v43  ;;  %v3658_v62 = vor.u32 %v3717_v60, %v3657_v59  ;;  %2140 = vmatpush.bf16.msrb.mxu2 %v2131_v63  ;;  %v466_v31 = vld [vmem:[%s4356_s15 + $0xc0] sm:$0xff] }
  0x1d   : > { %v3743_v51 = vpack.i.bf16 %v1291_v49, %v1289_v46  ;;  %953 = vst.msk [vmem:[#allocation2 + $0xd8] sm:$0x1] %vm943_vm3, %v4263_v29  ;;  %v3733_v52 = vpack.i.bf16 %v1114_v50, %v1112_v47  ;;  %v4602_v44 = vpack.c.bf16 %v467_v35, %v466_v31 }
  0x1e   : > { %954 = vst.msk [vmem:[#allocation2 + $0xf0] sm:$0x1] %vm943_vm3, %v4263_v29  ;;  %v2276_v1 = vsel %vm1286_vm4, %v3658_v62, 0 }
  0x1f   : > { %3744 = vrot.lane.b32.xlu1 %v3743_v51, %s4264_s18  ;;  %955 = vst.msk [vmem:[#allocation2 + $0x108] sm:$0x1] %vm943_vm3, %v4263_v29  ;;  %3734 = vrot.lane.b32.xlu0 %v3733_v52, %s4265_s19 }
  0x20   : > { %956 = vst.msk [vmem:[#allocation2 + $0x120] sm:$0x1] %vm943_vm3, %v4263_v29  ;;  %2285 = vmatpush.bf16.msrb.mxu3 %v2276_v1 }
  0x21   : > { %3618 = vmatmul.msk.bf16.gmra.mxu1 %vm491_vm1, %v4366_v7  ;;  %957 = vst.msk [vmem:[#allocation2 + $0x138] sm:$0x1] %vm943_vm3, %v4263_v29  ;;  %3602 = vmatmul.msk.bf16.gmra.mxu0 %vm491_vm1, %v4366_v7  ;;  %v3719_v7 = vld [vmem:[%s6198_s2 + $0x10] sm:$0x30] }
  0x22   : > { %958 = vst.msk [vmem:[#allocation2 + $0x150] sm:$0x1] %vm943_vm3, %v4263_v29  ;;  %v3680_v9 = vor.u32 %v3719_v7, %v3679_v6 }
  0x23   : > { %959 = vst.msk [vmem:[#allocation2 + $0x168] sm:$0x1] %vm943_vm3, %v4263_v29 }
  0x24   : > { %960 = vst.msk [vmem:[#allocation2 + $0x180] sm:$0x1] %vm943_vm3, %v4263_v29  ;;  %v2953_v12 = vsel %vm1286_vm4, %v3680_v9, 0  ;;  %v468_v9 = vld [vmem:[%s4356_s15 + $0xd0] sm:$0xff] }
  0x25   : > { %3626 = vmatmul.msk.bf16.gmra.mxu3 %vm491_vm1, %v4405_v28  ;;  %963 = vst.msk [vmem:[#allocation2 + $0x29] sm:$0x1] %vm943_vm3, %v4263_v29  ;;  %3610 = vmatmul.msk.bf16.gmra.mxu2 %vm491_vm1, %v4405_v28 }
  0x26   : > { %964 = vst.msk [vmem:[#allocation2 + $0x41] sm:$0x1] %vm943_vm3, %v4263_v29  ;;  %2962 = vmatpush.bf16.msrb.mxu0 %v2953_v12 }
  0x27   : > { %965 = vst.msk [vmem:[#allocation2 + $0x59] sm:$0x1] %vm943_vm3, %v4263_v29 }
  0x28   : > { %966 = vst.msk [vmem:[#allocation2 + $0x71] sm:$0x1] %vm943_vm3, %v4263_v29 }
  0x29   : > { %967 = vst.msk [vmem:[#allocation2 + $0x89] sm:$0x1] %vm943_vm3, %v4263_v29 }
  0x2a   : > { %968 = vst.msk [vmem:[#allocation2 + $0xa1] sm:$0x1] %vm943_vm3, %v4263_v29 }
  0x2b   : > { %969 = vst.msk [vmem:[#allocation2 + $0xb9] sm:$0x1] %vm943_vm3, %v4263_v29 }
  0x2c   : > { %970 = vst.msk [vmem:[#allocation2 + $0xd1] sm:$0x1] %vm943_vm3, %v4263_v29 }
  0x2d   : > { %971 = vst.msk [vmem:[#allocation2 + $0xe9] sm:$0x1] %vm943_vm3, %v4263_v29 }
  0x2e   : > { %972 = vst.msk [vmem:[#allocation2 + $0x101] sm:$0x1] %vm943_vm3, %v4263_v29 }
  0x2f   : > { %973 = vst.msk [vmem:[#allocation2 + $0x119] sm:$0x1] %vm943_vm3, %v4263_v29 }
  0x30   : > { %974 = vst.msk [vmem:[#allocation2 + $0x131] sm:$0x1] %vm943_vm3, %v4263_v29 }
  0x31   : > { %3619 = vmatmul.msk.bf16.gmra.mxu1 %vm491_vm1, %v4372_v10  ;;  %975 = vst.msk [vmem:[#allocation2 + $0x149] sm:$0x1] %vm943_vm3, %v4263_v29  ;;  %3603 = vmatmul.msk.bf16.gmra.mxu0 %vm491_vm1, %v4372_v10 }
  0x32   : > { %976 = vst.msk [vmem:[#allocation2 + $0x161] sm:$0x1] %vm943_vm3, %v4263_v29 }
  0x33   : > { %977 = vst.msk [vmem:[#allocation2 + $0x179] sm:$0x1] %vm943_vm3, %v4263_v29 }
  0x34   : > { %978 = vst.msk [vmem:[#allocation2 + $0x191] sm:$0x1] %vm943_vm3, %v4263_v29 }
  0x35   : > { %3627 = vmatmul.msk.bf16.gmra.mxu3 %vm491_vm1, %v4462_v48  ;;  %979 = vst.msk [vmem:[#allocation2 + $0x1a9] sm:$0x1] %vm943_vm3, %v4263_v29  ;;  %3611 = vmatmul.msk.bf16.gmra.mxu2 %vm491_vm1, %v4462_v48 }
  0x36   : > { %961 = vst.msk [vmem:[#allocation2 + $0x198] sm:$0x1] %vm943_vm3, %v4263_v29 }
  0x41   : > { %3620 = vmatmul.msk.bf16.gmra.mxu1 %vm491_vm1, %v4378_v13  ;;  %3604 = vmatmul.msk.bf16.gmra.mxu0 %vm491_vm1, %v4378_v13 }
  0x45   : > { %3628 = vmatmul.msk.bf16.gmra.mxu3 %vm491_vm1, %v4532_v4  ;;  %3612 = vmatmul.msk.bf16.gmra.mxu2 %vm491_vm1, %v4532_v4 }
  0x51   : > { %3621 = vmatmul.msk.bf16.gmra.mxu1 %vm491_vm1, %v4384_v16  ;;  %3605 = vmatmul.msk.bf16.gmra.mxu0 %vm491_vm1, %v4384_v16 }
  0x55   : > { %3629 = vmatmul.msk.bf16.gmra.mxu3 %vm491_vm1, %v4602_v44  ;;  %3613 = vmatmul.msk.bf16.gmra.mxu2 %vm491_vm1, %v4602_v44 }
  0x61   : > { %3622 = vmatmul.msk.bf16.gmra.mxu1 %vm491_vm1, %v4390_v19  ;;  %3606 = vmatmul.msk.bf16.gmra.mxu0 %vm491_vm1, %v4390_v19 }
  0x71   : > { %3623 = vmatmul.msk.bf16.gmra.mxu1 %vm491_vm1, %v4399_v25  ;;  %3607 = vmatmul.msk.bf16.gmra.mxu0 %vm491_vm1, %v4399_v25 }
  0x81   : > { %3624 = vmatmul.msk.bf16.gmra.mxu1 %vm491_vm1, %v4429_v33  ;;  %3608 = vmatmul.msk.bf16.gmra.mxu0 %vm491_vm1, %v4429_v33 }
  0x8e   : > { %v751_v57 = vpop.f32.mrf.mxu1 }
  0x8f   : > { %v835_v61 = vmul.f32 %v4489_v53, %v751_v57 }
  0x91   : > { %v871_v0 = vadd.f32 %v4496_v54, %v835_v61 }
  0x93   : > { %v903_v5 = vmax.f32 %v871_v0, 0.0 }
  0x95   : > { %981 = vst.msk [vmem:[#allocation2 + $0x19] sm:$0xff] %vm491_vm1, %v903_v5 }
  0x96   : > { %v753_v8 = vpop.f32.mrf.mxu1 }
  0x97   : > { %v836_v11 = vmul.f32 %v4489_v53, %v753_v8 }
  0x99   : > { %v872_v14 = vadd.f32 %v4496_v54, %v836_v11  ;;  %v469_v11 = vld [vmem:[%s4356_s15 + $0xd8] sm:$0xff] }
  0x9b   : > { %v904_v15 = vmax.f32 %v872_v14, 0.0 }
  0x9c   : > { %v4573_v21 = vld [vmem:[#allocation2 + $0x18] sm:$0xff] }
  0x9d   : > { %982 = vst.msk [vmem:[#allocation2 + $0x21] sm:$0xff] %vm491_vm1, %v904_v15  ;;  %v1817_v26 = vrot.slane %v4573_v21, 2  ;;  %v1641_v27 = vrot.slane %v4573_v21, 1 }
  0x9e   : > { %v756_v17 = vpop.f32.mrf.mxu1 }
  0x9f   : > { %v837_v18 = vmul.f32 %v4489_v53, %v756_v17 }
  0xa1   : > { %v873_v20 = vadd.f32 %v4496_v54, %v837_v18 }
  0xa3   : > { %v905_v22 = vmax.f32 %v873_v20, 0.0 }
  0xa4   : > { %v4579_v23 = vld [vmem:[#allocation2 + $0x20] sm:$0xff]  ;;  %v1547_v24 = vld [vmem:[#allocation2 + $0x28] sm:$0x3] }
  0xa5   : > { %983 = vst.msk [vmem:[#allocation2 + $0x31] sm:$0xff] %vm491_vm1, %v905_v22  ;;  %v4585_v28 = vrot.slane %v4579_v23, 2  ;;  %v1820_v29 = vrot.slane %v1547_v24, 2  ;;  %v1642_v30 = vrot.slane %v4579_v23, 1  ;;  %v1644_v10 = vrot.slane %v1547_v24, 1 }
  0xa6   : > { %v758_v34 = vpop.f32.mrf.mxu1  ;;  %v4598_v41 = vld [vmem:[#allocation2 + $0x28] sm:$0x3] }
  0xa7   : > { %v838_v36 = vmul.f32 %v4489_v53, %v758_v34  ;;  %v4593_v37 = vsel %vm1286_vm4, %v1817_v26, %v4585_v28  ;;  %v1821_v39 = vsel %vm1286_vm4, %v4585_v28, %v1820_v29  ;;  %v1643_v40 = vsel %vm1109_vm5, %v1641_v27, %v1642_v30 }
  0xa8   : > { %v3748_v42 = vpack.i.bf16 %v1821_v39, %v4593_v37  ;;  %v1645_v43 = vsel %vm1109_vm5, %v1642_v30, %v1644_v10  ;;  %v1118_v47 = vrot.slane %v4598_v41, 1  ;;  %v4648_v26 = vpack.c.bf16 %v469_v11, %v468_v9 }
  0xa9   : > { %v874_v45 = vadd.f32 %v4496_v54, %v838_v36  ;;  %v3738_v46 = vpack.i.bf16 %v1645_v43, %v1643_v40  ;;  %v1295_v35 = vrot.slane %v4598_v41, 2 }
  0xaa   : > { %3749 = vrot.lane.b32.xlu1 %v3748_v42, %s4264_s18  ;;  %v1119_v50 = vsel %vm1109_vm5, %v1642_v30, %v1118_v47  ;;  %3630 = vmatmul.msk.bf16.gmra.mxu3 %vm491_vm1, %v4648_v26 }
  0xab   : > { %v906_v48 = vmax.f32 %v874_v45, 0.0  ;;  %3739 = vrot.lane.b32.xlu0 %v3738_v46, %s4265_s19  ;;  %v3753_v55 = vpack.i.bf16 %v1119_v50, %v1643_v40  ;;  %v1296_v45 = vsel %vm1286_vm4, %v4585_v28, %v1295_v35  ;;  %3614 = vmatmul.msk.bf16.gmra.mxu2 %vm491_vm1, %v4648_v26  ;;  %v472_v26 = vld [vmem:[%s4356_s15 + $0xf0] sm:$0xff] }
  0xac   : > { %v4614_v56 = vld [vmem:[#allocation2 + $0x30] sm:$0xff] }
  0xad   : > { %984 = vst.msk [vmem:[#allocation2 + $0x39] sm:$0xff] %vm491_vm1, %v906_v48  ;;  %v2464_v60 = vrot.slane %v4614_v56, 1  ;;  %v1822_v13 = vrot.slane %v4614_v56, 2 }
  0xae   : > { %v761_v49 = vpop.f32.mrf.mxu1 }
  0xaf   : > { %v839_v51 = vmul.f32 %v4489_v53, %v761_v49 }
  0xb1   : > { %v875_v52 = vadd.f32 %v4496_v54, %v839_v51 }
  0xb3   : > { %v907_v57 = vmax.f32 %v875_v52, 0.0  ;;  %3754 = vrot.lane.b32.xlu0 %v3753_v55, %s4265_s19 }
  0xb4   : > { %v4621_v58 = vld [vmem:[#allocation2 + $0x38] sm:$0xff]  ;;  %v2370_v59 = vld [vmem:[#allocation2 + $0x40] sm:$0x3] }
  0xb5   : > { %v1550_v61 = vld [vmem:[#allocation2 + $0x40] sm:$0x3]  ;;  %985 = vst.msk [vmem:[#allocation2 + $0x49] sm:$0xff] %vm491_vm1, %v907_v57  ;;  %v2465_v62 = vrot.slane %v4621_v58, 1  ;;  %v2467_v63 = vrot.slane %v2370_v59, 1  ;;  %v4628_v0 = vrot.slane %v4621_v58, 2 }
  0xb6   : > { %v763_v1 = vpop.f32.mrf.mxu1  ;;  %v1825_v2 = vrot.slane %v1550_v61, 2  ;;  %v1649_v3 = vrot.slane %v1550_v61, 1  ;;  %v4637_v8 = vld [vmem:[#allocation2 + $0x40] sm:$0x3]  ;;  %v2643_v18 = vrot.slane %v2370_v59, 2  ;;  %v471_v61 = vld [vmem:[%s4356_s15 + $0xe8] sm:$0xff] }
  0xb7   : > { %v840_v4 = vmul.f32 %v4489_v53, %v763_v1  ;;  %v2466_v5 = vsel %vm1109_vm5, %v2464_v60, %v2465_v62  ;;  %v2468_v6 = vsel %vm1109_vm5, %v2465_v62, %v2467_v63  ;;  %v4635_v7 = vsel %vm1286_vm4, %v1822_v13, %v4628_v0  ;;  %v470_v60 = vld [vmem:[%s4356_s15 + $0xe0] sm:$0xff] }
  0xb8   : > { %v3758_v12 = vpack.i.bf16 %v2468_v6, %v2466_v5  ;;  %v1826_v14 = vsel %vm1286_vm4, %v4628_v0, %v1825_v2  ;;  %v1650_v15 = vsel %vm1109_vm5, %v2465_v62, %v1649_v3  ;;  %v1123_v24 = vrot.slane %v4637_v8, 1 }
  0xb9   : > { %v876_v17 = vadd.f32 %v4496_v54, %v840_v4  ;;  %v3778_v20 = vpack.i.bf16 %v1826_v14, %v4635_v7  ;;  %v3773_v22 = vpack.i.bf16 %v1650_v15, %v2466_v5  ;;  %v2644_v29 = vsel %vm1286_vm4, %v4628_v0, %v2643_v18 }
  0xba   : > { %3759 = vrot.lane.b32.xlu2 %v3758_v12, %s4265_s19  ;;  %v1124_v10 = vsel %vm1109_vm5, %v2465_v62, %v1123_v24  ;;  %v3763_v34 = vpack.i.bf16 %v2644_v29, %v4635_v7  ;;  %v3768_v62 = vpack.i.bf16 %v1296_v45, %v4593_v37  ;;  %v4692_v6 = vpack.c.bf16 %v471_v61, %v470_v60 }
  0xbb   : > { %v908_v27 = vmax.f32 %v876_v17, 0.0  ;;  %3779 = vrot.lane.b32.xlu0 %v3778_v20, %s4264_s18  ;;  %3774 = vrot.lane.b32.xlu1 %v3773_v22, %s4265_s19  ;;  %v3783_v40 = vpack.i.bf16 %v1124_v10, %v2466_v5  ;;  %v1300_v20 = vrot.slane %v4637_v8, 2 }
  0xbc   : > { %v2371_v36 = vld [vmem:[#allocation2 + $0x48] sm:$0xff]  ;;  %3631 = vmatmul.msk.bf16.gmra.mxu3 %vm491_vm1, %v4692_v6  ;;  %3615 = vmatmul.msk.bf16.gmra.mxu2 %vm491_vm1, %v4692_v6 }
  0xbd   : > { %986 = vst.msk [vmem:[#allocation2 + $0x51] sm:$0xff] %vm491_vm1, %v908_v27  ;;  %v2469_v43 = vrot.slane %v2371_v36, 1  ;;  %v1827_v48 = vrot.slane %v2371_v36, 2  ;;  %v1301_v10 = vsel %vm1286_vm4, %v4628_v0, %v1300_v20 }
  0xbe   : > { %v766_v30 = vpop.f32.mrf.mxu1 }
  0xbf   : > { %v841_v31 = vmul.f32 %v4489_v53, %v766_v30 }
  0xc1   : > { %v877_v39 = vadd.f32 %v4496_v54, %v841_v31 }
  0xc2   : > { %3764 = vrot.lane.b32.xlu2 %v3763_v34, %s4264_s18 }
  0xc3   : > { %v909_v42 = vmax.f32 %v877_v39, 0.0  ;;  %3784 = vrot.lane.b32.xlu0 %v3783_v40, %s4265_s19 }
  0xc4   : > { %v2372_v41 = vld [vmem:[#allocation2 + $0x50] sm:$0xff]  ;;  %v2373_v46 = vld [vmem:[#allocation2 + $0x58] sm:$0x3] }
  0xc5   : > { %v1553_v47 = vld [vmem:[#allocation2 + $0x58] sm:$0x3]  ;;  %987 = vst.msk [vmem:[#allocation2 + $0x61] sm:$0xff] %vm491_vm1, %v909_v42  ;;  %v2470_v49 = vrot.slane %v2372_v41, 1  ;;  %v2472_v16 = vrot.slane %v2373_v46, 1  ;;  %v4671_v50 = vrot.slane %v2372_v41, 2 }
  0xc6   : > { %v1830_v51 = vrot.slane %v1553_v47, 2  ;;  %v768_v52 = vpop.f32.mrf.mxu1  ;;  %v4680_v59 = vld [vmem:[#allocation2 + $0x58] sm:$0x3]  ;;  %v2648_v3 = vrot.slane %v2373_v46, 2  ;;  %v1654_v4 = vrot.slane %v1553_v47, 1 }
  0xc7   : > { %v842_v55 = vmul.f32 %v4489_v53, %v768_v52  ;;  %v2471_v44 = vsel %vm1109_vm5, %v2469_v43, %v2470_v49  ;;  %v2473_v28 = vsel %vm1109_vm5, %v2470_v49, %v2472_v16  ;;  %v4678_v57 = vsel %vm1286_vm4, %v1827_v48, %v4671_v50  ;;  %v473_v47 = vld [vmem:[%s4356_s15 + $0xf8] sm:$0xff] }
  0xc8   : > { %v3788_v63 = vpack.i.bf16 %v2473_v28, %v2471_v44  ;;  %v1831_v13 = vsel %vm1286_vm4, %v4671_v50, %v1830_v51  ;;  %v1128_v5 = vrot.slane %v4680_v59, 1  ;;  %v2649_v37 = vsel %vm1286_vm4, %v4671_v50, %v2648_v3 }
  0xc9   : > { %v878_v1 = vadd.f32 %v4496_v54, %v842_v55  ;;  %v3808_v2 = vpack.i.bf16 %v1831_v13, %v4678_v57  ;;  %v1655_v11 = vsel %vm1109_vm5, %v2470_v49, %v1654_v4  ;;  %v3793_v17 = vpack.i.bf16 %v2649_v37, %v4678_v57 }
  0xca   : > { %3769 = vrot.lane.b32.xlu2 %v3768_v62, %s4264_s18  ;;  %3789 = vrot.lane.b32.xlu1 %v3788_v63, %s4265_s19  ;;  %v1129_v14 = vsel %vm1109_vm5, %v2470_v49, %v1128_v5  ;;  %v3803_v18 = vpack.i.bf16 %v1655_v11, %v2471_v44  ;;  %v3798_v48 = vpack.i.bf16 %v1301_v10, %v4635_v7  ;;  %v1305_v4 = vrot.slane %v4680_v59, 2 }
  0xcb   : > { %v910_v9 = vmax.f32 %v878_v1, 0.0  ;;  %3809 = vrot.lane.b32.xlu0 %v3808_v2, %s4264_s18  ;;  %v3813_v27 = vpack.i.bf16 %v1129_v14, %v2471_v44  ;;  %v4737_v60 = vpack.c.bf16 %v473_v47, %v472_v26 }
  0xcc   : > { %v2374_v22 = vld [vmem:[#allocation2 + $0x60] sm:$0xff]  ;;  %v1306_v14 = vsel %vm1286_vm4, %v4671_v50, %v1305_v4 }
  0xcd   : > { %988 = vst.msk [vmem:[#allocation2 + $0x69] sm:$0xff] %vm491_vm1, %v910_v9  ;;  %v2474_v30 = vrot.slane %v2374_v22, 1  ;;  %v1832_v35 = vrot.slane %v2374_v22, 2  ;;  %3632 = vmatmul.msk.bf16.gmra.mxu3 %vm491_vm1, %v4737_v60  ;;  %v3828_v6 = vpack.i.bf16 %v1306_v14, %v4678_v57  ;;  %v791_v57 = vpop.f32.mrf.mxu3  ;;  %3616 = vmatmul.msk.bf16.gmra.mxu2 %vm491_vm1, %v4737_v60 }
  0xce   : > { %v771_v12 = vpop.f32.mrf.mxu1  ;;  %v851_v26 = vmul.f32 %v4489_v53, %v791_v57 }
  0xcf   : > { %v843_v15 = vmul.f32 %v4489_v53, %v771_v12 }
  0xd1   : > { %v879_v24 = vadd.f32 %v4496_v54, %v843_v15 }
  0xd2   : > { %3794 = vrot.lane.b32.xlu2 %v3793_v17, %s4264_s18  ;;  %3804 = vrot.lane.b32.xlu1 %v3803_v18, %s4265_s19 }
  0xd3   : > { %v911_v29 = vmax.f32 %v879_v24, 0.0  ;;  %3814 = vrot.lane.b32.xlu0 %v3813_v27, %s4265_s19 }
  0xd4   : > { %v2375_v31 = vld [vmem:[#allocation2 + $0x68] sm:$0xff]  ;;  %v2376_v8 = vld [vmem:[#allocation2 + $0x70] sm:$0x3] }
  0xd5   : > { %v1556_v34 = vld [vmem:[#allocation2 + $0x70] sm:$0x3]  ;;  %989 = vst.msk [vmem:[#allocation2 + $0x79] sm:$0xff] %vm491_vm1, %v911_v29  ;;  %v2475_v36 = vrot.slane %v2375_v31, 1  ;;  %v2477_v39 = vrot.slane %v2376_v8, 1  ;;  %v4716_v40 = vrot.slane %v2375_v31, 2 }
  0xd6   : > { %v1835_v42 = vrot.slane %v1556_v34, 2  ;;  %v773_v19 = vpop.f32.mrf.mxu1  ;;  %v4725_v46 = vld [vmem:[#allocation2 + $0x70] sm:$0x3]  ;;  %v2653_v55 = vrot.slane %v2376_v8, 2  ;;  %v1659_v44 = vrot.slane %v1556_v34, 1 }
  0xd7   : > { %v844_v43 = vmul.f32 %v4489_v53, %v773_v19  ;;  %v2476_v0 = vsel %vm1109_vm5, %v2474_v30, %v2475_v36  ;;  %v2478_v45 = vsel %vm1109_vm5, %v2475_v36, %v2477_v39  ;;  %v4723_v41 = vsel %vm1286_vm4, %v1832_v35, %v4716_v40 }
  0xd8   : > { %v3818_v49 = vpack.i.bf16 %v2478_v45, %v2476_v0  ;;  %v1836_v16 = vsel %vm1286_vm4, %v4716_v40, %v1835_v42  ;;  %v1133_v28 = vrot.slane %v4725_v46, 1  ;;  %v2654_v7 = vsel %vm1286_vm4, %v4716_v40, %v2653_v55 }
  0xd9   : > { %v880_v51 = vadd.f32 %v4496_v54, %v844_v43  ;;  %v3838_v52 = vpack.i.bf16 %v1836_v16, %v4723_v41  ;;  %v1660_v62 = vsel %vm1109_vm5, %v2475_v36, %v1659_v44  ;;  %v3823_v2 = vpack.i.bf16 %v2654_v7, %v4723_v41 }
  0xda   : > { %3799 = vrot.lane.b32.xlu2 %v3798_v48, %s4264_s18  ;;  %3819 = vrot.lane.b32.xlu1 %v3818_v49, %s4265_s19  ;;  %v1134_v13 = vsel %vm1109_vm5, %v2475_v36, %v1133_v28  ;;  %v3833_v3 = vpack.i.bf16 %v1660_v62, %v2476_v0  ;;  %v887_v16 = vadd.f32 %v4496_v54, %v851_v26  ;;  %v1310_v55 = vrot.slane %v4725_v46, 2 }
  0xdb   : > { %v912_v61 = vmax.f32 %v880_v51, 0.0  ;;  %3839 = vrot.lane.b32.xlu0 %v3838_v52, %s4264_s18  ;;  %v3843_v37 = vpack.i.bf16 %v1134_v13, %v2476_v0  ;;  %v793_v13 = vpop.f32.mrf.mxu3 }
  0xdc   : > { %v2377_v5 = vld [vmem:[#allocation2 + $0x78] sm:$0xff]  ;;  %v919_v7 = vmax.f32 %v887_v16, 0.0  ;;  %v1311_v46 = vsel %vm1286_vm4, %v4716_v40, %v1310_v55 }
  0xdd   : > { %990 = vst.msk [vmem:[#allocation2 + $0x81] sm:$0xff] %vm491_vm1, %v912_v61  ;;  %v2479_v12 = vrot.slane %v2377_v5, 1  ;;  %v1837_v18 = vrot.slane %v2377_v5, 2  ;;  %v852_v5 = vmul.f32 %v4489_v53, %v793_v13 }
  0xde   : > { %v776_v63 = vpop.f32.mrf.mxu1  ;;  %997 = vst.msk [vmem:[#allocation2 + $0xd9] sm:$0xff] %vm491_vm1, %v919_v7 }
  0xdf   : > { %v845_v1 = vmul.f32 %v4489_v53, %v776_v63  ;;  %v888_v14 = vadd.f32 %v4496_v54, %v852_v5 }
  0xe1   : > { %v881_v9 = vadd.f32 %v4496_v54, %v845_v1 }
  0xe2   : > { %3824 = vrot.lane.b32.xlu2 %v3823_v2, %s4264_s18  ;;  %3834 = vrot.lane.b32.xlu1 %v3833_v3, %s4265_s19 }
  0xe3   : > { %v913_v11 = vmax.f32 %v881_v9, 0.0  ;;  %3844 = vrot.lane.b32.xlu0 %v3843_v37, %s4265_s19 }
  0xe4   : > { %v2378_v15 = vld [vmem:[#allocation2 + $0x80] sm:$0xff]  ;;  %v2379_v59 = vld [vmem:[#allocation2 + $0x88] sm:$0x3] }
  0xe5   : > { %v1559_v17 = vld [vmem:[#allocation2 + $0x88] sm:$0x3]  ;;  %991 = vst.msk [vmem:[#allocation2 + $0x91] sm:$0xff] %vm491_vm1, %v913_v11  ;;  %v2480_v20 = vrot.slane %v2378_v15, 1  ;;  %v2482_v22 = vrot.slane %v2379_v59, 1  ;;  %v4761_v24 = vrot.slane %v2378_v15, 2 }
  0xe6   : > { %v1840_v27 = vrot.slane %v1559_v17, 2  ;;  %v778_v29 = vpop.f32.mrf.mxu1  ;;  %v4770_v31 = vld [vmem:[#allocation2 + $0x88] sm:$0x3]  ;;  %v2658_v39 = vrot.slane %v2379_v59, 2  ;;  %v1664_v42 = vrot.slane %v1559_v17, 1 }
  0xe7   : > { %v846_v25 = vmul.f32 %v4489_v53, %v778_v29  ;;  %v2481_v30 = vsel %vm1109_vm5, %v2479_v12, %v2480_v20  ;;  %v2483_v50 = vsel %vm1109_vm5, %v2480_v20, %v2482_v22  ;;  %v4768_v10 = vsel %vm1286_vm4, %v1837_v18, %v4761_v24  ;;  %v3745_v29 = vpop.permute.xlu1 %3744 }
  0xe8   : > { %v3848_v8 = vpack.i.bf16 %v2483_v50, %v2481_v30  ;;  %v1841_v34 = vsel %vm1286_vm4, %v4761_v24, %v1840_v27  ;;  %v1138_v19 = vrot.slane %v4770_v31, 1  ;;  %v2659_v0 = vsel %vm1286_vm4, %v4761_v24, %v2658_v39 }
  0xe9   : > { %v882_v35 = vadd.f32 %v4496_v54, %v846_v25  ;;  %v3868_v36 = vpack.i.bf16 %v1841_v34, %v4768_v10  ;;  %v1665_v45 = vsel %vm1109_vm5, %v2480_v20, %v1664_v42  ;;  %v3853_v51 = vpack.i.bf16 %v2659_v0, %v4768_v10  ;;  %v3735_v25 = vpop.permute.xlu0 %3734 }
  0xea   : > { %3829 = vrot.lane.b32.xlu2 %v3828_v6, %s4264_s18  ;;  %3849 = vrot.lane.b32.xlu1 %v3848_v8, %s4265_s19  ;;  %v1139_v48 = vsel %vm1109_vm5, %v2480_v20, %v1138_v19  ;;  %v3863_v52 = vpack.i.bf16 %v1665_v45, %v2481_v30  ;;  %v3858_v18 = vpack.i.bf16 %v1311_v46, %v4723_v41  ;;  %v920_v34 = vmax.f32 %v888_v14, 0.0  ;;  %v796_v19 = vpop.f32.mrf.mxu3  ;;  %v4855_v46 = vld [vmem:[%s6208_s12] ss:$0 sm:$0xff] }
  0xeb   : > { %v914_v43 = vmax.f32 %v882_v35, 0.0  ;;  %3869 = vrot.lane.b32.xlu0 %v3868_v36, %s4264_s18  ;;  %v3873_v61 = vpack.i.bf16 %v1139_v48, %v2481_v30  ;;  %v3747_v41 = vunpack.i.h.bf16 %v3745_v29  ;;  %v3746_v36 = vunpack.i.l.bf16 %v3745_v29 }
  0xec   : > { %v2380_v44 = vld [vmem:[#allocation2 + $0x90] sm:$0xff]  ;;  %v3737_v39 = vunpack.i.h.bf16 %v3735_v25  ;;  %v3736_v42 = vunpack.i.l.bf16 %v3735_v25  ;;  %998 = vst.msk [vmem:[#allocation2 + $0xe1] sm:$0xff] %vm491_vm1, %v920_v34  ;;  %v853_v57 = vmul.f32 %v4489_v53, %v796_v19  ;;  %v1315_v55 = vrot.slane %v4770_v31, 2  ;;  %v593_v34 = vpop.f32.mrf.mxu2 }
  0xed   : > { %992 = vst.msk [vmem:[#allocation2 + $0x99] sm:$0xff] %vm491_vm1, %v914_v43  ;;  %v2484_v63 = vrot.slane %v2380_v44, 1  ;;  %v1842_v4 = vrot.slane %v2380_v44, 2 }
  0xee   : > { %v781_v47 = vpop.f32.mrf.mxu1  ;;  %v1464_v45 = vsel %vm491_vm1, %v4425_v32, %v3737_v39  ;;  %v1463_v48 = vsel %vm491_vm1, %v4441_v38, %v3736_v42  ;;  %v4845_v38 = vld [vmem:[%s6207_s11] ss:$0 sm:$0xff] }
  0xef   : > { %v847_v49 = vmul.f32 %v4489_v53, %v781_v47  ;;  %v1496_v16 = vsel %vm705_vm6, %v1464_v45, %v3747_v41  ;;  %v1495_v44 = vsel %vm705_vm6, %v1463_v48, %v3746_v36 }
  0xf0   : > { %v1527_v7 = vpack.c.bf16 %v1496_v16, %v1495_v44  ;;  %v4911_v44 = vld [vmem:[#allocation2 + $0xd8] sm:$0xff] }
  0xf1   : > { %v883_v28 = vadd.f32 %v4496_v54, %v847_v49  ;;  %v889_v49 = vadd.f32 %v4496_v54, %v853_v57 }
  0xf2   : > { %3854 = vrot.lane.b32.xlu2 %v3853_v51, %s4264_s18  ;;  %3864 = vrot.lane.b32.xlu1 %v3863_v52, %s4265_s19 }
  0xf3   : > { %v915_v62 = vmax.f32 %v883_v28, 0.0  ;;  %3874 = vrot.lane.b32.xlu0 %v3873_v61, %s4265_s19  ;;  %v921_v61 = vmax.f32 %v889_v49, 0.0  ;;  %3659 = vmatmul.msk.bf16.vlgmr.msrb.gmra.mxu3 %vm2081_vm7, %v1527_v7  ;;  %v2390_v7 = vld [vmem:[#allocation2 + $0xe0] sm:$0xff] }
  0xf4   : > { %v2381_v1 = vld [vmem:[#allocation2 + $0x98] sm:$0xff]  ;;  %v2382_v2 = vld [vmem:[#allocation2 + $0xa0] sm:$0x3] }
  0xf5   : > { %v1562_v3 = vld [vmem:[#allocation2 + $0xa0] sm:$0x3]  ;;  %993 = vst.msk [vmem:[#allocation2 + $0xa9] sm:$0xff] %vm491_vm1, %v915_v62  ;;  %v2485_v9 = vrot.slane %v2381_v1, 1  ;;  %v2487_v37 = vrot.slane %v2382_v2, 1  ;;  %v4804_v11 = vrot.slane %v2381_v1, 2  ;;  %v553_v62 = vpop.f32.mrf.mxu0 }
  0xf6   : > { %v1845_v12 = vrot.slane %v1562_v3, 2  ;;  %v783_v33 = vpop.f32.mrf.mxu1  ;;  %v4814_v60 = vld [vmem:[#allocation2 + $0xa0] sm:$0x3]  ;;  %v2663_v27 = vrot.slane %v2382_v2, 2  ;;  %v1669_v6 = vrot.slane %v1562_v3, 1  ;;  %999 = vst.msk [vmem:[#allocation2 + $0xf1] sm:$0xff] %vm491_vm1, %v921_v61  ;;  %v637_v31 = vmul.f32 %v4845_v38, %v553_v62  ;;  %v798_v3 = vpop.f32.mrf.mxu3 }
  0xf7   : > { %v848_v40 = vmul.f32 %v4489_v53, %v783_v33  ;;  %v2486_v15 = vsel %vm1109_vm5, %v2484_v63, %v2485_v9  ;;  %v2488_v59 = vsel %vm1109_vm5, %v2485_v9, %v2487_v37  ;;  %v4812_v17 = vsel %vm1286_vm4, %v1842_v4, %v4804_v11  ;;  %v595_v62 = vpop.f32.mrf.mxu2 }
  0xf8   : > { %v3878_v20 = vpack.i.bf16 %v2488_v59, %v2486_v15  ;;  %v1846_v22 = vsel %vm1286_vm4, %v4804_v11, %v1845_v12  ;;  %v1143_v8 = vrot.slane %v4814_v60, 1  ;;  %v2664_v43 = vsel %vm1286_vm4, %v4804_v11, %v2663_v27 }
  0xf9   : > { %v884_v30 = vadd.f32 %v4496_v54, %v848_v40  ;;  %v3898_v50 = vpack.i.bf16 %v1846_v22, %v4812_v17  ;;  %v1670_v0 = vsel %vm1109_vm5, %v2485_v9, %v1669_v6  ;;  %v3883_v52 = vpack.i.bf16 %v2664_v43, %v4812_v17 }
  0xfa   : > { %3859 = vrot.lane.b32.xlu2 %v3858_v18, %s4264_s18  ;;  %3879 = vrot.lane.b32.xlu1 %v3878_v20, %s4265_s19  ;;  %v1144_v47 = vsel %vm1109_vm5, %v2485_v9, %v1143_v8  ;;  %v3893_v28 = vpack.i.bf16 %v1670_v0, %v2486_v15  ;;  %v1316_v4 = vsel %vm1286_vm4, %v4761_v24, %v1315_v55 }
  0xfb   : > { %v916_v35 = vmax.f32 %v884_v30, 0.0  ;;  %3899 = vrot.lane.b32.xlu0 %v3898_v50, %s4264_s18  ;;  %v3903_v13 = vpack.i.bf16 %v1144_v47, %v2486_v15  ;;  %v854_v33 = vmul.f32 %v4489_v53, %v798_v3  ;;  %v673_v14 = vadd.f32 %v4855_v46, %v637_v31 }
  0xfc   : > { %v2383_v32 = vld [vmem:[#allocation2 + $0xa8] sm:$0xff]  ;;  %v3888_v50 = vpack.i.bf16 %v1316_v4, %v4768_v10  ;;  %v653_v43 = vmul.f32 %v4845_v38, %v593_v34  ;;  %v2499_v3 = vrot.slane %v4911_v44, 1 }
  0xfd   : > { %994 = vst.msk [vmem:[#allocation2 + $0xb1] sm:$0xff] %vm491_vm1, %v916_v35  ;;  %v2489_v2 = vrot.slane %v2383_v32, 1  ;;  %v1847_v12 = vrot.slane %v2383_v32, 2  ;;  %v890_v20 = vadd.f32 %v4496_v54, %v854_v33  ;;  %v555_v41 = vpop.f32.mrf.mxu0 }
  0xfe   : > { %v786_v26 = vpop.f32.mrf.mxu1  ;;  %706 = vst.msk [vmem:[%s4868_s17] sm:$0xff] %vm705_vm6, %v673_v14  ;;  %v638_v57 = vmul.f32 %v4845_v38, %v555_v41  ;;  %v801_v45 = vpop.f32.mrf.mxu3 }
  0xff   : > { %v849_v51 = vmul.f32 %v4489_v53, %v786_v26  ;;  %v922_v10 = vmax.f32 %v890_v20, 0.0  ;;  %v689_v26 = vadd.f32 %v4855_v46, %v653_v43  ;;  %v855_v47 = vmul.f32 %v4489_v53, %v801_v45 }
 0x100   : > { %v674_v48 = vadd.f32 %v4855_v46, %v638_v57 }
 0x101   : > { %v885_v63 = vadd.f32 %v4496_v54, %v849_v51  ;;  %1000 = vst.msk [vmem:[#allocation2 + $0xf9] sm:$0xff] %vm491_vm1, %v922_v10  ;;  %v1320_v51 = vrot.slane %v4814_v60, 2  ;;  %v891_v55 = vadd.f32 %v4496_v54, %v855_v47 }
 0x102   : > { %3884 = vrot.lane.b32.xlu2 %v3883_v52, %s4264_s18  ;;  %3894 = vrot.lane.b32.xlu1 %v3893_v28, %s4265_s19  ;;  %722 = vst.msk [vmem:[%s4868_s17 + $0x80] sm:$0xff] %vm705_vm6, %v689_v26 }
 0x103   : > { %v917_v1 = vmax.f32 %v885_v63, 0.0  ;;  %3904 = vrot.lane.b32.xlu0 %v3903_v13, %s4265_s19  ;;  %707 = vst.msk [vmem:[%s4868_s17 + $0x8] sm:$0xff] %vm705_vm6, %v674_v48  ;;  %v923_v61 = vmax.f32 %v891_v55, 0.0  ;;  %v1321_v60 = vsel %vm1286_vm4, %v4804_v11, %v1320_v51  ;;  %v4963_v51 = vrot.slane %v2390_v7, 2 }
 0x104   : > { %v2384_v5 = vld [vmem:[#allocation2 + $0xb0] sm:$0xff]  ;;  %v2385_v9 = vld [vmem:[#allocation2 + $0xb8] sm:$0x3]  ;;  %v3918_v33 = vpack.i.bf16 %v1321_v60, %v4812_v17 }
 0x105   : > { %v1565_v37 = vld [vmem:[#allocation2 + $0xb8] sm:$0x3]  ;;  %995 = vst.msk [vmem:[#allocation2 + $0xc1] sm:$0xff] %vm491_vm1, %v917_v1  ;;  %v2490_v40 = vrot.slane %v2384_v5, 1  ;;  %v2492_v15 = vrot.slane %v2385_v9, 1  ;;  %v4871_v24 = vrot.slane %v2384_v5, 2  ;;  %v558_v63 = vpop.f32.mrf.mxu0  ;;  %v654_v1 = vmul.f32 %v4845_v38, %v595_v62 }
 0x106   : > { %v1850_v59 = vrot.slane %v1565_v37, 2  ;;  %v788_v18 = vpop.f32.mrf.mxu1  ;;  %v4883_v30 = vld [vmem:[#allocation2 + $0xb8] sm:$0x3]  ;;  %v2668_v39 = vrot.slane %v2385_v9, 2  ;;  %v1674_v42 = vrot.slane %v1565_v37, 1  ;;  %1001 = vst.msk [vmem:[#allocation2 + $0x109] sm:$0xff] %vm491_vm1, %v923_v61  ;;  %v803_v9 = vpop.f32.mrf.mxu3 }
 0x107   : > { %v850_v22 = vmul.f32 %v4489_v53, %v788_v18  ;;  %v2491_v27 = vsel %vm1109_vm5, %v2489_v2, %v2490_v40  ;;  %v2493_v29 = vsel %vm1109_vm5, %v2490_v40, %v2492_v15  ;;  %v4881_v25 = vsel %vm1286_vm4, %v1847_v12, %v4871_v24 }
 0x108   : > { %v3908_v6 = vpack.i.bf16 %v2493_v29, %v2491_v27  ;;  %v1851_v8 = vsel %vm1286_vm4, %v4871_v24, %v1850_v59  ;;  %v1148_v19 = vrot.slane %v4883_v30, 1  ;;  %v2669_v49 = vsel %vm1286_vm4, %v4871_v24, %v2668_v39 }
 0x109   : > { %v886_v35 = vadd.f32 %v4496_v54, %v850_v22  ;;  %v3928_v36 = vpack.i.bf16 %v1851_v8, %v4881_v25  ;;  %v1675_v16 = vsel %vm1109_vm5, %v2490_v40, %v1674_v42  ;;  %v3913_v28 = vpack.i.bf16 %v2669_v49, %v4881_v25  ;;  %v4944_v42 = vld [vmem:[#allocation2 + $0xe8] sm:$0x3] }
 0x10a   : > { %3889 = vrot.lane.b32.xlu2 %v3888_v50, %s4264_s18  ;;  %3909 = vrot.lane.b32.xlu1 %v3908_v6, %s4265_s19  ;;  %v1149_v52 = vsel %vm1109_vm5, %v2490_v40, %v1148_v19  ;;  %v3923_v32 = vpack.i.bf16 %v1675_v16, %v2491_v27  ;;  %v639_v2 = vmul.f32 %v4845_v38, %v558_v63  ;;  %v1325_v4 = vrot.slane %v4883_v30, 2 }
 0x10b   : > { %v918_v0 = vmax.f32 %v886_v35, 0.0  ;;  %3929 = vrot.lane.b32.xlu0 %v3928_v36, %s4264_s18  ;;  %v3933_v13 = vpack.i.bf16 %v1149_v52, %v2491_v27  ;;  %v4924_v5 = vrot.slane %v2390_v7, 1  ;;  %v690_v11 = vadd.f32 %v4855_v46, %v654_v1  ;;  %v4929_v27 = vld [vmem:[#allocation2 + $0xe8] sm:$0x3] }
 0x10c   : > { %v2386_v31 = vld [vmem:[#allocation2 + $0xc0] sm:$0xff]  ;;  %v675_v37 = vadd.f32 %v4855_v46, %v639_v2  ;;  %v856_v29 = vmul.f32 %v4489_v53, %v803_v9  ;;  %v2502_v48 = vrot.slane %v4929_v27, 1  ;;  %v1857_v49 = vrot.slane %v4911_v44, 2 }
 0x10d   : > { %996 = vst.msk [vmem:[#allocation2 + $0xc9] sm:$0xff] %vm491_vm1, %v918_v0  ;;  %v2494_v15 = vrot.slane %v2386_v31, 1  ;;  %v1852_v22 = vrot.slane %v2386_v31, 2  ;;  %v598_v0 = vpop.f32.mrf.mxu2  ;;  %v560_v45 = vpop.f32.mrf.mxu0  ;;  %v1860_v52 = vrot.slane %v4944_v42, 2  ;;  %v1684_v30 = vrot.slane %v4944_v42, 1 }
 0x10e   : > { %723 = vst.msk [vmem:[%s4868_s17 + $0x88] sm:$0xff] %vm705_vm6, %v690_v11  ;;  %v892_v55 = vadd.f32 %v4496_v54, %v856_v29  ;;  %v655_v61 = vmul.f32 %v4845_v38, %v598_v0  ;;  %v806_v62 = vpop.f32.mrf.mxu3  ;;  %v640_v63 = vmul.f32 %v4845_v38, %v560_v45  ;;  %v5007_v0 = vsel %vm1109_vm5, %v2499_v3, %v4924_v5  ;;  %v5028_v42 = vld [vmem:[%s6200_s4] ss:$0 sm:$0xff] }
 0x10f   : > { %708 = vst.msk [vmem:[%s4868_s17 + $0x10] sm:$0xff] %vm705_vm6, %v675_v37  ;;  %v857_v2 = vmul.f32 %v4489_v53, %v806_v62  ;;  %v5020_v3 = vsel %vm1286_vm4, %v1857_v49, %v4963_v51 }
 0x110   : > { %v924_v1 = vmax.f32 %v892_v55, 0.0 }
 0x112   : > { %3914 = vrot.lane.b32.xlu2 %v3913_v28, %s4264_s18  ;;  %3924 = vrot.lane.b32.xlu1 %v3923_v32, %s4265_s19  ;;  %1002 = vst.msk [vmem:[#allocation2 + $0x111] sm:$0xff] %vm491_vm1, %v924_v1  ;;  %v2392_v1 = vld [vmem:[#allocation2 + $0xf0] sm:$0xff] }
 0x113   : > { %3934 = vrot.lane.b32.xlu0 %v3933_v13, %s4265_s19 }
 0x114   : > { %v3760_v12 = vpop.permute.xlu2 %3759  ;;  %v2387_v14 = vld [vmem:[#allocation2 + $0xc8] sm:$0xff]  ;;  %v2388_v40 = vld [vmem:[#allocation2 + $0xd0] sm:$0x3] }
 0x115   : > { %v1568_v59 = vld [vmem:[#allocation2 + $0xd0] sm:$0x3]  ;;  %v2495_v18 = vrot.slane %v2387_v14, 1  ;;  %v2497_v20 = vrot.slane %v2388_v40, 1  ;;  %v3762_v50 = vunpack.i.h.bf16 %v3760_v12  ;;  %v4934_v6 = vrot.slane %v2387_v14, 2 }
 0x116   : > { %v1855_v8 = vrot.slane %v1568_v59, 2  ;;  %v2673_v34 = vrot.slane %v2388_v40, 2  ;;  %v4936_v17 = vld [vmem:[#allocation2 + $0xd0] sm:$0x3]  ;;  %v3761_v41 = vunpack.i.l.bf16 %v3760_v12  ;;  %v1679_v39 = vrot.slane %v1568_v59, 1 }
 0x117   : > { %v4941_v35 = vsel %vm1109_vm5, %v2494_v15, %v2495_v18  ;;  %v2498_v36 = vsel %vm1109_vm5, %v2495_v18, %v2497_v20  ;;  %v4949_v10 = vsel %vm1286_vm4, %v1852_v22, %v4934_v6  ;;  %v1153_v47 = vrot.slane %v4936_v17, 1 }
 0x118   : > { %v3938_v19 = vpack.i.bf16 %v2498_v36, %v4941_v35  ;;  %v1856_v43 = vsel %vm1286_vm4, %v4934_v6, %v1855_v8  ;;  %v2674_v57 = vsel %vm1286_vm4, %v4934_v6, %v2673_v34  ;;  %v2817_v16 = vsel %vm491_vm1, %v4621_v58, %v3762_v50  ;;  %v563_v34 = vpop.f32.mrf.mxu0 }
 0x119   : > { %v3973_v26 = vpack.i.bf16 %v1856_v43, %v4949_v10  ;;  %v2816_v28 = vsel %vm491_vm1, %v4614_v56, %v3761_v41  ;;  %v3943_v32 = vpack.i.bf16 %v2674_v57, %v4949_v10  ;;  %v1680_v7 = vsel %vm1109_vm5, %v2495_v18, %v1679_v39  ;;  %v4993_v43 = vld [vmem:[#allocation2 + $0xe8] sm:$0x3] }
 0x11a   : > { %3919 = vrot.lane.b32.xlu2 %v3918_v33, %s4264_s18  ;;  %3939 = vrot.lane.b32.xlu1 %v3938_v19, %s4265_s19  ;;  %v1154_v31 = vsel %vm1109_vm5, %v2495_v18, %v1153_v47  ;;  %v691_v40 = vadd.f32 %v4855_v46, %v655_v61  ;;  %v893_v15 = vadd.f32 %v4496_v54, %v857_v2  ;;  %v600_v54 = vpop.f32.mrf.mxu2  ;;  %v2678_v19 = vrot.slane %v4929_v27, 2 }
 0x11b   : > { %3974 = vrot.lane.b32.xlu0 %v3973_v26, %s4264_s18  ;;  %v3953_v53 = vpack.i.bf16 %v1680_v7, %v4941_v35  ;;  %v676_v20 = vadd.f32 %v4855_v46, %v640_v63  ;;  %v3978_v41 = vpack.i.bf16 %v1154_v31, %v4941_v35  ;;  %v1326_v35 = vsel %vm1286_vm4, %v4871_v24, %v1325_v4  ;;  %v808_v24 = vpop.f32.mrf.mxu3  ;;  %v5042_v63 = vld [vmem:[%s6201_s5] ss:$0 sm:$0xff] }
 0x11c   : > { %v3750_v13 = vpop.permute.xlu1 %3749  ;;  %v3765_v60 = vpop.permute.xlu2 %3764  ;;  %724 = vst.msk [vmem:[%s4868_s17 + $0x90] sm:$0xff] %vm705_vm6, %v691_v40  ;;  %v925_v8 = vmax.f32 %v893_v15, 0.0  ;;  %v2503_v27 = vsel %vm1109_vm5, %v4924_v5, %v2502_v48  ;;  %v656_v45 = vmul.f32 %v4845_v38, %v600_v54  ;;  %v641_v4 = vmul.f32 %v4845_v38, %v563_v34 }
 0x11d   : > { %v3752_v11 = vunpack.i.h.bf16 %v3750_v13  ;;  %v3751_v56 = vunpack.i.l.bf16 %v3750_v13  ;;  %v3740_v9 = vpop.permute.xlu0 %3739  ;;  %v3767_v37 = vunpack.i.h.bf16 %v3765_v60  ;;  %v3766_v12 = vunpack.i.l.bf16 %v3765_v60  ;;  %709 = vst.msk [vmem:[%s4868_s17 + $0x18] sm:$0xff] %vm705_vm6, %v676_v20  ;;  %v1574_v20 = vld [vmem:[#allocation2 + $0x100] sm:$0x3] }
 0x11e   : > { %v3742_v33 = vunpack.i.h.bf16 %v3740_v9  ;;  %v3741_v14 = vunpack.i.l.bf16 %v3740_v9  ;;  %1003 = vst.msk [vmem:[#allocation2 + $0x121] sm:$0xff] %vm491_vm1, %v925_v8  ;;  %v1861_v26 = vsel %vm1286_vm4, %v4963_v51, %v1860_v52  ;;  %v1158_v47 = vrot.slane %v4993_v43, 1 }
 0x11f   : > { %v2848_v59 = vsel %vm705_vm6, %v2816_v28, %v3766_v12  ;;  %v2849_v18 = vsel %vm705_vm6, %v2817_v16, %v3767_v37  ;;  %v858_v48 = vmul.f32 %v5028_v42, %v808_v24  ;;  %v3196_v16 = vld [vmem:[%s6199_s3] sm:$0x3]  ;;  %v5036_v52 = vsel %vm1286_vm4, %v4963_v51, %v2678_v19  ;;  %v2393_v37 = vld [vmem:[#allocation2 + $0xf8] sm:$0xff] }
 0x120   : > { %v1994_v22 = vsel %vm491_vm1, %v4579_v23, %v3742_v33  ;;  %v1993_v29 = vsel %vm491_vm1, %v4573_v21, %v3741_v14  ;;  %v2880_v50 = vpack.c.bf16 %v2849_v18, %v2848_v59  ;;  %v677_v60 = vadd.f32 %v4855_v46, %v641_v4  ;;  %v5056_v12 = vld [vmem:[#allocation2 + $0x100] sm:$0x3]  ;;  %v565_v14 = vpop.f32.mrf.mxu0 }
 0x121   : > { %v2025_v36 = vsel %vm705_vm6, %v1993_v29, %v3751_v56  ;;  %v2026_v39 = vsel %vm705_vm6, %v1994_v22, %v3752_v11  ;;  %v894_v13 = vadd.f32 %v5042_v63, %v858_v48  ;;  %v3948_v7 = vpack.i.bf16 %v1326_v35, %v4881_v25 }
 0x122   : > { %3944 = vrot.lane.b32.xlu2 %v3943_v32, %s4264_s18  ;;  %3954 = vrot.lane.b32.xlu1 %v3953_v53, %s4265_s19  ;;  %v2057_v57 = vpack.c.bf16 %v2026_v39, %v2025_v36  ;;  %v692_v32 = vadd.f32 %v4855_v46, %v656_v45  ;;  %v3958_v31 = vpack.i.bf16 %v2503_v27, %v5007_v0  ;;  %v3246_v2 = vsel %vm540_vm0, %v3196_v16, 0  ;;  %v603_v25 = vpop.f32.mrf.mxu2 }
 0x123   : > { %3979 = vrot.lane.b32.xlu0 %v3978_v41, %s4265_s19  ;;  %3681 = vmatmul.msk.bf16.vlgmr.msrb.gmra.mxu0 %vm2081_vm7, %v2880_v50  ;;  %v3983_v9 = vpack.i.bf16 %v1861_v26, %v5020_v3  ;;  %v926_v33 = vmax.f32 %v894_v13, 0.0  ;;  %710 = vst.msk [vmem:[%s4868_s17 + $0x20] sm:$0xff] %vm705_vm6, %v677_v60  ;;  %v1159_v18 = vsel %vm1109_vm5, %v4924_v5, %v1158_v47  ;;  %v2504_v53 = vrot.slane %v2392_v1, 1  ;;  %v811_v26 = vpop.f32.mrf.mxu3 }
 0x124   : > { %3639 = vmatmul.msk.bf16.vlgmr.msrb.gmra.mxu2 %vm2081_vm7, %v2057_v57  ;;  %v3770_v44 = vpop.permute.xlu2 %3769  ;;  %725 = vst.msk [vmem:[%s4868_s17 + $0x98] sm:$0xff] %vm705_vm6, %v692_v32  ;;  %3255 = vmatpush.bf16.msrb.mxu1 %v3246_v2  ;;  %v1335_v22 = vrot.slane %v4993_v43, 2  ;;  %v5073_v29 = vrot.slane %v2393_v37, 1  ;;  %v2507_v50 = vrot.slane %v5056_v12, 1  ;;  %v657_v8 = vmul.f32 %v4845_v38, %v603_v25  ;;  %v2395_v25 = vld [vmem:[#allocation2 + $0x108] sm:$0xff] }
 0x125   : > { %v3755_v55 = vpop.permute.xlu0 %3754  ;;  %v3772_v49 = vunpack.i.h.bf16 %v3770_v44  ;;  %v3771_v28 = vunpack.i.l.bf16 %v3770_v44  ;;  %1004 = vst.msk [vmem:[#allocation2 + $0x129] sm:$0xff] %vm491_vm1, %v926_v33  ;;  %v642_v54 = vmul.f32 %v4845_v38, %v565_v14  ;;  %v1330_v41 = vrot.slane %v4936_v17, 2  ;;  %v2396_v14 = vld [vmem:[#allocation2 + $0x110] sm:$0xff] }
 0x126   : > { %v3757_v61 = vunpack.i.h.bf16 %v3755_v55  ;;  %v3756_v62 = vunpack.i.l.bf16 %v3755_v55  ;;  %v1862_v36 = vrot.slane %v2392_v1, 2  ;;  %v5083_v39 = vrot.slane %v2393_v37, 2  ;;  %v4223_v55 = vld [vmem:[#allocation2 + $0x30] sm:$0xff] }
 0x127   : > { %v4003_v57 = vpack.i.bf16 %v1159_v18, %v5007_v0  ;;  %v1865_v35 = vrot.slane %v1574_v20, 2  ;;  %v693_v27 = vadd.f32 %v4855_v46, %v657_v8  ;;  %v5090_v17 = vsel %vm1109_vm5, %v2504_v53, %v5073_v29  ;;  %v2397_v53 = vld [vmem:[#allocation2 + $0x118] sm:$0x3] }
 0x128   : > { %v1466_v11 = vsel %vm491_vm1, %v4579_v23, %v3757_v61  ;;  %v1465_v56 = vsel %vm491_vm1, %v4573_v21, %v3756_v62  ;;  %v3963_v23 = vpack.i.bf16 %v5036_v52, %v5020_v3  ;;  %v1685_v21 = vsel %vm1109_vm5, %v4924_v5, %v1684_v30  ;;  %v568_v61 = vpop.f32.mrf.mxu0 }
 0x129   : > { %v1497_v40 = vsel %vm705_vm6, %v1465_v56, %v3771_v28  ;;  %v1498_v15 = vsel %vm705_vm6, %v1466_v11, %v3772_v49  ;;  %v3968_v5 = vpack.i.bf16 %v1685_v21, %v5007_v0  ;;  %v678_v30 = vadd.f32 %v4855_v46, %v642_v54  ;;  %726 = vst.msk [vmem:[%s4868_s17 + $0xa0] sm:$0xff] %vm705_vm6, %v693_v27  ;;  %v5123_v11 = vld [vmem:[#allocation2 + $0x100] sm:$0x3] }
 0x12a   : > { %3949 = vrot.lane.b32.xlu2 %v3948_v7, %s4264_s18  ;;  %3959 = vrot.lane.b32.xlu1 %v3958_v31, %s4265_s19  ;;  %v1528_v59 = vpack.c.bf16 %v1498_v15, %v1497_v40  ;;  %v2508_v47 = vsel %vm1109_vm5, %v5073_v29, %v2507_v50  ;;  %v1689_v48 = vrot.slane %v1574_v20, 1  ;;  %v859_v0 = vmul.f32 %v5028_v42, %v811_v26  ;;  %v605_v32 = vpop.f32.mrf.mxu2 }
 0x12b   : > { %3984 = vrot.lane.b32.xlu0 %v3983_v9, %s4264_s18  ;;  %v1331_v28 = vsel %vm1286_vm4, %v4934_v6, %v1330_v41  ;;  %v5104_v52 = vsel %vm1286_vm4, %v1862_v36, %v5083_v39  ;;  %711 = vst.msk [vmem:[%s4868_s17 + $0x28] sm:$0xff] %vm705_vm6, %v678_v30  ;;  %v658_v60 = vmul.f32 %v4845_v38, %v605_v32  ;;  %v2683_v2 = vrot.slane %v5056_v12, 2  ;;  %v1577_v41 = vld [vmem:[#allocation2 + $0x118] sm:$0x3] }
 0x12c   : > { %3660 = vmatmul.msk.bf16.gmra.mxu3 %vm2081_vm7, %v1528_v59  ;;  %v5079_v34 = vpop.permute.xlu2 %3794  ;;  %v1866_v7 = vsel %vm1286_vm4, %v5083_v39, %v1865_v35  ;;  %v643_v31 = vmul.f32 %v4845_v38, %v568_v61  ;;  %v5120_v1 = vsel %vm1109_vm5, %v5073_v29, %v1689_v48  ;;  %v3988_v33 = vpack.i.bf16 %v2508_v47, %v5090_v17 }
 0x12d   : > { %v3780_v19 = vpop.permute.xlu0 %3779  ;;  %v3775_v43 = vpop.permute.xlu1 %3774  ;;  %v694_v9 = vadd.f32 %v4855_v46, %v658_v60  ;;  %v5130_v40 = vsel %vm1286_vm4, %v4963_v51, %v1335_v22  ;;  %v3993_v59 = vpack.i.bf16 %v1331_v28, %v4949_v10  ;;  %v4018_v18 = vpack.i.bf16 %v1866_v7, %v5104_v52 }
 0x12e   : > { %v3782_v45 = vunpack.i.h.bf16 %v3780_v19  ;;  %v3781_v24 = vunpack.i.l.bf16 %v3780_v19  ;;  %v3777_v4 = vunpack.i.h.bf16 %v3775_v43  ;;  %v3776_v44 = vunpack.i.l.bf16 %v3775_v43  ;;  %v813_v22 = vpop.f32.mrf.mxu3  ;;  %v4224_v19 = vld [vmem:[#allocation2 + $0x38] sm:$0xff] }
 0x12f   : > { %v679_v15 = vadd.f32 %v4855_v46, %v643_v31  ;;  %v4008_v8 = vpack.i.bf16 %v5120_v1, %v5090_v17  ;;  %v1163_v51 = vrot.slane %v5123_v11, 1  ;;  %727 = vst.msk [vmem:[%s4868_s17 + $0xa8] sm:$0xff] %vm705_vm6, %v694_v9  ;;  %v5143_v54 = vsel %vm1286_vm4, %v5083_v39, %v2683_v2 }
 0x130   : > { %v1996_v16 = vsel %vm491_vm1, %v4621_v58, %v3777_v4  ;;  %v1995_v49 = vsel %vm491_vm1, %v4223_v55, %v3776_v44  ;;  %v895_v58 = vadd.f32 %v5042_v63, %v859_v0  ;;  %v2509_v10 = vrot.slane %v2395_v25, 1 }
 0x131   : > { %v2027_v62 = vsel %vm705_vm6, %v1995_v49, %v3781_v24  ;;  %v2028_v13 = vsel %vm705_vm6, %v1996_v16, %v3782_v45  ;;  %v860_v36 = vmul.f32 %v5028_v42, %v813_v22  ;;  %712 = vst.msk [vmem:[%s4868_s17 + $0x30] sm:$0xff] %vm705_vm6, %v679_v15  ;;  %v2512_v35 = vrot.slane %v2397_v53, 1  ;;  %v570_v16 = vpop.f32.mrf.mxu0 }
 0x132   : > { %3964 = vrot.lane.b32.xlu2 %v3963_v23, %s4264_s18  ;;  %3969 = vrot.lane.b32.xlu1 %v3968_v5, %s4265_s19  ;;  %v2058_v6 = vpack.c.bf16 %v2028_v13, %v2027_v62  ;;  %v927_v56 = vmax.f32 %v895_v58, 0.0  ;;  %v5145_v5 = vrot.slane %v2396_v14, 1  ;;  %v1867_v27 = vrot.slane %v2395_v25, 2  ;;  %v608_v0 = vpop.f32.mrf.mxu2 }
 0x133   : > { %4004 = vrot.lane.b32.xlu0 %v4003_v57, %s4265_s19  ;;  %v5154_v24 = vrot.slane %v2396_v14, 2  ;;  %v896_v4 = vadd.f32 %v5042_v63, %v860_v36  ;;  %v1164_v26 = vsel %vm1109_vm5, %v5073_v29, %v1163_v51  ;;  %v1870_v47 = vrot.slane %v1577_v41, 2  ;;  %v4225_v14 = vld [vmem:[#allocation2 + $0x50] sm:$0xff]  ;;  %v5219_v36 = vld [vmem:[#allocation2 + $0x120] sm:$0xff] }
 0x134   : > { %3640 = vmatmul.msk.bf16.gmra.mxu2 %vm2081_vm7, %v2058_v6  ;;  %v3800_v37 = vpop.permute.xlu2 %3799  ;;  %1005 = vst.msk [vmem:[#allocation2 + $0x139] sm:$0xff] %vm491_vm1, %v927_v56  ;;  %v1694_v48 = vrot.slane %v1577_v41, 1  ;;  %v2688_v49 = vrot.slane %v2397_v53, 2  ;;  %v659_v28 = vmul.f32 %v4845_v38, %v608_v0  ;;  %v644_v32 = vmul.f32 %v4845_v38, %v570_v16  ;;  %v5175_v6 = vld [vmem:[#allocation2 + $0x118] sm:$0x3] }
 0x135   : > { %v3785_v12 = vpop.permute.xlu0 %3784  ;;  %v3802_v23 = vunpack.i.h.bf16 %v3800_v37  ;;  %v3801_v21 = vunpack.i.l.bf16 %v3800_v37  ;;  %v3797_v61 = vunpack.i.h.bf16 %v5079_v34  ;;  %v3796_v62 = vunpack.i.l.bf16 %v5079_v34 }
 0x136   : > { %v3787_v20 = vunpack.i.h.bf16 %v3785_v12  ;;  %v3786_v50 = vunpack.i.l.bf16 %v3785_v12  ;;  %v3998_v58 = vpack.i.bf16 %v5143_v54, %v5104_v52  ;;  %v5173_v60 = vsel %vm1109_vm5, %v2509_v10, %v5145_v5  ;;  %v4226_v12 = vld [vmem:[#allocation2 + $0x48] sm:$0xff] }
 0x137   : > { %v5181_v34 = vsel %vm1109_vm5, %v5145_v5, %v2512_v35  ;;  %v5185_v56 = vsel %vm1286_vm4, %v1867_v27, %v5154_v24  ;;  %v5190_v9 = vsel %vm1286_vm4, %v5154_v24, %v1870_v47  ;;  %v5194_v37 = vsel %vm1109_vm5, %v5145_v5, %v1694_v48  ;;  %v5242_v47 = vld [vmem:[#allocation2 + $0x130] sm:$0x3] }
 0x138   : > { %v1468_v43 = vsel %vm491_vm1, %v4224_v19, %v3787_v20  ;;  %v1467_v57 = vsel %vm491_vm1, %v4223_v55, %v3786_v50  ;;  %v928_v55 = vmax.f32 %v896_v4, 0.0  ;;  %v680_v25 = vadd.f32 %v4855_v46, %v644_v32 }
 0x139   : > { %v1499_v30 = vsel %vm705_vm6, %v1467_v57, %v3801_v21  ;;  %v1500_v45 = vsel %vm705_vm6, %v1468_v43, %v3802_v23  ;;  %v5202_v21 = vsel %vm1286_vm4, %v5154_v24, %v2688_v49  ;;  %v4033_v53 = vpack.i.bf16 %v1164_v26, %v5090_v17  ;;  %v573_v57 = vpop.f32.mrf.mxu0  ;;  %v2399_v26 = vld [vmem:[#allocation2 + $0x128] sm:$0xff] }
 0x13a   : > { %3989 = vrot.lane.b32.xlu1 %v3988_v33, %s4265_s19  ;;  %3994 = vrot.lane.b32.xlu2 %v3993_v59, %s4264_s18  ;;  %v1529_v44 = vpack.c.bf16 %v1500_v45, %v1499_v30  ;;  %1006 = vst.msk [vmem:[#allocation2 + $0x141] sm:$0xff] %vm491_vm1, %v928_v55  ;;  %v695_v33 = vadd.f32 %v4855_v46, %v659_v28  ;;  %v1168_v59 = vrot.slane %v5175_v6, 1  ;;  %v610_v43 = vpop.f32.mrf.mxu2  ;;  %v1340_v1 = vrot.slane %v5123_v11, 2 }
 0x13b   : > { %4019 = vrot.lane.b32.xlu0 %v4018_v18, %s4264_s18  ;;  %v816_v18 = vpop.f32.mrf.mxu3  ;;  %v4023_v54 = vpack.i.bf16 %v5181_v34, %v5173_v60  ;;  %v4013_v10 = vpack.i.bf16 %v5130_v40, %v5020_v3  ;;  %v4048_v41 = vpack.i.bf16 %v5190_v9, %v5185_v56  ;;  %713 = vst.msk [vmem:[%s4868_s17 + $0x38] sm:$0xff] %vm705_vm6, %v680_v25  ;;  %v2514_v48 = vrot.slane %v5219_v36, 1 }
 0x13c   : > { %3661 = vmatmul.msk.bf16.gmra.mxu3 %vm2081_vm7, %v1529_v44  ;;  %v3790_v13 = vpop.permute.xlu1 %3789  ;;  %v5167_v29 = vpop.permute.xlu2 %3824  ;;  %728 = vst.msk [vmem:[%s4868_s17 + $0xb0] sm:$0xff] %vm705_vm6, %v695_v33  ;;  %v861_v51 = vmul.f32 %v5028_v42, %v816_v18  ;;  %v4038_v19 = vpack.i.bf16 %v5194_v37, %v5173_v60  ;;  %v4028_v3 = vpack.i.bf16 %v5202_v21, %v5185_v56 }
 0x13d   : > { %v3792_v7 = vunpack.i.h.bf16 %v3790_v13  ;;  %v3791_v31 = vunpack.i.l.bf16 %v3790_v13  ;;  %v5177_v2 = vpop.permute.xlu0 %3809  ;;  %v5235_v17 = vsel %vm1109_vm5, %v5145_v5, %v1168_v59  ;;  %v645_v35 = vmul.f32 %v4845_v38, %v573_v57 }
 0x13e   : > { %v897_v40 = vadd.f32 %v5042_v63, %v861_v51  ;;  %v3812_v27 = vunpack.i.h.bf16 %v5177_v2  ;;  %v3811_v30 = vunpack.i.l.bf16 %v5177_v2 }
 0x13f   : > { %v2819_v15 = vsel %vm491_vm1, %v4225_v14, %v3792_v7  ;;  %v2818_v23 = vsel %vm491_vm1, %v4226_v12, %v3791_v31  ;;  %v2517_v7 = vrot.slane %v5242_v47, 1  ;;  %v1580_v31 = vld [vmem:[#allocation2 + $0x130] sm:$0x3] }
 0x140   : > { %v2850_v20 = vsel %vm705_vm6, %v2818_v23, %v3796_v62  ;;  %v2851_v50 = vsel %vm705_vm6, %v2819_v15, %v3797_v61  ;;  %v929_v44 = vmax.f32 %v897_v40, 0.0  ;;  %v681_v61 = vadd.f32 %v4855_v46, %v645_v35 }
 0x141   : > { %v2881_v22 = vpack.c.bf16 %v2851_v50, %v2850_v20  ;;  %v1875_v20 = vrot.slane %v1580_v31, 2  ;;  %v575_v51 = vpop.f32.mrf.mxu0  ;;  %v1699_v40 = vrot.slane %v1580_v31, 1  ;;  %v1345_v35 = vrot.slane %v5175_v6, 2  ;;  %v4227_v6 = vld [vmem:[#allocation2 + $0x68] sm:$0xff] }
 0x142   : > { %4009 = vrot.lane.b32.xlu1 %v4008_v8, %s4265_s19  ;;  %3999 = vrot.lane.b32.xlu2 %v3998_v58, %s4264_s18  ;;  %v660_v8 = vmul.f32 %v4845_v38, %v610_v43  ;;  %1007 = vst.msk [vmem:[#allocation2 + $0x151] sm:$0xff] %vm491_vm1, %v929_v44  ;;  %v5250_v58 = vrot.slane %v2399_v26, 1  ;;  %v613_v50 = vpop.f32.mrf.mxu2 }
 0x143   : > { %4034 = vrot.lane.b32.xlu0 %v4033_v53, %s4265_s19  ;;  %3682 = vmatmul.msk.bf16.gmra.mxu0 %vm2081_vm7, %v2881_v22  ;;  %v818_v2 = vpop.f32.mrf.mxu3  ;;  %714 = vst.msk [vmem:[%s4868_s17 + $0x40] sm:$0xff] %vm705_vm6, %v681_v61  ;;  %v5267_v53 = vrot.slane %v2399_v26, 2  ;;  %v661_v43 = vmul.f32 %v4845_v38, %v613_v50  ;;  %v5315_v61 = vld [vmem:[#allocation2 + $0x130] sm:$0x3]  ;;  %v5347_v37 = vsel %vm1286_vm4, %v5154_v24, %v1345_v35 }
 0x144   : > { %v3805_v45 = vpop.permute.xlu1 %3804  ;;  %v3830_v4 = vpop.permute.xlu2 %3829  ;;  %v696_v32 = vadd.f32 %v4855_v46, %v660_v8  ;;  %v862_v18 = vmul.f32 %v5028_v42, %v818_v2  ;;  %v5279_v57 = vsel %vm1109_vm5, %v2514_v48, %v5250_v58  ;;  %v5287_v8 = vsel %vm1286_vm4, %v5083_v39, %v1340_v1  ;;  %v5326_v2 = vld [vmem:[#allocation2 + $0x138] sm:$0xff] }
 0x145   : > { %v3807_v5 = vunpack.i.h.bf16 %v3805_v45  ;;  %v3806_v0 = vunpack.i.l.bf16 %v3805_v45  ;;  %v3815_v16 = vpop.permute.xlu0 %3814  ;;  %v3832_v11 = vunpack.i.h.bf16 %v3830_v4  ;;  %v3831_v55 = vunpack.i.l.bf16 %v3830_v4 }
 0x146   : > { %v3817_v49 = vunpack.i.h.bf16 %v3815_v16  ;;  %v3816_v28 = vunpack.i.l.bf16 %v3815_v16  ;;  %729 = vst.msk [vmem:[%s4868_s17 + $0xb8] sm:$0xff] %vm705_vm6, %v696_v32  ;;  %v898_v22 = vadd.f32 %v5042_v63, %v862_v18  ;;  %v5300_v48 = vsel %vm1286_vm4, %v5267_v53, %v1875_v20  ;;  %v2402_v18 = vld [vmem:[#allocation2 + $0x140] sm:$0xff] }
 0x147   : > { %v1998_v62 = vsel %vm491_vm1, %v4225_v14, %v3807_v5  ;;  %v1997_v13 = vsel %vm491_vm1, %v4226_v12, %v3806_v0  ;;  %v697_v1 = vadd.f32 %v4855_v46, %v661_v43  ;;  %v5307_v16 = vsel %vm1109_vm5, %v5250_v58, %v1699_v40 }
 0x148   : > { %v1470_v34 = vsel %vm491_vm1, %v4225_v14, %v3817_v49  ;;  %v1469_v9 = vsel %vm491_vm1, %v4226_v12, %v3816_v28  ;;  %v2029_v33 = vsel %vm705_vm6, %v1997_v13, %v3811_v30  ;;  %v2030_v25 = vsel %vm705_vm6, %v1998_v62, %v3812_v27 }
 0x149   : > { %v2059_v15 = vpack.c.bf16 %v2030_v25, %v2029_v33  ;;  %v1501_v23 = vsel %vm705_vm6, %v1469_v9, %v3831_v55  ;;  %v1502_v59 = vsel %vm705_vm6, %v1470_v34, %v3832_v11  ;;  %v1872_v12 = vrot.slane %v5219_v36, 2  ;;  %730 = vst.msk [vmem:[%s4868_s17 + $0xc0] sm:$0xff] %vm705_vm6, %v697_v1  ;;  %v578_v25 = vpop.f32.mrf.mxu0 }
 0x14a   : > { %4024 = vrot.lane.b32.xlu1 %v4023_v54, %s4265_s19  ;;  %4014 = vrot.lane.b32.xlu2 %v4013_v10, %s4264_s18  ;;  %v1530_v14 = vpack.c.bf16 %v1502_v59, %v1501_v23  ;;  %v646_v54 = vmul.f32 %v4845_v38, %v575_v51  ;;  %v3827_v27 = vunpack.i.h.bf16 %v5167_v29  ;;  %v3826_v30 = vunpack.i.l.bf16 %v5167_v29  ;;  %v4228_v29 = vld [vmem:[#allocation2 + $0x60] sm:$0xff]  ;;  %v615_v33 = vpop.f32.mrf.mxu2 }
 0x14b   : > { %4049 = vrot.lane.b32.xlu0 %v4048_v41, %s4264_s18  ;;  %3641 = vmatmul.msk.bf16.gmra.mxu2 %vm2081_vm7, %v2059_v15  ;;  %v5283_v41 = vsel %vm1109_vm5, %v5250_v58, %v2517_v7  ;;  %v5296_v26 = vsel %vm1286_vm4, %v1872_v12, %v5267_v53  ;;  %v930_v39 = vmax.f32 %v898_v22, 0.0  ;;  %v821_v11 = vpop.f32.mrf.mxu3  ;;  %v4063_v49 = vpack.i.bf16 %v5235_v17, %v5173_v60 }
 0x14c   : > { %3662 = vmatmul.msk.bf16.gmra.mxu3 %vm2081_vm7, %v1530_v14  ;;  %v3820_v10 = vpop.permute.xlu1 %3819  ;;  %v5275_v36 = vpop.permute.xlu2 %3854  ;;  %v682_v55 = vadd.f32 %v4855_v46, %v646_v54  ;;  %v863_v62 = vmul.f32 %v5028_v42, %v821_v11  ;;  %v4053_v7 = vpack.i.bf16 %v5283_v41, %v5279_v57  ;;  %v4043_v31 = vpack.i.bf16 %v5287_v8, %v5104_v52  ;;  %v5353_v14 = vld [vmem:[#allocation2 + $0x148] sm:$0x3] }
 0x14d   : > { %v3822_v45 = vunpack.i.h.bf16 %v3820_v10  ;;  %v3821_v4 = vunpack.i.l.bf16 %v3820_v10  ;;  %v5292_v44 = vpop.permute.xlu0 %3839  ;;  %1008 = vst.msk [vmem:[#allocation2 + $0x159] sm:$0xff] %vm491_vm1, %v930_v39  ;;  %v4078_v17 = vpack.i.bf16 %v5300_v48, %v5296_v26  ;;  %v4068_v52 = vpack.i.bf16 %v5307_v16, %v5279_v57 }
 0x14e   : > { %v2693_v34 = vrot.slane %v5242_v47, 2  ;;  %v899_v9 = vadd.f32 %v5042_v63, %v863_v62  ;;  %715 = vst.msk [vmem:[%s4868_s17 + $0x48] sm:$0xff] %vm705_vm6, %v682_v55  ;;  %v1173_v60 = vrot.slane %v5315_v61, 1  ;;  %v662_v21 = vmul.f32 %v4845_v38, %v615_v33 }
 0x14f   : > { %v2821_v5 = vsel %vm491_vm1, %v4227_v6, %v3822_v45  ;;  %v2820_v0 = vsel %vm491_vm1, %v4228_v29, %v3821_v4  ;;  %v3841_v47 = vunpack.i.l.bf16 %v5292_v44  ;;  %v2519_v12 = vrot.slane %v5326_v2, 1 }
 0x150   : > { %v2852_v28 = vsel %vm705_vm6, %v2820_v0, %v3826_v30  ;;  %v2853_v32 = vsel %vm705_vm6, %v2821_v5, %v3827_v27  ;;  %v931_v59 = vmax.f32 %v899_v9, 0.0  ;;  %v698_v54 = vadd.f32 %v4855_v46, %v662_v21  ;;  %v5364_v30 = vld [vmem:[#allocation2 + $0x148] sm:$0x3] }
 0x151   : > { %v2882_v13 = vpack.c.bf16 %v2853_v32, %v2852_v28  ;;  %v5361_v35 = vrot.slane %v2402_v18, 1  ;;  %v2522_v27 = vrot.slane %v5353_v14, 1  ;;  %v1880_v55 = vrot.slane %v5364_v30, 2  ;;  %v580_v28 = vpop.f32.mrf.mxu0 }
 0x152   : > { %4039 = vrot.lane.b32.xlu1 %v4038_v19, %s4265_s19  ;;  %4029 = vrot.lane.b32.xlu2 %v4028_v3, %s4264_s18  ;;  %v647_v19 = vmul.f32 %v4845_v38, %v578_v25  ;;  %v3842_v3 = vunpack.i.h.bf16 %v5292_v44  ;;  %1009 = vst.msk [vmem:[#allocation2 + $0x169] sm:$0xff] %vm491_vm1, %v931_v59  ;;  %v1174_v9 = vsel %vm1109_vm5, %v5250_v58, %v1173_v60  ;;  %v3856_v25 = vunpack.i.l.bf16 %v5275_v36  ;;  %v4231_v59 = vld [vmem:[#allocation2 + $0x78] sm:$0xff] }
 0x153   : > { %4064 = vrot.lane.b32.xlu0 %v4063_v49, %s4265_s19  ;;  %3683 = vmatmul.msk.bf16.gmra.mxu0 %vm2081_vm7, %v2882_v13  ;;  %v823_v45 = vpop.f32.mrf.mxu3  ;;  %731 = vst.msk [vmem:[%s4868_s17 + $0xc8] sm:$0xff] %vm705_vm6, %v698_v54  ;;  %v618_v49 = vpop.f32.mrf.mxu2  ;;  %v648_v13 = vmul.f32 %v4845_v38, %v580_v28  ;;  %v5401_v33 = vsel %vm1109_vm5, %v5361_v35, %v2522_v27  ;;  %v5439_v27 = vld [vmem:[#allocation2 + $0x150] sm:$0xff] }
 0x154   : > { %v3835_v15 = vpop.permute.xlu1 %3834  ;;  %v3860_v23 = vpop.permute.xlu2 %3859  ;;  %v683_v10 = vadd.f32 %v4855_v46, %v647_v19  ;;  %v864_v0 = vmul.f32 %v5028_v42, %v823_v45  ;;  %v663_v62 = vmul.f32 %v4845_v38, %v618_v49  ;;  %v3857_v38 = vunpack.i.h.bf16 %v5275_v36 }
 0x155   : > { %v3837_v20 = vunpack.i.h.bf16 %v3835_v15  ;;  %v3836_v50 = vunpack.i.l.bf16 %v3835_v15  ;;  %v3845_v24 = vpop.permute.xlu0 %3844  ;;  %v3862_v51 = vunpack.i.h.bf16 %v3860_v23  ;;  %v3861_v22 = vunpack.i.l.bf16 %v3860_v23  ;;  %v4230_v15 = vld [vmem:[#allocation2 + $0x80] sm:$0xff] }
 0x156   : > { %v3847_v40 = vunpack.i.h.bf16 %v3845_v24  ;;  %v3846_v43 = vunpack.i.l.bf16 %v3845_v24  ;;  %716 = vst.msk [vmem:[%s4868_s17 + $0x50] sm:$0xff] %vm705_vm6, %v683_v10  ;;  %v900_v32 = vadd.f32 %v5042_v63, %v864_v0  ;;  %v4093_v54 = vpack.i.bf16 %v1174_v9, %v5279_v57  ;;  %v2405_v0 = vld [vmem:[#allocation2 + $0x158] sm:$0xff] }
 0x157   : > { %v2000_v41 = vsel %vm491_vm1, %v4227_v6, %v3837_v20  ;;  %v1999_v8 = vsel %vm491_vm1, %v4228_v29, %v3836_v50  ;;  %v2698_v45 = vrot.slane %v5353_v14, 2 }
 0x158   : > { %v1472_v4 = vsel %vm491_vm1, %v4227_v6, %v3847_v40  ;;  %v1471_v44 = vsel %vm491_vm1, %v4228_v29, %v3846_v43  ;;  %v2031_v48 = vsel %vm705_vm6, %v1999_v8, %v3841_v47  ;;  %v2032_v46 = vsel %vm705_vm6, %v2000_v41, %v3842_v3  ;;  %v5418_v47 = vld [vmem:[%s6208_s12] ss:$0 sm:$0xff]  ;;  %v5429_v40 = vld [vmem:[#allocation2 + $0x148] sm:$0x3] }
 0x159   : > { %v1504_v39 = vsel %vm705_vm6, %v1472_v4, %v3862_v51  ;;  %v1503_v1 = vsel %vm705_vm6, %v1471_v44, %v3861_v22  ;;  %v2060_v5 = vpack.c.bf16 %v2032_v46, %v2031_v48  ;;  %v1877_v6 = vrot.slane %v5326_v2, 2  ;;  %v583_v44 = vpop.f32.mrf.mxu0 }
 0x15a   : > { %v1531_v11 = vpack.c.bf16 %v1504_v39, %v1503_v1  ;;  %4054 = vrot.lane.b32.xlu1 %v4053_v7, %s4265_s19  ;;  %4044 = vrot.lane.b32.xlu2 %v4043_v31, %s4264_s18  ;;  %v5380_v29 = vrot.slane %v2402_v18, 2  ;;  %v2694_v2 = vsel %vm1286_vm4, %v5267_v53, %v2693_v34  ;;  %v932_v60 = vmax.f32 %v900_v32, 0.0 }
 0x15b   : > { %4079 = vrot.lane.b32.xlu0 %v4078_v17, %s4264_s18  ;;  %3642 = vmatmul.msk.bf16.gmra.mxu2 %vm2081_vm7, %v2060_v5  ;;  %v5397_v17 = vsel %vm1109_vm5, %v2519_v12, %v5361_v35  ;;  %v699_v36 = vadd.f32 %v5418_v47, %v663_v62  ;;  %v1704_v12 = vrot.slane %v5364_v30, 1  ;;  %v826_v20 = vpop.f32.mrf.mxu3  ;;  %v684_v50 = vadd.f32 %v5418_v47, %v648_v13 }
 0x15c   : > { %3663 = vmatmul.msk.bf16.gmra.mxu3 %vm2081_vm7, %v1531_v11  ;;  %v3850_v7 = vpop.permute.xlu1 %3849  ;;  %v5389_v31 = vpop.permute.xlu2 %3884  ;;  %v5409_v34 = vsel %vm1286_vm4, %v1877_v6, %v5380_v29  ;;  %v5413_v58 = vsel %vm1286_vm4, %v5380_v29, %v1880_v55  ;;  %v4058_v24 = vpack.i.bf16 %v2694_v2, %v5296_v26  ;;  %1010 = vst.msk [vmem:[#allocation2 + $0x171] sm:$0xff] %vm491_vm1, %v932_v60  ;;  %v1178_v16 = vrot.slane %v5429_v40, 1  ;;  %v5469_v11 = vld [vmem:[#allocation2 + $0x160] sm:$0x3] }
 0x15d   : > { %v3852_v21 = vunpack.i.h.bf16 %v3850_v7  ;;  %v3851_v19 = vunpack.i.l.bf16 %v3850_v7  ;;  %v5405_v3 = vpop.permute.xlu0 %3869  ;;  %v865_v43 = vmul.f32 %v5028_v42, %v826_v20  ;;  %v4083_v41 = vpack.i.bf16 %v5401_v33, %v5397_v17  ;;  %732 = vst.msk [vmem:[%s4868_s17 + $0xd0] sm:$0xff] %vm705_vm6, %v699_v36 }
 0x15e   : > { %v4073_v8 = vpack.i.bf16 %v5347_v37, %v5185_v56  ;;  %v4108_v30 = vpack.i.bf16 %v5413_v58, %v5409_v34  ;;  %717 = vst.msk [vmem:[%s4868_s17 + $0x58] sm:$0xff] %vm705_vm6, %v684_v50  ;;  %v1350_v56 = vrot.slane %v5315_v61, 2  ;;  %v620_v37 = vpop.f32.mrf.mxu2  ;;  %v5457_v57 = vsel %vm1109_vm5, %v5361_v35, %v1704_v12 }
 0x15f   : > { %v2823_v23 = vsel %vm491_vm1, %v4230_v15, %v3852_v21  ;;  %v2822_v18 = vsel %vm491_vm1, %v4231_v59, %v3851_v19  ;;  %v901_v4 = vadd.f32 %v5042_v63, %v865_v43  ;;  %v3872_v48 = vunpack.i.h.bf16 %v5405_v3 }
 0x160   : > { %v2854_v51 = vsel %vm705_vm6, %v2822_v18, %v3856_v25  ;;  %v2855_v22 = vsel %vm705_vm6, %v2823_v23, %v3857_v38  ;;  %v3871_v46 = vunpack.i.l.bf16 %v5405_v3  ;;  %v2524_v6 = vrot.slane %v5439_v27, 1 }
 0x161   : > { %v2883_v10 = vpack.c.bf16 %v2855_v22, %v2854_v51  ;;  %v933_v5 = vmax.f32 %v901_v4, 0.0  ;;  %v5477_v25 = vrot.slane %v2405_v0, 1  ;;  %v2527_v21 = vrot.slane %v5469_v11, 1 }
 0x162   : > { %4069 = vrot.lane.b32.xlu1 %v4068_v52, %s4265_s19  ;;  %4059 = vrot.lane.b32.xlu2 %v4058_v24, %s4264_s18  ;;  %v5463_v52 = vld [vmem:[%s6207_s11] ss:$0 sm:$0xff]  ;;  %v585_v24 = vpop.f32.mrf.mxu0 }
 0x163   : > { %4094 = vrot.lane.b32.xlu0 %v4093_v54, %s4265_s19  ;;  %3684 = vmatmul.msk.bf16.gmra.mxu0 %vm2081_vm7, %v2883_v10  ;;  %v664_v14 = vmul.f32 %v5463_v52, %v620_v37  ;;  %v649_v61 = vmul.f32 %v5463_v52, %v583_v44  ;;  %1011 = vst.msk [vmem:[#allocation2 + $0x181] sm:$0xff] %vm491_vm1, %v933_v5  ;;  %v828_v19 = vpop.f32.mrf.mxu3  ;;  %v5520_v44 = vld [vmem:[#allocation2 + $0x160] sm:$0x3] }
 0x164   : > { %v3865_v39 = vpop.permute.xlu1 %3864  ;;  %v3890_v1 = vpop.permute.xlu2 %3889  ;;  %v866_v20 = vmul.f32 %v5028_v42, %v828_v19  ;;  %v4098_v42 = vpack.i.bf16 %v5457_v57, %v5397_v17  ;;  %v1179_v10 = vsel %vm1109_vm5, %v5361_v35, %v1178_v16  ;;  %v5518_v37 = vsel %vm1109_vm5, %v5477_v25, %v2527_v21  ;;  %v4233_v16 = vld [vmem:[#allocation2 + $0x98] sm:$0xff] }
 0x165   : > { %v3867_v55 = vunpack.i.h.bf16 %v3865_v39  ;;  %v3866_v49 = vunpack.i.l.bf16 %v3865_v39  ;;  %v3875_v28 = vpop.permute.xlu0 %3874  ;;  %v3892_v32 = vunpack.i.h.bf16 %v3890_v1  ;;  %v3891_v62 = vunpack.i.l.bf16 %v3890_v1 }
 0x166   : > { %v3877_v13 = vunpack.i.h.bf16 %v3875_v28  ;;  %v3876_v7 = vunpack.i.l.bf16 %v3875_v28  ;;  %v700_v2 = vadd.f32 %v5418_v47, %v664_v14  ;;  %v685_v9 = vadd.f32 %v5418_v47, %v649_v61  ;;  %v4234_v61 = vld [vmem:[#allocation2 + $0x90] sm:$0xff] }
 0x167   : > { %v2002_v33 = vsel %vm491_vm1, %v4230_v15, %v3867_v55  ;;  %v2001_v38 = vsel %vm491_vm1, %v4231_v59, %v3866_v49  ;;  %v902_v51 = vadd.f32 %v5042_v63, %v866_v20  ;;  %v3886_v35 = vunpack.i.l.bf16 %v5389_v31 }
 0x168   : > { %v1474_v3 = vsel %vm491_vm1, %v4230_v15, %v3877_v13  ;;  %v1473_v58 = vsel %vm491_vm1, %v4231_v59, %v3876_v7  ;;  %v2033_v60 = vsel %vm705_vm6, %v2001_v38, %v3871_v46  ;;  %v2034_v36 = vsel %vm705_vm6, %v2002_v33, %v3872_v48  ;;  %733 = vst.msk [vmem:[%s4868_s17 + $0xd8] sm:$0xff] %vm705_vm6, %v700_v2  ;;  %v623_v59 = vpop.f32.mrf.mxu2 }
 0x169   : > { %v1506_v23 = vsel %vm705_vm6, %v1474_v3, %v3892_v32  ;;  %v1505_v18 = vsel %vm705_vm6, %v1473_v58, %v3891_v62  ;;  %v2061_v12 = vpack.c.bf16 %v2034_v36, %v2033_v60  ;;  %718 = vst.msk [vmem:[%s4868_s17 + $0x60] sm:$0xff] %vm705_vm6, %v685_v9  ;;  %v5495_v15 = vsel %vm1286_vm4, %v5267_v53, %v1350_v56  ;;  %v5559_v3 = vld [vmem:[#allocation2 + $0x160] sm:$0x3] }
 0x16a   : > { %v1532_v50 = vpack.c.bf16 %v1506_v23, %v1505_v18  ;;  %4084 = vrot.lane.b32.xlu1 %v4083_v41, %s4265_s19  ;;  %4074 = vrot.lane.b32.xlu2 %v4073_v8, %s4264_s18  ;;  %v665_v22 = vmul.f32 %v5463_v52, %v623_v59  ;;  %v2699_v53 = vsel %vm1286_vm4, %v5380_v29, %v2698_v45  ;;  %v1882_v41 = vrot.slane %v5439_v27, 2  ;;  %v588_v13 = vpop.f32.mrf.mxu0 }
 0x16b   : > { %4109 = vrot.lane.b32.xlu0 %v4108_v30, %s4264_s18  ;;  %3643 = vmatmul.msk.bf16.gmra.mxu2 %vm2081_vm7, %v2061_v12  ;;  %v650_v8 = vmul.f32 %v5463_v52, %v585_v24  ;;  %v5514_v56 = vsel %vm1109_vm5, %v2524_v6, %v5477_v25  ;;  %v3887_v45 = vunpack.i.h.bf16 %v5389_v31  ;;  %v934_v27 = vmax.f32 %v902_v51, 0.0 }
 0x16c   : > { %3664 = vmatmul.msk.bf16.gmra.mxu3 %vm2081_vm7, %v1532_v50  ;;  %v3880_v43 = vpop.permute.xlu1 %3879  ;;  %v5504_v54 = vpop.permute.xlu2 %3914  ;;  %v701_v57 = vadd.f32 %v5418_v47, %v665_v22  ;;  %v5527_v46 = vrot.slane %v2405_v0, 2  ;;  %v4088_v1 = vpack.i.bf16 %v2699_v53, %v5409_v34  ;;  %v1885_v6 = vrot.slane %v5520_v44, 2 }
 0x16d   : > { %v3882_v30 = vunpack.i.h.bf16 %v3880_v43  ;;  %v3881_v4 = vunpack.i.l.bf16 %v3880_v43  ;;  %v3900_v63 = vpop.permute.xlu0 %3899  ;;  %v686_v39 = vadd.f32 %v5418_v47, %v650_v8  ;;  %1012 = vst.msk [vmem:[#allocation2 + $0x189] sm:$0xff] %vm491_vm1, %v934_v27  ;;  %v4123_v55 = vpack.i.bf16 %v1179_v10, %v5397_v17 }
 0x16e   : > { %734 = vst.msk [vmem:[%s4868_s17 + $0xe0] sm:$0xff] %vm705_vm6, %v701_v57  ;;  %v4113_v0 = vpack.i.bf16 %v5518_v37, %v5514_v56  ;;  %v4103_v28 = vpack.i.bf16 %v5495_v15, %v5296_v26  ;;  %v1355_v32 = vrot.slane %v5429_v40, 2  ;;  %v5551_v17 = vsel %vm1286_vm4, %v1882_v41, %v5527_v46  ;;  %v5583_v37 = vld [vmem:[#allocation2 + $0x170] sm:$0xff] }
 0x16f   : > { %v2825_v14 = vsel %vm491_vm1, %v4233_v16, %v3882_v30  ;;  %v2824_v48 = vsel %vm491_vm1, %v4234_v61, %v3881_v4  ;;  %719 = vst.msk [vmem:[%s4868_s17 + $0x68] sm:$0xff] %vm705_vm6, %v686_v39  ;;  %v1709_v7 = vrot.slane %v5520_v44, 1  ;;  %v651_v26 = vmul.f32 %v5463_v52, %v588_v13  ;;  %v5577_v4 = vld [vmem:[#allocation2 + $0x168] sm:$0xff]  ;;  %v5585_v44 = vld [vmem:[#allocation2 + $0x178] sm:$0x3]  ;;  %v4235_v13 = vld [vmem:[#allocation2 + $0xb0] sm:$0xff] }
 0x170   : > { %v2856_v5 = vsel %vm705_vm6, %v2824_v48, %v3886_v35  ;;  %v2857_v31 = vsel %vm705_vm6, %v2825_v14, %v3887_v45  ;;  %v625_v62 = vpop.f32.mrf.mxu2  ;;  %v3902_v9 = vunpack.i.h.bf16 %v3900_v63  ;;  %v3901_v33 = vunpack.i.l.bf16 %v3900_v63 }
 0x171   : > { %v2884_v49 = vpack.c.bf16 %v2857_v31, %v2856_v5  ;;  %v666_v2 = vmul.f32 %v5463_v52, %v625_v62  ;;  %v1886_v21 = vsel %vm1286_vm4, %v5527_v46, %v1885_v6  ;;  %v2703_v19 = vrot.slane %v5469_v11, 2 }
 0x172   : > { %4099 = vrot.lane.b32.xlu1 %v4098_v42, %s4265_s19  ;;  %4089 = vrot.lane.b32.xlu2 %v4088_v1, %s4264_s18  ;;  %v687_v15 = vadd.f32 %v5418_v47, %v651_v26  ;;  %v4138_v11 = vpack.i.bf16 %v1886_v21, %v5551_v17  ;;  %v1183_v42 = vrot.slane %v5559_v3, 1  ;;  %v1710_v30 = vsel %vm1109_vm5, %v5477_v25, %v1709_v7  ;;  %v590_v35 = vpop.f32.mrf.mxu0 }
 0x173   : > { %4124 = vrot.lane.b32.xlu0 %v4123_v55, %s4265_s19  ;;  %3685 = vmatmul.msk.bf16.gmra.mxu0 %vm2081_vm7, %v2884_v49  ;;  %v702_v50 = vadd.f32 %v5418_v47, %v666_v2  ;;  %v5591_v27 = vsel %vm1286_vm4, %v5380_v29, %v1355_v32  ;;  %v4128_v48 = vpack.i.bf16 %v1710_v30, %v5514_v56  ;;  %v2529_v29 = vrot.slane %v5577_v4, 1  ;;  %v4236_v2 = vld [vmem:[#allocation2 + $0xa8] sm:$0xff] }
 0x174   : > { %v3895_v38 = vpop.permute.xlu1 %3894  ;;  %v3920_v40 = vpop.permute.xlu2 %3919  ;;  %720 = vst.msk [vmem:[%s4868_s17 + $0x70] sm:$0xff] %vm705_vm6, %v687_v15  ;;  %v2704_v39 = vsel %vm1286_vm4, %v5527_v46, %v2703_v19  ;;  %v1184_v1 = vsel %vm1109_vm5, %v5477_v25, %v1183_v42  ;;  %v5605_v55 = vrot.slane %v5583_v37, 1  ;;  %v2532_v49 = vrot.slane %v5585_v44, 1 }
 0x175   : > { %v3897_v58 = vunpack.i.h.bf16 %v3895_v38  ;;  %v3896_v60 = vunpack.i.l.bf16 %v3895_v38  ;;  %v3905_v36 = vpop.permute.xlu0 %3904  ;;  %v3922_v23 = vunpack.i.h.bf16 %v3920_v40  ;;  %v3921_v18 = vunpack.i.l.bf16 %v3920_v40  ;;  %735 = vst.msk [vmem:[%s4868_s17 + $0xe8] sm:$0xff] %vm705_vm6, %v702_v50 }
 0x176   : > { %v3907_v12 = vunpack.i.h.bf16 %v3905_v36  ;;  %v3906_v20 = vunpack.i.l.bf16 %v3905_v36  ;;  %v3916_v32 = vunpack.i.l.bf16 %v5504_v54  ;;  %v4153_v19 = vpack.i.bf16 %v1184_v1, %v5514_v56 }
 0x177   : > { %v2004_v59 = vsel %vm491_vm1, %v4233_v16, %v3897_v58  ;;  %v2003_v24 = vsel %vm491_vm1, %v4234_v61, %v3896_v60  ;;  %v5629_v60 = vsel %vm1109_vm5, %v2529_v29, %v5605_v55  ;;  %v2533_v36 = vsel %vm1109_vm5, %v5605_v55, %v2532_v49 }
 0x178   : > { %v1476_v51 = vsel %vm491_vm1, %v4233_v16, %v3907_v12  ;;  %v1475_v22 = vsel %vm491_vm1, %v4234_v61, %v3906_v20  ;;  %v2035_v43 = vsel %vm705_vm6, %v2003_v24, %v3901_v33  ;;  %v2036_v53 = vsel %vm705_vm6, %v2004_v59, %v3902_v9  ;;  %v628_v45 = vpop.f32.mrf.mxu2 }
 0x179   : > { %v1508_v10 = vsel %vm705_vm6, %v1476_v51, %v3922_v23  ;;  %v1507_v41 = vsel %vm705_vm6, %v1475_v22, %v3921_v18  ;;  %v2062_v8 = vpack.c.bf16 %v2036_v53, %v2035_v43  ;;  %v667_v57 = vmul.f32 %v5463_v52, %v628_v45  ;;  %v5655_v45 = vld [vmem:[#allocation2 + $0x178] sm:$0x3] }
 0x17a   : > { %v1533_v63 = vpack.c.bf16 %v1508_v10, %v1507_v41  ;;  %4114 = vrot.lane.b32.xlu1 %v4113_v0, %s4265_s19  ;;  %4104 = vrot.lane.b32.xlu2 %v4103_v28, %s4264_s18  ;;  %v652_v16 = vmul.f32 %v5463_v52, %v590_v35  ;;  %v5608_v0 = vld [vmem:[#allocation2 + $0x178] sm:$0x3]  ;;  %v3917_v28 = vunpack.i.h.bf16 %v5504_v54  ;;  %v4118_v9 = vpack.i.bf16 %v2704_v39, %v5551_v17 }
 0x17b   : > { %4139 = vrot.lane.b32.xlu0 %v4138_v11, %s4264_s18  ;;  %3644 = vmatmul.msk.bf16.gmra.mxu2 %vm2081_vm7, %v2062_v8  ;;  %v703_v62 = vadd.f32 %v5418_v47, %v667_v57  ;;  %v1887_v33 = vrot.slane %v5577_v4, 2  ;;  %v5621_v54 = vrot.slane %v5583_v37, 2  ;;  %v1890_v21 = vrot.slane %v5608_v0, 2 }
 0x17c   : > { %3665 = vmatmul.msk.bf16.gmra.mxu3 %vm2081_vm7, %v1533_v63  ;;  %v3910_v14 = vpop.permute.xlu1 %3909  ;;  %v5596_v61 = vpop.permute.xlu2 %3944  ;;  %v688_v25 = vadd.f32 %v5418_v47, %v652_v16  ;;  %v4133_v56 = vpack.i.bf16 %v5591_v27, %v5409_v34  ;;  %v1360_v18 = vrot.slane %v5559_v3, 2  ;;  %v4143_v59 = vpack.i.bf16 %v2533_v36, %v5629_v60 }
 0x17d   : > { %v3912_v5 = vunpack.i.h.bf16 %v3910_v14  ;;  %v3911_v31 = vunpack.i.l.bf16 %v3910_v14  ;;  %v3930_v6 = vpop.permute.xlu0 %3929  ;;  %736 = vst.msk [vmem:[%s4868_s17 + $0xf0] sm:$0xff] %vm705_vm6, %v703_v62  ;;  %v5646_v24 = vsel %vm1286_vm4, %v1887_v33, %v5621_v54  ;;  %v1891_v11 = vsel %vm1286_vm4, %v5621_v54, %v1890_v21 }
 0x17e   : > { %721 = vst.msk [vmem:[%s4868_s17 + $0x78] sm:$0xff] %vm705_vm6, %v688_v25  ;;  %v3932_v20 = vunpack.i.h.bf16 %v3930_v6  ;;  %v3931_v43 = vunpack.i.l.bf16 %v3930_v6  ;;  %v1714_v30 = vrot.slane %v5608_v0, 1  ;;  %v2708_v63 = vrot.slane %v5585_v44, 2  ;;  %v5666_v44 = vld [vmem:[#allocation2 + $0x180] sm:$0xff] }
 0x17f   : > { %v2827_v7 = vsel %vm491_vm1, %v4235_v13, %v3912_v5  ;;  %v2826_v26 = vsel %vm491_vm1, %v4236_v2, %v3911_v31  ;;  %v1188_v29 = vrot.slane %v5655_v45, 1  ;;  %v5671_v5 = vld [vmem:[#allocation2 + $0x188] sm:$0xff]  ;;  %v5673_v31 = vld [vmem:[#allocation2 + $0x190] sm:$0x3]  ;;  %v1361_v62 = vsel %vm1286_vm4, %v5527_v46, %v1360_v18 }
 0x180   : > { %v2858_v38 = vsel %vm705_vm6, %v2826_v26, %v3916_v32  ;;  %v2859_v40 = vsel %vm705_vm6, %v2827_v7, %v3917_v28  ;;  %v630_v23 = vpop.f32.mrf.mxu2  ;;  %v1715_v6 = vsel %vm1109_vm5, %v5605_v55, %v1714_v30  ;;  %v2709_v28 = vsel %vm1286_vm4, %v5621_v54, %v2708_v63  ;;  %v4237_v46 = vld [vmem:[#allocation2 + $0xc8] sm:$0xff] }
 0x181   : > { %v2885_v58 = vpack.c.bf16 %v2859_v40, %v2858_v38  ;;  %v668_v12 = vmul.f32 %v5463_v52, %v630_v23  ;;  %v2534_v32 = vrot.slane %v5666_v44, 1  ;;  %v2537_v26 = vrot.slane %v5673_v31, 1 }
 0x182   : > { %4129 = vrot.lane.b32.xlu1 %v4128_v48, %s4265_s19  ;;  %4119 = vrot.lane.b32.xlu2 %v4118_v9, %s4264_s18  ;;  %v4168_v48 = vpack.i.bf16 %v1891_v11, %v5646_v24  ;;  %v5691_v9 = vld [vmem:[#allocation2 + $0x190] sm:$0x3]  ;;  %v3947_v33 = vunpack.i.h.bf16 %v5596_v61  ;;  %v3946_v38 = vunpack.i.l.bf16 %v5596_v61  ;;  %v4158_v40 = vpack.i.bf16 %v1715_v6, %v5629_v60 }
 0x183   : > { %4154 = vrot.lane.b32.xlu0 %v4153_v19, %s4265_s19  ;;  %3686 = vmatmul.msk.bf16.gmra.mxu0 %vm2081_vm7, %v2885_v58  ;;  %v704_v10 = vadd.f32 %v5418_v47, %v668_v12  ;;  %v1189_v21 = vsel %vm1109_vm5, %v5605_v55, %v1188_v29  ;;  %v4238_v58 = vld [vmem:[#allocation2 + $0xc0] sm:$0xff]  ;;  %v4148_v23 = vpack.i.bf16 %v2709_v28, %v5646_v24  ;;  %v1893_v61 = vrot.slane %v5671_v5, 2 }
 0x184   : > { %v3925_v50 = vpop.permute.xlu1 %3924  ;;  %v3950_v15 = vpop.permute.xlu2 %3949  ;;  %v4173_v55 = vpack.i.bf16 %v1189_v21, %v5629_v60  ;;  %v5735_v28 = vld [vmem:[#allocation2 + $0x1a0] sm:$0xff] }
 0x185   : > { %v3927_v42 = vunpack.i.h.bf16 %v3925_v50  ;;  %v3926_v51 = vunpack.i.l.bf16 %v3925_v50  ;;  %v3935_v22 = vpop.permute.xlu0 %3934  ;;  %v3952_v34 = vunpack.i.h.bf16 %v3950_v15  ;;  %v3951_v3 = vunpack.i.l.bf16 %v3950_v15  ;;  %737 = vst.msk [vmem:[%s4868_s17 + $0xf8] sm:$0xff] %vm705_vm6, %v704_v10 }
 0x186   : > { %v3937_v52 = vunpack.i.h.bf16 %v3935_v22  ;;  %v3936_v53 = vunpack.i.l.bf16 %v3935_v22 }
 0x187   : > { %v2006_v41 = vsel %vm491_vm1, %v4235_v13, %v3927_v42  ;;  %v2005_v8 = vsel %vm491_vm1, %v4236_v2, %v3926_v51  ;;  %v4163_v51 = vpack.i.bf16 %v1361_v62, %v5551_v17  ;;  %v2713_v17 = vrot.slane %v5673_v31, 2  ;;  %v2287_v62 = vpop.f32.mrf.mxu3 }
 0x188   : > { %v1478_v35 = vsel %vm491_vm1, %v4235_v13, %v3937_v52  ;;  %v1477_v27 = vsel %vm491_vm1, %v4236_v2, %v3936_v53  ;;  %v2037_v57 = vsel %vm705_vm6, %v2005_v8, %v3931_v43  ;;  %v2038_v16 = vsel %vm705_vm6, %v2006_v41, %v3932_v20 }
 0x189   : > { %v1510_v47 = vsel %vm705_vm6, %v1478_v35, %v3952_v34  ;;  %v1509_v14 = vsel %vm705_vm6, %v1477_v27, %v3951_v3  ;;  %v2063_v39 = vpack.c.bf16 %v2038_v16, %v2037_v57  ;;  %v5688_v2 = vrot.slane %v5671_v5, 1 }
 0x18a   : > { %v1534_v1 = vpack.c.bf16 %v1510_v47, %v1509_v14  ;;  %4144 = vrot.lane.b32.xlu1 %v4143_v59, %s4265_s19  ;;  %4134 = vrot.lane.b32.xlu2 %v4133_v56, %s4264_s18  ;;  %v1892_v56 = vrot.slane %v5666_v44, 2  ;;  %v1895_v20 = vrot.slane %v5691_v9, 2  ;;  %v1719_v57 = vrot.slane %v5691_v9, 1 }
 0x18b   : > { %4169 = vrot.lane.b32.xlu0 %v4168_v48, %s4264_s18  ;;  %3645 = vmatmul.msk.bf16.gmra.mxu2 %vm2081_vm7, %v2063_v39  ;;  %v5709_v15 = vsel %vm1109_vm5, %v2534_v32, %v5688_v2  ;;  %v2538_v59 = vsel %vm1109_vm5, %v5688_v2, %v2537_v26  ;;  %v5737_v32 = vld [vmem:[#allocation2 + $0x1a8] sm:$0x3]  ;;  %v2714_v26 = vsel %vm1286_vm4, %v1893_v61, %v2713_v17 }
 0x18c   : > { %3666 = vmatmul.msk.bf16.gmra.mxu3 %vm2081_vm7, %v1534_v1  ;;  %v5680_v49 = vpop.permute.xlu2 %3964  ;;  %v3940_v0 = vpop.permute.xlu1 %3939  ;;  %v4178_v60 = vpack.i.bf16 %v2538_v59, %v5709_v15  ;;  %v1894_v22 = vsel %vm1286_vm4, %v1892_v56, %v1893_v61  ;;  %v1896_v34 = vsel %vm1286_vm4, %v1893_v61, %v1895_v20  ;;  %v4240_v56 = vld [vmem:[#allocation2 + $0xd8] sm:$0xff] }
 0x18d   : > { %v3942_v25 = vunpack.i.h.bf16 %v3940_v0  ;;  %v3941_v13 = vunpack.i.l.bf16 %v3940_v0  ;;  %v3975_v7 = vpop.permute.xlu0 %3974  ;;  %v4198_v39 = vpack.i.bf16 %v1896_v34, %v1894_v22  ;;  %v5731_v0 = vld [vmem:[#allocation2 + $0x198] sm:$0xff] }
 0x18e   : > { %v3977_v41 = vunpack.i.h.bf16 %v3975_v7  ;;  %v3976_v8 = vunpack.i.l.bf16 %v3975_v7  ;;  %v1720_v7 = vsel %vm1109_vm5, %v5688_v2, %v1719_v57  ;;  %v2539_v9 = vrot.slane %v5731_v0, 1 }
 0x18f   : > { %v2829_v19 = vsel %vm491_vm1, %v4237_v46, %v3942_v25  ;;  %v2828_v36 = vsel %vm491_vm1, %v4238_v58, %v3941_v13 }
 0x190   : > { %v2860_v18 = vsel %vm705_vm6, %v2828_v36, %v3946_v38  ;;  %v2861_v12 = vsel %vm705_vm6, %v2829_v19, %v3947_v33  ;;  %v1365_v33 = vrot.slane %v5655_v45, 2  ;;  %v2542_v19 = vrot.slane %v5737_v32, 1 }
 0x191   : > { %v2886_v50 = vpack.c.bf16 %v2861_v12, %v2860_v18  ;;  %v3966_v36 = vunpack.i.l.bf16 %v5680_v49  ;;  %v4193_v12 = vpack.i.bf16 %v1720_v7, %v5709_v15  ;;  %v4183_v45 = vpack.i.bf16 %v2714_v26, %v1894_v22 }
 0x192   : > { %4159 = vrot.lane.b32.xlu1 %v4158_v40, %s4265_s19  ;;  %4149 = vrot.lane.b32.xlu2 %v4148_v23, %s4264_s18  ;;  %v4239_v23 = vld [vmem:[#allocation2 + $0xe0] sm:$0xff] }
 0x193   : > { %4174 = vrot.lane.b32.xlu0 %v4173_v55, %s4265_s19  ;;  %3687 = vmatmul.msk.bf16.gmra.mxu0 %vm2081_vm7, %v2886_v50 }
 0x194   : > { %v3955_v11 = vpop.permute.xlu1 %3954  ;;  %v3995_v42 = vpop.permute.xlu2 %3994 }
 0x195   : > { %v3957_v3 = vunpack.i.h.bf16 %v3955_v11  ;;  %v3956_v43 = vunpack.i.l.bf16 %v3955_v11  ;;  %v3997_v52 = vunpack.i.h.bf16 %v3995_v42  ;;  %v3996_v53 = vunpack.i.l.bf16 %v3995_v42  ;;  %v3980_v10 = vpop.permute.xlu0 %3979 }
 0x196   : > { %v3982_v30 = vunpack.i.h.bf16 %v3980_v10  ;;  %v3981_v63 = vunpack.i.l.bf16 %v3980_v10 }
 0x197   : > { %v2008_v35 = vsel %vm491_vm1, %v4237_v46, %v3957_v3  ;;  %v2007_v27 = vsel %vm491_vm1, %v4238_v58, %v3956_v43 }
 0x198   : > { %v1480_v16 = vsel %vm491_vm1, %v4237_v46, %v3982_v30  ;;  %v1479_v47 = vsel %vm491_vm1, %v4238_v58, %v3981_v63  ;;  %v2039_v14 = vsel %vm705_vm6, %v2007_v27, %v3976_v8  ;;  %v2040_v48 = vsel %vm705_vm6, %v2008_v35, %v3977_v41 }
 0x199   : > { %v2064_v1 = vpack.c.bf16 %v2040_v48, %v2039_v14  ;;  %v1511_v29 = vsel %vm705_vm6, %v1479_v47, %v3996_v53  ;;  %v1512_v6 = vsel %vm705_vm6, %v1480_v16, %v3997_v52  ;;  %v2540_v46 = vrot.slane %v5735_v28, 1  ;;  %v2289_v52 = vpop.f32.mrf.mxu3 }
 0x19a   : > { %4179 = vrot.lane.b32.xlu1 %v4178_v60, %s4265_s19  ;;  %4164 = vrot.lane.b32.xlu2 %v4163_v51, %s4264_s18  ;;  %v1535_v31 = vpack.c.bf16 %v1512_v6, %v1511_v29  ;;  %v3967_v58 = vunpack.i.h.bf16 %v5680_v49  ;;  %v1366_v49 = vsel %vm1286_vm4, %v5621_v54, %v1365_v33  ;;  %v2715_v27 = vrot.slane %v5731_v0, 2 }
 0x19b   : > { %4199 = vrot.lane.b32.xlu0 %v4198_v39, %s4264_s18  ;;  %3646 = vmatmul.msk.bf16.gmra.mxu2 %vm2081_vm7, %v2064_v1  ;;  %v2541_v50 = vsel %vm1109_vm5, %v2539_v9, %v2540_v46  ;;  %v2543_v59 = vsel %vm1109_vm5, %v2540_v46, %v2542_v19  ;;  %v4188_v60 = vpack.i.bf16 %v1366_v49, %v5646_v24  ;;  %v2716_v24 = vrot.slane %v5735_v28, 2  ;;  %v4241_v19 = vld [vmem:[#allocation2 + $0xf8] sm:$0xff] }
 0x19c   : > { %3667 = vmatmul.msk.bf16.gmra.mxu3 %vm2081_vm7, %v1535_v31  ;;  %v3960_v25 = vpop.permute.xlu1 %3959  ;;  %v5742_v13 = vpop.permute.xlu2 %3999  ;;  %v4203_v42 = vpack.i.bf16 %v2543_v59, %v2541_v50  ;;  %v2718_v6 = vrot.slane %v5737_v32, 2 }
 0x19d   : > { %v3962_v38 = vunpack.i.h.bf16 %v3960_v25  ;;  %v3961_v40 = vunpack.i.l.bf16 %v3960_v25  ;;  %v3985_v21 = vpop.permute.xlu0 %3984  ;;  %v2717_v31 = vsel %vm1286_vm4, %v2715_v27, %v2716_v24 }
 0x19e   : > { %v3987_v53 = vunpack.i.h.bf16 %v3985_v21  ;;  %v3986_v10 = vunpack.i.l.bf16 %v3985_v21  ;;  %v2719_v9 = vsel %vm1286_vm4, %v2716_v24, %v2718_v6  ;;  %v4001_v21 = vunpack.i.l.bf16 %v5742_v13 }
 0x19f   : > { %v2831_v2 = vsel %vm491_vm1, %v4239_v23, %v3962_v38  ;;  %v2830_v18 = vsel %vm491_vm1, %v4240_v56, %v3961_v40  ;;  %v4002_v40 = vunpack.i.h.bf16 %v5742_v13  ;;  %v4208_v46 = vpack.i.bf16 %v2719_v9, %v2717_v31 }
 0x1a0   : > { %v2862_v61 = vsel %vm705_vm6, %v2830_v18, %v3966_v36  ;;  %v2863_v20 = vsel %vm705_vm6, %v2831_v2, %v3967_v58  ;;  %v2964_v8 = vpop.f32.mrf.mxu0  ;;  %v4242_v36 = vld [vmem:[#allocation2 + $0xf0] sm:$0xff] }
 0x1a1   : > { %v2887_v55 = vpack.c.bf16 %v2863_v20, %v2862_v61 }
 0x1a2   : > { %4194 = vrot.lane.b32.xlu1 %v4193_v12, %s4265_s19  ;;  %4184 = vrot.lane.b32.xlu2 %v4183_v45, %s4264_s18  ;;  %v5798_v12 = vld [vmem:[%s6203_s7] ss:$0 sm:$0xff] }
 0x1a3   : > { %3688 = vmatmul.msk.bf16.gmra.mxu0 %vm2081_vm7, %v2887_v55 }
 0x1a4   : > { %v3970_v15 = vpop.permute.xlu1 %3969  ;;  %v4015_v11 = vpop.permute.xlu2 %4014 }
 0x1a5   : > { %v3972_v51 = vunpack.i.h.bf16 %v3970_v15  ;;  %v3971_v22 = vunpack.i.l.bf16 %v3970_v15  ;;  %v4017_v34 = vunpack.i.h.bf16 %v4015_v11  ;;  %v4016_v3 = vunpack.i.l.bf16 %v4015_v11  ;;  %v4005_v43 = vpop.permute.xlu0 %4004 }
 0x1a6   : > { %v4007_v54 = vunpack.i.h.bf16 %v4005_v43  ;;  %v4006_v41 = vunpack.i.l.bf16 %v4005_v43 }
 0x1a7   : > { %v2010_v30 = vsel %vm491_vm1, %v4239_v23, %v3972_v51  ;;  %v2009_v63 = vsel %vm491_vm1, %v4240_v56, %v3971_v22  ;;  %v2142_v35 = vpop.f32.mrf.mxu2 }
 0x1a8   : > { %v1482_v57 = vsel %vm491_vm1, %v4239_v23, %v4007_v54  ;;  %v1481_v17 = vsel %vm491_vm1, %v4240_v56, %v4006_v41  ;;  %v2288_v16 = vadd.f32 %v2287_v62, %v2142_v35  ;;  %v2041_v47 = vsel %vm705_vm6, %v2009_v63, %v3986_v10  ;;  %v5783_v62 = vld [vmem:[%s6202_s6] ss:$0 sm:$0xff]  ;;  %v2966_v20 = vpop.f32.mrf.mxu0 }
 0x1a9   : > { %v2042_v14 = vsel %vm705_vm6, %v2010_v30, %v3987_v53  ;;  %v1513_v48 = vsel %vm705_vm6, %v1481_v17, %v4016_v3  ;;  %v1514_v39 = vsel %vm705_vm6, %v1482_v57, %v4017_v34 }
 0x1aa   : > { %4204 = vrot.lane.b32.xlu1 %v4203_v42, %s4265_s19  ;;  %4189 = vrot.lane.b32.xlu2 %v4188_v60, %s4264_s18  ;;  %v2065_v1 = vpack.c.bf16 %v2042_v14, %v2041_v47  ;;  %v1536_v29 = vpack.c.bf16 %v1514_v39, %v1513_v48  ;;  %v3044_v25 = vadd.f32 %v2964_v8, %v2288_v16 }
 0x1ac   : > { %3647 = vmatmul.msk.bf16.gmra.mxu2 %vm2081_vm7, %v2065_v1  ;;  %3668 = vmatmul.msk.bf16.gmra.mxu3 %vm2081_vm7, %v1536_v29  ;;  %v3990_v7 = vpop.permute.xlu1 %3989  ;;  %v5787_v26 = vpop.permute.xlu2 %4029  ;;  %v3080_v18 = vmul.f32 %v5783_v62, %v3044_v25 }
 0x1ad   : > { %v3992_v33 = vunpack.i.h.bf16 %v3990_v7  ;;  %v3991_v38 = vunpack.i.l.bf16 %v3990_v7  ;;  %v4020_v32 = vpop.permute.xlu0 %4019  ;;  %v4032_v7 = vunpack.i.h.bf16 %v5787_v26  ;;  %v4031_v9 = vunpack.i.l.bf16 %v5787_v26 }
 0x1ae   : > { %v3116_v59 = vadd.f32 %v5798_v12, %v3080_v18  ;;  %v4022_v53 = vunpack.i.h.bf16 %v4020_v32  ;;  %v4021_v10 = vunpack.i.l.bf16 %v4020_v32  ;;  %v4244_v32 = vld [vmem:[#allocation2 + $0x108] sm:$0xff] }
 0x1af   : > { %v2833_v58 = vsel %vm491_vm1, %v4241_v19, %v3992_v33  ;;  %v2832_v23 = vsel %vm491_vm1, %v4242_v36, %v3991_v38  ;;  %v2144_v2 = vpop.f32.mrf.mxu2  ;;  %v2292_v56 = vpop.f32.mrf.mxu3  ;;  %v4243_v33 = vld [vmem:[#allocation2 + $0x110] sm:$0xff] }
 0x1b0   : > { %v2290_v45 = vadd.f32 %v2289_v52, %v2144_v2  ;;  %v2864_v61 = vsel %vm705_vm6, %v2832_v23, %v4001_v21  ;;  %v2865_v13 = vsel %vm705_vm6, %v2833_v58, %v4002_v40  ;;  %v3148_v30 = vmax.f32 %v3116_v59, 0.0 }
 0x1b1   : > { %v2888_v55 = vpack.c.bf16 %v2865_v13, %v2864_v61 }
 0x1b2   : > { %v3045_v50 = vadd.f32 %v2966_v20, %v2290_v45  ;;  %4209 = vrot.lane.b32.xlu2 %v4208_v46, %s4264_s18 }
 0x1b3   : > { %3689 = vmatmul.msk.bf16.gmra.mxu0 %vm2081_vm7, %v2888_v55 }
 0x1b4   : > { %v3081_v49 = vmul.f32 %v5783_v62, %v3045_v50  ;;  %v4010_v15 = vpop.permute.xlu1 %4009  ;;  %v4045_v11 = vpop.permute.xlu2 %4044 }
 0x1b5   : > { %v4012_v42 = vunpack.i.h.bf16 %v4010_v15  ;;  %v4011_v60 = vunpack.i.l.bf16 %v4010_v15  ;;  %v4047_v51 = vunpack.i.h.bf16 %v4045_v11  ;;  %v4046_v22 = vunpack.i.l.bf16 %v4045_v11  ;;  %v4035_v34 = vpop.permute.xlu0 %4034 }
 0x1b6   : > { %v3117_v3 = vadd.f32 %v5798_v12, %v3081_v49  ;;  %v4037_v43 = vunpack.i.h.bf16 %v4035_v34  ;;  %v4036_v52 = vunpack.i.l.bf16 %v4035_v34 }
 0x1b7   : > { %v2012_v54 = vsel %vm491_vm1, %v4241_v19, %v4012_v42  ;;  %v2011_v41 = vsel %vm491_vm1, %v4242_v36, %v4011_v60  ;;  %v2294_v8 = vpop.f32.mrf.mxu3  ;;  %v2147_v24 = vpop.f32.mrf.mxu2 }
 0x1b8   : > { %v3149_v63 = vmax.f32 %v3117_v3, 0.0  ;;  %v1484_v35 = vsel %vm491_vm1, %v4241_v19, %v4037_v43  ;;  %v1483_v27 = vsel %vm491_vm1, %v4242_v36, %v4036_v52  ;;  %v2043_v57 = vsel %vm705_vm6, %v2011_v41, %v4021_v10 }
 0x1b9   : > { %v2044_v17 = vsel %vm705_vm6, %v2012_v54, %v4022_v53  ;;  %v1515_v16 = vsel %vm705_vm6, %v1483_v27, %v4046_v22  ;;  %v1516_v47 = vsel %vm705_vm6, %v1484_v35, %v4047_v51  ;;  %v2293_v46 = vadd.f32 %v2292_v56, %v2147_v24 }
 0x1ba   : > { %v2066_v14 = vpack.c.bf16 %v2044_v17, %v2043_v57  ;;  %v1537_v48 = vpack.c.bf16 %v1516_v47, %v1515_v16  ;;  %v3180_v39 = vpack.c.bf16 %v3149_v63, %v3148_v30 }
 0x1bc   : > { %3648 = vmatmul.msk.bf16.gmra.mxu2 %vm2081_vm7, %v2066_v14  ;;  %3669 = vmatmul.msk.bf16.gmra.mxu3 %vm2081_vm7, %v1537_v48  ;;  %v4025_v1 = vpop.permute.xlu1 %4024  ;;  %v5817_v29 = vpop.permute.xlu2 %4059 }
 0x1bd   : > { %3697 = vmatmul.msk.bf16.vlgmr.msrb.gmra.mxu1 %vm491_vm1, %v3180_v39  ;;  %v4027_v6 = vunpack.i.h.bf16 %v4025_v1  ;;  %v4026_v31 = vunpack.i.l.bf16 %v4025_v1  ;;  %v4050_v25 = vpop.permute.xlu0 %4049  ;;  %v4062_v14 = vunpack.i.h.bf16 %v5817_v29  ;;  %v4061_v48 = vunpack.i.l.bf16 %v5817_v29 }
 0x1be   : > { %v4052_v45 = vunpack.i.h.bf16 %v4050_v25  ;;  %v4051_v13 = vunpack.i.l.bf16 %v4050_v25  ;;  %v4246_v25 = vld [vmem:[#allocation2 + $0x120] sm:$0xff] }
 0x1bf   : > { %v2835_v38 = vsel %vm491_vm1, %v4243_v33, %v4027_v6  ;;  %v2834_v40 = vsel %vm491_vm1, %v4244_v32, %v4026_v31  ;;  %v2297_v21 = vpop.f32.mrf.mxu3  ;;  %v2149_v18 = vpop.f32.mrf.mxu2  ;;  %v4245_v6 = vld [vmem:[#allocation2 + $0x128] sm:$0xff] }
 0x1c0   : > { %v2969_v19 = vpop.f32.mrf.mxu0  ;;  %v2866_v58 = vsel %vm705_vm6, %v2834_v40, %v4031_v9  ;;  %v2867_v36 = vsel %vm705_vm6, %v2835_v38, %v4032_v7  ;;  %v2295_v42 = vadd.f32 %v2294_v8, %v2149_v18 }
 0x1c1   : > { %v2889_v23 = vpack.c.bf16 %v2867_v36, %v2866_v58  ;;  %v3046_v2 = vadd.f32 %v2969_v19, %v2293_v46 }
 0x1c3   : > { %3690 = vmatmul.msk.bf16.gmra.mxu0 %vm2081_vm7, %v2889_v23  ;;  %v3082_v56 = vmul.f32 %v5783_v62, %v3046_v2 }
 0x1c4   : > { %v4040_v26 = vpop.permute.xlu1 %4039  ;;  %v4075_v61 = vpop.permute.xlu2 %4074 }
 0x1c5   : > { %v4042_v20 = vunpack.i.h.bf16 %v4040_v26  ;;  %v4041_v55 = vunpack.i.l.bf16 %v4040_v26  ;;  %v4077_v50 = vunpack.i.h.bf16 %v4075_v61  ;;  %v4065_v59 = vpop.permute.xlu0 %4064  ;;  %v4076_v49 = vunpack.i.l.bf16 %v4075_v61 }
 0x1c6   : > { %v4067_v15 = vunpack.i.h.bf16 %v4065_v59  ;;  %v4066_v11 = vunpack.i.l.bf16 %v4065_v59  ;;  %v3118_v30 = vadd.f32 %v5798_v12, %v3082_v56 }
 0x1c7   : > { %v2014_v60 = vsel %vm491_vm1, %v4243_v33, %v4042_v20  ;;  %v2013_v51 = vsel %vm491_vm1, %v4244_v32, %v4041_v55  ;;  %v2299_v22 = vpop.f32.mrf.mxu3 }
 0x1c8   : > { %v1486_v34 = vsel %vm491_vm1, %v4243_v33, %v4067_v15  ;;  %v1485_v3 = vsel %vm491_vm1, %v4244_v32, %v4066_v11  ;;  %v2971_v43 = vpop.f32.mrf.mxu0  ;;  %v2045_v52 = vsel %vm705_vm6, %v2013_v51, %v4051_v13  ;;  %v2046_v53 = vsel %vm705_vm6, %v2014_v60, %v4052_v45 }
 0x1c9   : > { %v3047_v10 = vadd.f32 %v2971_v43, %v2295_v42  ;;  %v2067_v54 = vpack.c.bf16 %v2046_v53, %v2045_v52  ;;  %v1517_v41 = vsel %vm705_vm6, %v1485_v3, %v4076_v49  ;;  %v1518_v8 = vsel %vm705_vm6, %v1486_v34, %v4077_v50 }
 0x1ca   : > { %v1538_v63 = vpack.c.bf16 %v1518_v8, %v1517_v41  ;;  %v3150_v39 = vmax.f32 %v3118_v30, 0.0 }
 0x1cb   : > { %v3083_v35 = vmul.f32 %v5783_v62, %v3047_v10 }
 0x1cc   : > { %3649 = vmatmul.msk.bf16.gmra.mxu2 %vm2081_vm7, %v2067_v54  ;;  %3670 = vmatmul.msk.bf16.gmra.mxu3 %vm2081_vm7, %v1538_v63  ;;  %v4055_v27 = vpop.permute.xlu1 %4054  ;;  %v5840_v24 = vpop.permute.xlu2 %4089 }
 0x1cd   : > { %v3119_v57 = vadd.f32 %v5798_v12, %v3083_v35  ;;  %v4057_v17 = vunpack.i.h.bf16 %v4055_v27  ;;  %v4056_v16 = vunpack.i.l.bf16 %v4055_v27  ;;  %v4080_v47 = vpop.permute.xlu0 %4079 }
 0x1ce   : > { %v2152_v1 = vpop.f32.mrf.mxu2  ;;  %v4082_v29 = vunpack.i.h.bf16 %v4080_v47  ;;  %v4081_v18 = vunpack.i.l.bf16 %v4080_v47 }
 0x1cf   : > { %v2837_v31 = vsel %vm491_vm1, %v4245_v6, %v4057_v17  ;;  %v2836_v7 = vsel %vm491_vm1, %v4246_v25, %v4056_v16  ;;  %v2298_v9 = vadd.f32 %v2297_v21, %v2152_v1  ;;  %v2302_v33 = vpop.f32.mrf.mxu3  ;;  %v3151_v38 = vmax.f32 %v3119_v57, 0.0  ;;  %v4248_v1 = vld [vmem:[#allocation2 + $0x138] sm:$0xff] }
 0x1d0   : > { %v2974_v32 = vpop.f32.mrf.mxu0  ;;  %v2868_v40 = vsel %vm705_vm6, %v2836_v7, %v4061_v48  ;;  %v2869_v46 = vsel %vm705_vm6, %v2837_v31, %v4062_v14  ;;  %v4092_v17 = vunpack.i.h.bf16 %v5840_v24  ;;  %v4091_v16 = vunpack.i.l.bf16 %v5840_v24  ;;  %v4247_v48 = vld [vmem:[#allocation2 + $0x140] sm:$0xff] }
 0x1d1   : > { %v2890_v19 = vpack.c.bf16 %v2869_v46, %v2868_v40  ;;  %v3181_v58 = vpack.c.bf16 %v3151_v38, %v3150_v39  ;;  %v3048_v36 = vadd.f32 %v2974_v32, %v2298_v9 }
 0x1d3   : > { %3691 = vmatmul.msk.bf16.gmra.mxu0 %vm2081_vm7, %v2890_v19  ;;  %3698 = vmatmul.msk.bf16.gmra.mxu1 %vm491_vm1, %v3181_v58  ;;  %v3084_v13 = vmul.f32 %v5783_v62, %v3048_v36 }
 0x1d4   : > { %v4070_v23 = vpop.permute.xlu1 %4069  ;;  %v4105_v2 = vpop.permute.xlu2 %4104 }
 0x1d5   : > { %v4072_v45 = vunpack.i.h.bf16 %v4070_v23  ;;  %v4071_v21 = vunpack.i.l.bf16 %v4070_v23  ;;  %v4107_v26 = vunpack.i.h.bf16 %v4105_v2  ;;  %v4095_v61 = vpop.permute.xlu0 %4094  ;;  %v4106_v20 = vunpack.i.l.bf16 %v4105_v2 }
 0x1d6   : > { %v4097_v55 = vunpack.i.h.bf16 %v4095_v61  ;;  %v4096_v50 = vunpack.i.l.bf16 %v4095_v61  ;;  %v2154_v59 = vpop.f32.mrf.mxu2  ;;  %v3120_v54 = vadd.f32 %v5798_v12, %v3084_v13 }
 0x1d7   : > { %v2016_v56 = vsel %vm491_vm1, %v4245_v6, %v4072_v45  ;;  %v2015_v49 = vsel %vm491_vm1, %v4246_v25, %v4071_v21  ;;  %v2300_v15 = vadd.f32 %v2299_v22, %v2154_v59  ;;  %v2304_v11 = vpop.f32.mrf.mxu3 }
 0x1d8   : > { %v1488_v42 = vsel %vm491_vm1, %v4245_v6, %v4097_v55  ;;  %v1487_v60 = vsel %vm491_vm1, %v4246_v25, %v4096_v50  ;;  %v2976_v51 = vpop.f32.mrf.mxu0  ;;  %v2047_v34 = vsel %vm705_vm6, %v2015_v49, %v4081_v18  ;;  %v2048_v3 = vsel %vm705_vm6, %v2016_v56, %v4082_v29 }
 0x1d9   : > { %v3049_v43 = vadd.f32 %v2976_v51, %v2300_v15  ;;  %v2068_v52 = vpack.c.bf16 %v2048_v3, %v2047_v34  ;;  %v1519_v53 = vsel %vm705_vm6, %v1487_v60, %v4106_v20  ;;  %v1520_v10 = vsel %vm705_vm6, %v1488_v42, %v4107_v26 }
 0x1da   : > { %v1539_v41 = vpack.c.bf16 %v1520_v10, %v1519_v53  ;;  %v3152_v47 = vmax.f32 %v3120_v54, 0.0 }
 0x1db   : > { %v3085_v22 = vmul.f32 %v5783_v62, %v3049_v43 }
 0x1dc   : > { %3650 = vmatmul.msk.bf16.gmra.mxu2 %vm2081_vm7, %v2068_v52  ;;  %3671 = vmatmul.msk.bf16.gmra.mxu3 %vm2081_vm7, %v1539_v41  ;;  %v4085_v8 = vpop.permute.xlu1 %4084  ;;  %v5864_v30 = vpop.permute.xlu2 %4119 }
 0x1dd   : > { %v3121_v63 = vadd.f32 %v5798_v12, %v3085_v22  ;;  %v4087_v35 = vunpack.i.h.bf16 %v4085_v8  ;;  %v4086_v27 = vunpack.i.l.bf16 %v4085_v8  ;;  %v4110_v57 = vpop.permute.xlu0 %4109 }
 0x1de   : > { %v2157_v14 = vpop.f32.mrf.mxu2  ;;  %v4112_v24 = vunpack.i.h.bf16 %v4110_v57  ;;  %v4111_v29 = vunpack.i.l.bf16 %v4110_v57 }
 0x1df   : > { %v2839_v39 = vsel %vm491_vm1, %v4247_v48, %v4087_v35  ;;  %v2838_v6 = vsel %vm491_vm1, %v4248_v1, %v4086_v27  ;;  %v2303_v31 = vadd.f32 %v2302_v33, %v2157_v14  ;;  %v2307_v25 = vpop.f32.mrf.mxu3  ;;  %v3153_v7 = vmax.f32 %v3121_v63, 0.0  ;;  %v4250_v14 = vld [vmem:[#allocation2 + $0x150] sm:$0xff] }
 0x1e0   : > { %v2979_v9 = vpop.f32.mrf.mxu0  ;;  %v2870_v38 = vsel %vm705_vm6, %v2838_v6, %v4091_v16  ;;  %v2871_v32 = vsel %vm705_vm6, %v2839_v39, %v4092_v17  ;;  %v4122_v35 = vunpack.i.h.bf16 %v5864_v30  ;;  %v4121_v27 = vunpack.i.l.bf16 %v5864_v30  ;;  %v4249_v16 = vld [vmem:[#allocation2 + $0x158] sm:$0xff] }
 0x1e1   : > { %v2891_v40 = vpack.c.bf16 %v2871_v32, %v2870_v38  ;;  %v3182_v46 = vpack.c.bf16 %v3153_v7, %v3152_v47  ;;  %v3050_v19 = vadd.f32 %v2979_v9, %v2303_v31 }
 0x1e3   : > { %3692 = vmatmul.msk.bf16.gmra.mxu0 %vm2081_vm7, %v2891_v40  ;;  %3699 = vmatmul.msk.bf16.gmra.mxu1 %vm491_vm1, %v3182_v46  ;;  %v3086_v45 = vmul.f32 %v5783_v62, %v3050_v19 }
 0x1e4   : > { %v4100_v58 = vpop.permute.xlu1 %4099  ;;  %v4135_v36 = vpop.permute.xlu2 %4134 }
 0x1e5   : > { %v4102_v23 = vunpack.i.h.bf16 %v4100_v58  ;;  %v4101_v33 = vunpack.i.l.bf16 %v4100_v58  ;;  %v4137_v2 = vunpack.i.h.bf16 %v4135_v36  ;;  %v4125_v18 = vpop.permute.xlu0 %4124  ;;  %v4136_v21 = vunpack.i.l.bf16 %v4135_v36 }
 0x1e6   : > { %v4127_v26 = vunpack.i.h.bf16 %v4125_v18  ;;  %v4126_v61 = vunpack.i.l.bf16 %v4125_v18  ;;  %v2159_v13 = vpop.f32.mrf.mxu2  ;;  %v3122_v52 = vadd.f32 %v5798_v12, %v3086_v45 }
 0x1e7   : > { %v2018_v20 = vsel %vm491_vm1, %v4247_v48, %v4102_v23  ;;  %v2017_v55 = vsel %vm491_vm1, %v4248_v1, %v4101_v33  ;;  %v2305_v50 = vadd.f32 %v2304_v11, %v2159_v13  ;;  %v2309_v59 = vpop.f32.mrf.mxu3 }
 0x1e8   : > { %v1490_v56 = vsel %vm491_vm1, %v4247_v48, %v4127_v26  ;;  %v1489_v49 = vsel %vm491_vm1, %v4248_v1, %v4126_v61  ;;  %v2981_v15 = vpop.f32.mrf.mxu0  ;;  %v2049_v42 = vsel %vm705_vm6, %v2017_v55, %v4111_v29  ;;  %v2050_v60 = vsel %vm705_vm6, %v2018_v20, %v4112_v24 }
 0x1e9   : > { %v3051_v51 = vadd.f32 %v2981_v15, %v2305_v50  ;;  %v2069_v34 = vpack.c.bf16 %v2050_v60, %v2049_v42  ;;  %v1521_v3 = vsel %vm705_vm6, %v1489_v49, %v4136_v21  ;;  %v1522_v43 = vsel %vm705_vm6, %v1490_v56, %v4137_v2 }
 0x1ea   : > { %v1540_v53 = vpack.c.bf16 %v1522_v43, %v1521_v3  ;;  %v3154_v57 = vmax.f32 %v3122_v52, 0.0 }
 0x1eb   : > { %v3087_v11 = vmul.f32 %v5783_v62, %v3051_v51 }
 0x1ec   : > { %3651 = vmatmul.msk.bf16.gmra.mxu2 %vm2081_vm7, %v2069_v34  ;;  %3672 = vmatmul.msk.bf16.gmra.mxu3 %vm2081_vm7, %v1540_v53  ;;  %v4115_v10 = vpop.permute.xlu1 %4114  ;;  %v5888_v54 = vpop.permute.xlu2 %4149 }
 0x1ed   : > { %v3123_v41 = vadd.f32 %v5798_v12, %v3087_v11  ;;  %v4117_v22 = vunpack.i.h.bf16 %v4115_v10  ;;  %v4116_v8 = vunpack.i.l.bf16 %v4115_v10  ;;  %v4140_v63 = vpop.permute.xlu0 %4139 }
 0x1ee   : > { %v2162_v17 = vpop.f32.mrf.mxu2  ;;  %v4142_v30 = vunpack.i.h.bf16 %v4140_v63  ;;  %v4141_v24 = vunpack.i.l.bf16 %v4140_v63 }
 0x1ef   : > { %v2841_v47 = vsel %vm491_vm1, %v4249_v16, %v4117_v22  ;;  %v2840_v48 = vsel %vm491_vm1, %v4250_v14, %v4116_v8  ;;  %v2308_v39 = vadd.f32 %v2307_v25, %v2162_v17  ;;  %v2312_v1 = vpop.f32.mrf.mxu3  ;;  %v3155_v6 = vmax.f32 %v3123_v41, 0.0 }
 0x1f0   : > { %v2984_v31 = vpop.f32.mrf.mxu0  ;;  %v2872_v7 = vsel %vm705_vm6, %v2840_v48, %v4121_v27  ;;  %v2873_v9 = vsel %vm705_vm6, %v2841_v47, %v4122_v35  ;;  %v4152_v22 = vunpack.i.h.bf16 %v5888_v54  ;;  %v4151_v8 = vunpack.i.l.bf16 %v5888_v54 }
 0x1f1   : > { %v2892_v38 = vpack.c.bf16 %v2873_v9, %v2872_v7  ;;  %v3183_v32 = vpack.c.bf16 %v3155_v6, %v3154_v57  ;;  %v3052_v40 = vadd.f32 %v2984_v31, %v2308_v39 }
 0x1f3   : > { %3693 = vmatmul.msk.bf16.gmra.mxu0 %vm2081_vm7, %v2892_v38  ;;  %3700 = vmatmul.msk.bf16.gmra.mxu1 %vm491_vm1, %v3183_v32  ;;  %v3088_v23 = vmul.f32 %v5783_v62, %v3052_v40 }
 0x1f4   : > { %v4130_v46 = vpop.permute.xlu1 %4129  ;;  %v4165_v19 = vpop.permute.xlu2 %4164 }
 0x1f5   : > { %v4132_v58 = vunpack.i.h.bf16 %v4130_v46  ;;  %v4131_v25 = vunpack.i.l.bf16 %v4130_v46  ;;  %v4167_v36 = vunpack.i.h.bf16 %v4165_v19  ;;  %v4155_v29 = vpop.permute.xlu0 %4154  ;;  %v4166_v33 = vunpack.i.l.bf16 %v4165_v19 }
 0x1f6   : > { %v4157_v2 = vunpack.i.h.bf16 %v4155_v29  ;;  %v4156_v18 = vunpack.i.l.bf16 %v4155_v29  ;;  %v2164_v45 = vpop.f32.mrf.mxu2  ;;  %v3124_v34 = vadd.f32 %v5798_v12, %v3088_v23  ;;  %v4252_v29 = vld [vmem:[#allocation2 + $0x168] sm:$0xff] }
 0x1f7   : > { %v2020_v21 = vsel %vm491_vm1, %v4249_v16, %v4132_v58  ;;  %v2019_v26 = vsel %vm491_vm1, %v4250_v14, %v4131_v25  ;;  %v2310_v61 = vadd.f32 %v2309_v59, %v2164_v45  ;;  %v2314_v13 = vpop.f32.mrf.mxu3  ;;  %v4251_v25 = vld [vmem:[#allocation2 + $0x170] sm:$0xff] }
 0x1f8   : > { %v1492_v20 = vsel %vm491_vm1, %v4249_v16, %v4157_v2  ;;  %v1491_v55 = vsel %vm491_vm1, %v4250_v14, %v4156_v18  ;;  %v2986_v50 = vpop.f32.mrf.mxu0  ;;  %v2051_v56 = vsel %vm705_vm6, %v2019_v26, %v4141_v24  ;;  %v2052_v49 = vsel %vm705_vm6, %v2020_v21, %v4142_v30 }
 0x1f9   : > { %v3053_v15 = vadd.f32 %v2986_v50, %v2310_v61  ;;  %v2070_v42 = vpack.c.bf16 %v2052_v49, %v2051_v56  ;;  %v1523_v60 = vsel %vm705_vm6, %v1491_v55, %v4166_v33  ;;  %v1524_v51 = vsel %vm705_vm6, %v1492_v20, %v4167_v36 }
 0x1fa   : > { %v1541_v3 = vpack.c.bf16 %v1524_v51, %v1523_v60  ;;  %v3156_v63 = vmax.f32 %v3124_v34, 0.0 }
 0x1fb   : > { %v3089_v59 = vmul.f32 %v5783_v62, %v3053_v15 }
 0x1fc   : > { %3652 = vmatmul.msk.bf16.gmra.mxu2 %vm2081_vm7, %v2070_v42  ;;  %3673 = vmatmul.msk.bf16.gmra.mxu3 %vm2081_vm7, %v1541_v3  ;;  %v4145_v43 = vpop.permute.xlu1 %4144  ;;  %v5912_v52 = vpop.permute.xlu2 %4184 }
 0x1fd   : > { %v3125_v53 = vadd.f32 %v5798_v12, %v3089_v59  ;;  %v4147_v11 = vunpack.i.h.bf16 %v4145_v43  ;;  %v4146_v10 = vunpack.i.l.bf16 %v4145_v43  ;;  %v4170_v41 = vpop.permute.xlu0 %4169  ;;  %v4187_v3 = vunpack.i.h.bf16 %v5912_v52 }
 0x1fe   : > { %v2167_v35 = vpop.f32.mrf.mxu2  ;;  %v4172_v54 = vunpack.i.h.bf16 %v4170_v41  ;;  %v4171_v38 = vunpack.i.l.bf16 %v4170_v41  ;;  %v4186_v59 = vunpack.i.l.bf16 %v5912_v52 }
 0x1ff   : > { %v3157_v27 = vmax.f32 %v3125_v53, 0.0  ;;  %v2843_v57 = vsel %vm491_vm1, %v5583_v37, %v4147_v11  ;;  %v2842_v17 = vsel %vm491_vm1, %v5577_v4, %v4146_v10  ;;  %v2313_v16 = vadd.f32 %v2312_v1, %v2167_v35  ;;  %v2317_v47 = vpop.f32.mrf.mxu3 }
 0x200   : > { %v2989_v14 = vpop.f32.mrf.mxu0  ;;  %v2874_v48 = vsel %vm705_vm6, %v2842_v17, %v4151_v8  ;;  %v2875_v39 = vsel %vm705_vm6, %v2843_v57, %v4152_v22 }
 0x201   : > { %v3184_v6 = vpack.c.bf16 %v3157_v27, %v3156_v63  ;;  %v2893_v31 = vpack.c.bf16 %v2875_v39, %v2874_v48  ;;  %v3054_v7 = vadd.f32 %v2989_v14, %v2313_v16 }
 0x203   : > { %3694 = vmatmul.msk.bf16.gmra.mxu0 %vm2081_vm7, %v2893_v31  ;;  %3701 = vmatmul.msk.bf16.gmra.mxu1 %vm491_vm1, %v3184_v6  ;;  %v3090_v30 = vmul.f32 %v5783_v62, %v3054_v7 }
 0x204   : > { %v4160_v9 = vpop.permute.xlu1 %4159  ;;  %v4190_v37 = vpop.permute.xlu2 %4189 }
 0x205   : > { %v4162_v32 = vunpack.i.h.bf16 %v4160_v9  ;;  %v4161_v4 = vunpack.i.l.bf16 %v4160_v9  ;;  %v4192_v1 = vunpack.i.h.bf16 %v4190_v37  ;;  %v4175_v40 = vpop.permute.xlu0 %4174  ;;  %v4191_v46 = vunpack.i.l.bf16 %v4190_v37 }
 0x206   : > { %v4177_v19 = vunpack.i.h.bf16 %v4175_v40  ;;  %v4176_v24 = vunpack.i.l.bf16 %v4175_v40  ;;  %v2169_v58 = vpop.f32.mrf.mxu2  ;;  %v3126_v49 = vadd.f32 %v5798_v12, %v3090_v30 }
 0x207   : > { %v2022_v36 = vsel %vm491_vm1, %v4251_v25, %v4162_v32  ;;  %v2021_v23 = vsel %vm491_vm1, %v4252_v29, %v4161_v4  ;;  %v2315_v33 = vadd.f32 %v2314_v13, %v2169_v58  ;;  %v2319_v2 = vpop.f32.mrf.mxu3 }
 0x208   : > { %v1494_v18 = vsel %vm491_vm1, %v4251_v25, %v4177_v19  ;;  %v1493_v45 = vsel %vm491_vm1, %v4252_v29, %v4176_v24  ;;  %v2991_v21 = vpop.f32.mrf.mxu0  ;;  %v2053_v26 = vsel %vm705_vm6, %v2021_v23, %v4171_v38  ;;  %v2054_v61 = vsel %vm705_vm6, %v2022_v36, %v4172_v54 }
 0x209   : > { %v3055_v20 = vadd.f32 %v2991_v21, %v2315_v33  ;;  %v2071_v55 = vpack.c.bf16 %v2054_v61, %v2053_v26  ;;  %v1525_v50 = vsel %vm705_vm6, %v1493_v45, %v4191_v46  ;;  %v1526_v56 = vsel %vm705_vm6, %v1494_v18, %v4192_v1 }
 0x20a   : > { %v1542_v15 = vpack.c.bf16 %v1526_v56, %v1525_v50  ;;  %v3158_v43 = vmax.f32 %v3126_v49, 0.0 }
 0x20b   : > { %v3091_v13 = vmul.f32 %v5783_v62, %v3055_v20 }
 0x20c   : > { %3653 = vmatmul.msk.bf16.gmra.mxu2 %vm2081_vm7, %v2071_v55  ;;  %3674 = vmatmul.msk.bf16.gmra.mxu3 %vm2081_vm7, %v1542_v15  ;;  %v4180_v42 = vpop.permute.xlu1 %4179  ;;  %v4210_v46 = vpop.permute.xlu2 %4209 }
 0x20d   : > { %v3127_v60 = vadd.f32 %v5798_v12, %v3091_v13  ;;  %v4182_v51 = vunpack.i.h.bf16 %v4180_v42  ;;  %v4181_v34 = vunpack.i.l.bf16 %v4180_v42  ;;  %v4200_v52 = vpop.permute.xlu0 %4199  ;;  %v4212_v58 = vunpack.i.h.bf16 %v4210_v46 }
 0x20e   : > { %v2172_v53 = vpop.f32.mrf.mxu2  ;;  %v4202_v6 = vunpack.i.h.bf16 %v4200_v52  ;;  %v4201_v31 = vunpack.i.l.bf16 %v4200_v52  ;;  %v4211_v25 = vunpack.i.l.bf16 %v4210_v46  ;;  %v5982_v52 = vld [vmem:[%s6205_s9] ss:$0 sm:$0xff] }
 0x20f   : > { %v3159_v11 = vmax.f32 %v3127_v60, 0.0  ;;  %v2845_v10 = vsel %vm491_vm1, %v5671_v5, %v4182_v51  ;;  %v2844_v41 = vsel %vm491_vm1, %v5666_v44, %v4181_v34  ;;  %v2318_v22 = vadd.f32 %v2317_v47, %v2172_v53  ;;  %v2322_v8 = vpop.f32.mrf.mxu3 }
 0x210   : > { %v2994_v63 = vpop.f32.mrf.mxu0  ;;  %v2876_v35 = vsel %vm705_vm6, %v2844_v41, %v4186_v59  ;;  %v2877_v27 = vsel %vm705_vm6, %v2845_v10, %v4187_v3 }
 0x211   : > { %v3185_v57 = vpack.c.bf16 %v3159_v11, %v3158_v43  ;;  %v2894_v17 = vpack.c.bf16 %v2877_v27, %v2876_v35  ;;  %v3056_v16 = vadd.f32 %v2994_v63, %v2318_v22  ;;  %v5976_v27 = vld [vmem:[%s6204_s8] ss:$0 sm:$0xff] }
 0x213   : > { %3695 = vmatmul.msk.bf16.gmra.mxu0 %vm2081_vm7, %v2894_v17  ;;  %3702 = vmatmul.msk.bf16.gmra.mxu1 %vm491_vm1, %v3185_v57  ;;  %v3092_v47 = vmul.f32 %v5783_v62, %v3056_v16 }
 0x214   : > { %v4195_v14 = vpop.permute.xlu1 %4194 }
 0x215   : > { %v4197_v48 = vunpack.i.h.bf16 %v4195_v14  ;;  %v4196_v39 = vunpack.i.l.bf16 %v4195_v14  ;;  %v3128_v19 = vadd.f32 %v5798_v12, %v3092_v47 }
 0x216   : > { %v2174_v7 = vpop.f32.mrf.mxu2 }
 0x217   : > { %v2024_v54 = vsel %vm491_vm1, %v5671_v5, %v4197_v48  ;;  %v2023_v9 = vsel %vm491_vm1, %v5666_v44, %v4196_v39  ;;  %v2320_v37 = vadd.f32 %v2319_v2, %v2174_v7  ;;  %v2324_v38 = vpop.f32.mrf.mxu3  ;;  %v3160_v23 = vmax.f32 %v3128_v19, 0.0 }
 0x218   : > { %v2996_v32 = vpop.f32.mrf.mxu0  ;;  %v2055_v4 = vsel %vm705_vm6, %v2023_v9, %v4201_v31  ;;  %v2056_v1 = vsel %vm705_vm6, %v2024_v54, %v4202_v6  ;;  %v3409_v54 = vld [vmem:[%s4868_s17] sm:$0xff] }
 0x219   : > { %v3057_v40 = vadd.f32 %v2996_v32, %v2320_v37  ;;  %v2072_v30 = vpack.c.bf16 %v2056_v1, %v2055_v4 }
 0x21b   : > { %v3093_v24 = vmul.f32 %v5783_v62, %v3057_v40 }
 0x21c   : > { %3654 = vmatmul.msk.bf16.gmra.mxu2 %vm2081_vm7, %v2072_v30  ;;  %v4205_v5 = vpop.permute.xlu1 %4204 }
 0x21d   : > { %v3129_v44 = vadd.f32 %v5798_v12, %v3093_v24  ;;  %v4207_v36 = vunpack.i.h.bf16 %v4205_v5  ;;  %v4206_v29 = vunpack.i.l.bf16 %v4205_v5 }
 0x21e   : > { %v2177_v33 = vpop.f32.mrf.mxu2 }
 0x21f   : > { %v3161_v2 = vmax.f32 %v3129_v44, 0.0  ;;  %v2847_v18 = vsel %vm491_vm1, %v5735_v28, %v4207_v36  ;;  %v2846_v45 = vsel %vm491_vm1, %v5731_v0, %v4206_v29  ;;  %v2323_v21 = vadd.f32 %v2322_v8, %v2177_v33  ;;  %v2327_v26 = vpop.f32.mrf.mxu3 }
 0x220   : > { %v2879_v61 = vsel %vm705_vm6, %v2847_v18, %v4212_v58  ;;  %v2878_v20 = vsel %vm705_vm6, %v2846_v45, %v4211_v25  ;;  %v2999_v55 = vpop.f32.mrf.mxu0  ;;  %v3410_v25 = vld [vmem:[%s4868_s17 + $0x8] sm:$0xff] }
 0x221   : > { %v3186_v50 = vpack.c.bf16 %v3161_v2, %v3160_v23  ;;  %v2895_v56 = vpack.c.bf16 %v2879_v61, %v2878_v20  ;;  %v3058_v49 = vadd.f32 %v2999_v55, %v2323_v21 }
 0x223   : > { %3696 = vmatmul.msk.bf16.gmra.mxu0 %vm2081_vm7, %v2895_v56  ;;  %3703 = vmatmul.msk.bf16.gmra.mxu1 %vm491_vm1, %v3186_v50  ;;  %v3094_v28 = vmul.f32 %v5783_v62, %v3058_v49 }
 0x225   : > { %v3130_v51 = vadd.f32 %v5798_v12, %v3094_v28 }
 0x226   : > { %v2179_v15 = vpop.f32.mrf.mxu2 }
 0x227   : > { %v2325_v13 = vadd.f32 %v2324_v38, %v2179_v15  ;;  %v2329_v42 = vpop.f32.mrf.mxu3  ;;  %v3162_v59 = vmax.f32 %v3130_v51, 0.0  ;;  %v3411_v51 = vld [vmem:[%s4868_s17 + $0x10] sm:$0xff] }
 0x228   : > { %v3001_v0 = vpop.f32.mrf.mxu0 }
 0x229   : > { %v3059_v60 = vadd.f32 %v3001_v0, %v2325_v13 }
 0x22b   : > { %v3095_v34 = vmul.f32 %v5783_v62, %v3059_v60 }
 0x22d   : > { %v3131_v3 = vadd.f32 %v5798_v12, %v3095_v34 }
 0x22f   : > { %v3163_v43 = vmax.f32 %v3131_v3, 0.0  ;;  %v2182_v53 = vpop.f32.mrf.mxu2  ;;  %v2332_v11 = vpop.f32.mrf.mxu3 }
 0x230   : > { %v2328_v10 = vadd.f32 %v2327_v26, %v2182_v53  ;;  %v3004_v41 = vpop.f32.mrf.mxu0 }
 0x231   : > { %v3187_v22 = vpack.c.bf16 %v3163_v43, %v3162_v59 }
 0x232   : > { %v3060_v8 = vadd.f32 %v3004_v41, %v2328_v10 }
 0x233   : > { %3704 = vmatmul.msk.bf16.gmra.mxu1 %vm491_vm1, %v3187_v22 }
 0x234   : > { %v3096_v57 = vmul.f32 %v5783_v62, %v3060_v8 }
 0x236   : > { %v3132_v6 = vadd.f32 %v5798_v12, %v3096_v57 }
 0x237   : > { %v2184_v63 = vpop.f32.mrf.mxu2  ;;  %v2334_v35 = vpop.f32.mrf.mxu3 }
 0x238   : > { %v2330_v17 = vadd.f32 %v2329_v42, %v2184_v63  ;;  %v3006_v16 = vpop.f32.mrf.mxu0  ;;  %v3164_v32 = vmax.f32 %v3132_v6, 0.0 }
 0x23a   : > { %v3061_v14 = vadd.f32 %v3006_v16, %v2330_v17  ;;  %v3257_v48 = vpop.f32.mrf.mxu1  ;;  %v3412_v17 = vld [vmem:[%s4868_s17 + $0x18] sm:$0xff] }
 0x23b   : > { %v3341_v39 = vmul.f32 %v5976_v27, %v3257_v48 }
 0x23c   : > { %v3097_v31 = vmul.f32 %v5783_v62, %v3061_v14 }
 0x23d   : > { %v3377_v47 = vadd.f32 %v5982_v52, %v3341_v39 }
 0x23e   : > { %v3133_v7 = vadd.f32 %v5798_v12, %v3097_v31 }
 0x23f   : > { %v3441_v9 = vadd.f32 %v3409_v54, %v3377_v47  ;;  %v2187_v37 = vpop.f32.mrf.mxu2  ;;  %v2337_v38 = vpop.f32.mrf.mxu3 }
 0x240   : > { %v3165_v4 = vmax.f32 %v3133_v7, 0.0  ;;  %v2333_v1 = vadd.f32 %v2332_v11, %v2187_v37  ;;  %v3009_v40 = vpop.f32.mrf.mxu0 }
 0x241   : > { %v3473_v30 = vmax.f32 %v3441_v9, 0.0 }
 0x242   : > { %v3188_v46 = vpack.c.bf16 %v3165_v4, %v3164_v32  ;;  %v3259_v19 = vpop.f32.mrf.mxu1  ;;  %v3062_v5 = vadd.f32 %v3009_v40, %v2333_v1  ;;  %v3413_v1 = vld [vmem:[%s4868_s17 + $0x20] sm:$0xff] }
 0x243   : > { %3505 = vst.msk [vmem:[%s4868_s17] sm:$0xff] %vm705_vm6, %v3473_v30  ;;  %v3342_v24 = vmul.f32 %v5976_v27, %v3259_v19 }
 0x244   : > { %3705 = vmatmul.msk.bf16.gmra.mxu1 %vm491_vm1, %v3188_v46  ;;  %v3098_v23 = vmul.f32 %v5783_v62, %v3062_v5 }
 0x245   : > { %v3378_v58 = vadd.f32 %v5982_v52, %v3342_v24 }
 0x246   : > { %v3134_v21 = vadd.f32 %v5798_v12, %v3098_v23 }
 0x247   : > { %v3442_v44 = vadd.f32 %v3410_v25, %v3378_v58  ;;  %v2189_v36 = vpop.f32.mrf.mxu2  ;;  %v2339_v29 = vpop.f32.mrf.mxu3 }
 0x248   : > { %v2335_v33 = vadd.f32 %v2334_v35, %v2189_v36  ;;  %v3011_v2 = vpop.f32.mrf.mxu0  ;;  %v3166_v50 = vmax.f32 %v3134_v21, 0.0 }
 0x249   : > { %v3474_v18 = vmax.f32 %v3442_v44, 0.0 }
 0x24a   : > { %v3063_v45 = vadd.f32 %v3011_v2, %v2335_v33  ;;  %v3414_v2 = vld [vmem:[%s4868_s17 + $0x28] sm:$0xff] }
 0x24b   : > { %3506 = vst.msk [vmem:[%s4868_s17 + $0x8] sm:$0xff] %vm705_vm6, %v3474_v18 }
 0x24c   : > { %v3099_v26 = vmul.f32 %v5783_v62, %v3063_v45 }
 0x24e   : > { %v3135_v61 = vadd.f32 %v5798_v12, %v3099_v26 }
 0x24f   : > { %v2192_v20 = vpop.f32.mrf.mxu2  ;;  %v2342_v55 = vpop.f32.mrf.mxu3 }
 0x250   : > { %v3167_v56 = vmax.f32 %v3135_v61, 0.0  ;;  %v2338_v49 = vadd.f32 %v2337_v38, %v2192_v20  ;;  %v3014_v15 = vpop.f32.mrf.mxu0  ;;  %v3262_v28 = vpop.f32.mrf.mxu1 }
 0x251   : > { %v3343_v13 = vmul.f32 %v5976_v27, %v3262_v28 }
 0x252   : > { %v3189_v42 = vpack.c.bf16 %v3167_v56, %v3166_v50  ;;  %v3064_v60 = vadd.f32 %v3014_v15, %v2338_v49 }
 0x253   : > { %v3379_v0 = vadd.f32 %v5982_v52, %v3343_v13  ;;  %v3415_v13 = vld [vmem:[%s4868_s17 + $0x30] sm:$0xff] }
 0x254   : > { %3706 = vmatmul.msk.bf16.gmra.mxu1 %vm491_vm1, %v3189_v42  ;;  %v3100_v53 = vmul.f32 %v5783_v62, %v3064_v60 }
 0x255   : > { %v3443_v34 = vadd.f32 %v3411_v51, %v3379_v0  ;;  %v6039_v51 = vld [vmem:[%s6202_s6] ss:$0 sm:$0xff] }
 0x256   : > { %v3136_v35 = vadd.f32 %v5798_v12, %v3100_v53 }
 0x257   : > { %v3475_v3 = vmax.f32 %v3443_v34, 0.0  ;;  %v2194_v59 = vpop.f32.mrf.mxu2  ;;  %v2344_v43 = vpop.f32.mrf.mxu3 }
 0x258   : > { %v2340_v11 = vadd.f32 %v2339_v29, %v2194_v59  ;;  %v3016_v10 = vpop.f32.mrf.mxu0  ;;  %v3264_v41 = vpop.f32.mrf.mxu1  ;;  %v3168_v6 = vmax.f32 %v3136_v35, 0.0 }
 0x259   : > { %3507 = vst.msk [vmem:[%s4868_s17 + $0x10] sm:$0xff] %vm705_vm6, %v3475_v3  ;;  %v3344_v22 = vmul.f32 %v5976_v27, %v3264_v41  ;;  %v6049_v41 = vld [vmem:[%s6203_s7] ss:$0 sm:$0xff] }
 0x25a   : > { %v3065_v8 = vadd.f32 %v3016_v10, %v2340_v11 }
 0x25b   : > { %v3380_v63 = vadd.f32 %v5982_v52, %v3344_v22 }
 0x25c   : > { %v3101_v57 = vmul.f32 %v5783_v62, %v3065_v8 }
 0x25d   : > { %v3444_v16 = vadd.f32 %v3412_v17, %v3380_v63  ;;  %v3416_v63 = vld [vmem:[%s4868_s17 + $0x38] sm:$0xff] }
 0x25e   : > { %v3137_v14 = vadd.f32 %v5798_v12, %v3101_v57 }
 0x25f   : > { %v3476_v48 = vmax.f32 %v3444_v16, 0.0  ;;  %v2197_v39 = vpop.f32.mrf.mxu2  ;;  %v2347_v9 = vpop.f32.mrf.mxu3 }
 0x260   : > { %v3169_v31 = vmax.f32 %v3137_v14, 0.0  ;;  %v2343_v47 = vadd.f32 %v2342_v55, %v2197_v39  ;;  %v3019_v7 = vpop.f32.mrf.mxu0  ;;  %v3267_v54 = vpop.f32.mrf.mxu1 }
 0x261   : > { %3508 = vst.msk [vmem:[%s4868_s17 + $0x18] sm:$0xff] %vm705_vm6, %v3476_v48  ;;  %v3345_v37 = vmul.f32 %v5976_v27, %v3267_v54 }
 0x262   : > { %v3190_v38 = vpack.c.bf16 %v3169_v31, %v3168_v6  ;;  %v3066_v4 = vadd.f32 %v3019_v7, %v2343_v47 }
 0x263   : > { %v3381_v32 = vadd.f32 %v5982_v52, %v3345_v37 }
 0x264   : > { %3707 = vmatmul.msk.bf16.gmra.mxu1 %vm491_vm1, %v3190_v38  ;;  %v3102_v19 = vmul.f32 %v5783_v62, %v3066_v4  ;;  %v3417_v38 = vld [vmem:[%s4868_s17 + $0x40] sm:$0xff] }
 0x265   : > { %v3445_v40 = vadd.f32 %v3413_v1, %v3381_v32 }
 0x266   : > { %v3138_v23 = vadd.f32 %v5798_v12, %v3102_v19 }
 0x267   : > { %v3477_v30 = vmax.f32 %v3445_v40, 0.0  ;;  %v2199_v46 = vpop.f32.mrf.mxu2  ;;  %v2349_v36 = vpop.f32.mrf.mxu3 }
 0x268   : > { %v2345_v24 = vadd.f32 %v2344_v43, %v2199_v46  ;;  %v3021_v5 = vpop.f32.mrf.mxu0  ;;  %v3269_v58 = vpop.f32.mrf.mxu1  ;;  %v3170_v61 = vmax.f32 %v3138_v23, 0.0 }
 0x269   : > { %3509 = vst.msk [vmem:[%s4868_s17 + $0x20] sm:$0xff] %vm705_vm6, %v3477_v30  ;;  %v3346_v25 = vmul.f32 %v5976_v27, %v3269_v58 }
 0x26a   : > { %v3067_v44 = vadd.f32 %v3021_v5, %v2345_v24 }
 0x26b   : > { %v3382_v29 = vadd.f32 %v5982_v52, %v3346_v25 }
 0x26c   : > { %v3103_v33 = vmul.f32 %v5783_v62, %v3067_v44 }
 0x26d   : > { %v3446_v18 = vadd.f32 %v3414_v2, %v3382_v29  ;;  %v3418_v29 = vld [vmem:[%s4868_s17 + $0x48] sm:$0xff] }
 0x26e   : > { %v3139_v45 = vadd.f32 %v5798_v12, %v3103_v33 }
 0x26f   : > { %v3478_v21 = vmax.f32 %v3446_v18, 0.0  ;;  %v2202_v26 = vpop.f32.mrf.mxu2  ;;  %v2352_v12 = vpop.f32.mrf.mxu3 }
 0x270   : > { %v3171_v20 = vmax.f32 %v3139_v45, 0.0  ;;  %v2348_v55 = vadd.f32 %v2347_v9, %v2202_v26  ;;  %v3024_v50 = vpop.f32.mrf.mxu0  ;;  %v3272_v56 = vpop.f32.mrf.mxu1 }
 0x271   : > { %3510 = vst.msk [vmem:[%s4868_s17 + $0x28] sm:$0xff] %vm705_vm6, %v3478_v21  ;;  %v3347_v49 = vmul.f32 %v5976_v27, %v3272_v56 }
 0x272   : > { %v3191_v15 = vpack.c.bf16 %v3171_v20, %v3170_v61  ;;  %v3068_v28 = vadd.f32 %v3024_v50, %v2348_v55 }
 0x273   : > { %v3383_v62 = vadd.f32 %v5982_v52, %v3347_v49 }
 0x274   : > { %3708 = vmatmul.msk.bf16.gmra.mxu1 %vm491_vm1, %v3191_v15  ;;  %v3104_v34 = vmul.f32 %v6039_v51, %v3068_v28 }
 0x275   : > { %v3447_v42 = vadd.f32 %v3415_v13, %v3383_v62  ;;  %v3419_v62 = vld [vmem:[%s4868_s17 + $0x50] sm:$0xff] }
 0x276   : > { %v3140_v22 = vadd.f32 %v6049_v41, %v3104_v34 }
 0x277   : > { %v3479_v0 = vmax.f32 %v3447_v42, 0.0  ;;  %v2204_v60 = vpop.f32.mrf.mxu2  ;;  %v2354_v17 = vpop.f32.mrf.mxu3 }
 0x278   : > { %v2350_v3 = vadd.f32 %v2349_v36, %v2204_v60  ;;  %v3026_v59 = vpop.f32.mrf.mxu0  ;;  %v3274_v43 = vpop.f32.mrf.mxu1  ;;  %v3172_v48 = vmax.f32 %v3140_v22, 0.0 }
 0x279   : > { %3511 = vst.msk [vmem:[%s4868_s17 + $0x30] sm:$0xff] %vm705_vm6, %v3479_v0  ;;  %v3348_v53 = vmul.f32 %v5976_v27, %v3274_v43 }
 0x27a   : > { %v3069_v11 = vadd.f32 %v3026_v59, %v2350_v3 }
 0x27b   : > { %v3384_v10 = vadd.f32 %v5982_v52, %v3348_v53 }
 0x27c   : > { %v3105_v8 = vmul.f32 %v6039_v51, %v3069_v11 }
 0x27d   : > { %v3448_v35 = vadd.f32 %v3416_v63, %v3384_v10  ;;  %v3420_v10 = vld [vmem:[%s4868_s17 + $0x58] sm:$0xff] }
 0x27e   : > { %v3141_v57 = vadd.f32 %v6049_v41, %v3105_v8 }
 0x27f   : > { %v3480_v16 = vmax.f32 %v3448_v35, 0.0  ;;  %v2207_v14 = vpop.f32.mrf.mxu2  ;;  %v2357_v24 = vpop.f32.mrf.mxu3 }
 0x280   : > { %v3173_v39 = vmax.f32 %v3141_v57, 0.0  ;;  %v2353_v6 = vadd.f32 %v2352_v12, %v2207_v14  ;;  %v3029_v31 = vpop.f32.mrf.mxu0  ;;  %v3277_v47 = vpop.f32.mrf.mxu1 }
 0x281   : > { %3512 = vst.msk [vmem:[%s4868_s17 + $0x38] sm:$0xff] %vm705_vm6, %v3480_v16  ;;  %v3349_v7 = vmul.f32 %v5976_v27, %v3277_v47 }
 0x282   : > { %v3192_v54 = vpack.c.bf16 %v3173_v39, %v3172_v48  ;;  %v3070_v37 = vadd.f32 %v3029_v31, %v2353_v6 }
 0x283   : > { %v3385_v9 = vadd.f32 %v5982_v52, %v3349_v7 }
 0x284   : > { %3709 = vmatmul.msk.bf16.gmra.mxu1 %vm491_vm1, %v3192_v54  ;;  %v3106_v40 = vmul.f32 %v6039_v51, %v3070_v37  ;;  %v3421_v54 = vld [vmem:[%s4868_s17 + $0x60] sm:$0xff] }
 0x285   : > { %v3449_v32 = vadd.f32 %v3417_v38, %v3385_v9 }
 0x286   : > { %v3142_v44 = vadd.f32 %v6049_v41, %v3106_v40 }
 0x287   : > { %v3481_v4 = vmax.f32 %v3449_v32, 0.0  ;;  %v2209_v1 = vpop.f32.mrf.mxu2  ;;  %v2359_v56 = vpop.f32.mrf.mxu3 }
 0x288   : > { %v2355_v30 = vadd.f32 %v2354_v17, %v2209_v1  ;;  %v3031_v46 = vpop.f32.mrf.mxu0  ;;  %v3279_v19 = vpop.f32.mrf.mxu1  ;;  %v3174_v45 = vmax.f32 %v3142_v44, 0.0 }
 0x289   : > { %3513 = vst.msk [vmem:[%s4868_s17 + $0x40] sm:$0xff] %vm705_vm6, %v3481_v4  ;;  %v3350_v5 = vmul.f32 %v5976_v27, %v3279_v19 }
 0x28a   : > { %v3071_v58 = vadd.f32 %v3031_v46, %v2355_v30 }
 0x28b   : > { %v3386_v25 = vadd.f32 %v5982_v52, %v3350_v5 }
 0x28c   : > { %v3107_v36 = vmul.f32 %v6039_v51, %v3071_v58 }
 0x28d   : > { %v3450_v23 = vadd.f32 %v3418_v29, %v3386_v25  ;;  %v3422_v25 = vld [vmem:[%s4868_s17 + $0x68] sm:$0xff] }
 0x28e   : > { %v3143_v33 = vadd.f32 %v6049_v41, %v3107_v36 }
 0x28f   : > { %v3482_v2 = vmax.f32 %v3450_v23, 0.0  ;;  %v2212_v18 = vpop.f32.mrf.mxu2  ;;  %v2362_v22 = vpop.f32.mrf.mxu3 }
 0x290   : > { %v3175_v21 = vmax.f32 %v3143_v33, 0.0  ;;  %v2358_v26 = vadd.f32 %v2357_v24, %v2212_v18  ;;  %v3034_v61 = vpop.f32.mrf.mxu0  ;;  %v3282_v20 = vpop.f32.mrf.mxu1 }
 0x291   : > { %3514 = vst.msk [vmem:[%s4868_s17 + $0x48] sm:$0xff] %vm705_vm6, %v3482_v2  ;;  %v3351_v55 = vmul.f32 %v5976_v27, %v3282_v20 }
 0x292   : > { %v3193_v50 = vpack.c.bf16 %v3175_v21, %v3174_v45  ;;  %v3072_v15 = vadd.f32 %v3034_v61, %v2358_v26 }
 0x293   : > { %v3387_v49 = vadd.f32 %v5982_v52, %v3351_v55 }
 0x294   : > { %3710 = vmatmul.msk.bf16.gmra.mxu1 %vm491_vm1, %v3193_v50  ;;  %v3108_v42 = vmul.f32 %v6039_v51, %v3072_v15  ;;  %v3424_v50 = vld [vmem:[%s4868_s17 + $0x78] sm:$0xff] }
 0x295   : > { %v3451_v28 = vadd.f32 %v3419_v62, %v3387_v49 }
 0x296   : > { %v3144_v53 = vadd.f32 %v6049_v41, %v3108_v42 }
 0x297   : > { %v3483_v13 = vmax.f32 %v3451_v28, 0.0  ;;  %v2214_v12 = vpop.f32.mrf.mxu2  ;;  %v2364_v37 = vpop.f32.mrf.mxu3 }
 0x298   : > { %v2360_v0 = vadd.f32 %v2359_v56, %v2214_v12  ;;  %v3036_v60 = vpop.f32.mrf.mxu0  ;;  %v3284_v34 = vpop.f32.mrf.mxu1  ;;  %v3176_v17 = vmax.f32 %v3144_v53, 0.0 }
 0x299   : > { %3515 = vst.msk [vmem:[%s4868_s17 + $0x50] sm:$0xff] %vm705_vm6, %v3483_v13  ;;  %v3352_v3 = vmul.f32 %v5976_v27, %v3284_v34  ;;  %v3425_v13 = vld [vmem:[%s4868_s17 + $0x80] sm:$0xff] }
 0x29a   : > { %v3073_v59 = vadd.f32 %v3036_v60, %v2360_v0 }
 0x29b   : > { %v3388_v43 = vadd.f32 %v5982_v52, %v3352_v3  ;;  %v3426_v3 = vld [vmem:[%s4868_s17 + $0x88] sm:$0xff] }
 0x29c   : > { %v3109_v11 = vmul.f32 %v6039_v51, %v3073_v59 }
 0x29d   : > { %v3452_v8 = vadd.f32 %v3420_v10, %v3388_v43 }
 0x29e   : > { %v3145_v63 = vadd.f32 %v6049_v41, %v3109_v11 }
 0x29f   : > { %v3484_v35 = vmax.f32 %v3452_v8, 0.0  ;;  %v2217_v57 = vpop.f32.mrf.mxu2 }
 0x2a0   : > { %v3177_v16 = vmax.f32 %v3145_v63, 0.0  ;;  %v2363_v14 = vadd.f32 %v2362_v22, %v2217_v57  ;;  %v3039_v48 = vpop.f32.mrf.mxu0  ;;  %v3287_v39 = vpop.f32.mrf.mxu1  ;;  %v3427_v22 = vld [vmem:[%s4868_s17 + $0x90] sm:$0xff] }
 0x2a1   : > { %3516 = vst.msk [vmem:[%s4868_s17 + $0x58] sm:$0xff] %vm705_vm6, %v3484_v35  ;;  %v3353_v6 = vmul.f32 %v5976_v27, %v3287_v39 }
 0x2a2   : > { %v3194_v31 = vpack.c.bf16 %v3177_v16, %v3176_v17  ;;  %v3074_v7 = vadd.f32 %v3039_v48, %v2363_v14  ;;  %v3428_v16 = vld [vmem:[%s4868_s17 + $0x98] sm:$0xff] }
 0x2a3   : > { %v3389_v47 = vadd.f32 %v5982_v52, %v3353_v6 }
 0x2a4   : > { %3711 = vmatmul.msk.bf16.gmra.mxu1 %vm491_vm1, %v3194_v31  ;;  %v3110_v4 = vmul.f32 %v6039_v51, %v3074_v7 }
 0x2a5   : > { %v3453_v9 = vadd.f32 %v3421_v54, %v3389_v47  ;;  %v3429_v47 = vld [vmem:[%s4868_s17 + $0xa0] sm:$0xff] }
 0x2a6   : > { %v3146_v5 = vadd.f32 %v6049_v41, %v3110_v4 }
 0x2a7   : > { %v3485_v38 = vmax.f32 %v3453_v9, 0.0  ;;  %v2219_v32 = vpop.f32.mrf.mxu2 }
 0x2a8   : > { %v2365_v1 = vadd.f32 %v2364_v37, %v2219_v32  ;;  %v3041_v40 = vpop.f32.mrf.mxu0  ;;  %v3289_v30 = vpop.f32.mrf.mxu1  ;;  %v3178_v23 = vmax.f32 %v3146_v5, 0.0  ;;  %v3430_v32 = vld [vmem:[%s4868_s17 + $0xa8] sm:$0xff] }
 0x2a9   : > { %3517 = vst.msk [vmem:[%s4868_s17 + $0x60] sm:$0xff] %vm705_vm6, %v3485_v38  ;;  %v3354_v46 = vmul.f32 %v5976_v27, %v3289_v30 }
 0x2aa   : > { %v3075_v19 = vadd.f32 %v3041_v40, %v2365_v1 }
 0x2ab   : > { %v3390_v24 = vadd.f32 %v5982_v52, %v3354_v46 }
 0x2ac   : > { %v3111_v58 = vmul.f32 %v6039_v51, %v3075_v19  ;;  %v3423_v51 = vld [vmem:[%s4868_s17 + $0x70] sm:$0xff] }
 0x2ad   : > { %v3454_v44 = vadd.f32 %v3422_v25, %v3390_v24  ;;  %v3431_v19 = vld [vmem:[%s4868_s17 + $0xb0] sm:$0xff] }
 0x2ae   : > { %v3147_v36 = vadd.f32 %v6049_v41, %v3111_v58 }
 0x2af   : > { %v3486_v29 = vmax.f32 %v3454_v44, 0.0 }
 0x2b0   : > { %v3179_v33 = vmax.f32 %v3147_v36, 0.0  ;;  %v3292_v2 = vpop.f32.mrf.mxu1  ;;  %v3432_v36 = vld [vmem:[%s4868_s17 + $0xb8] sm:$0xff] }
 0x2b1   : > { %3518 = vst.msk [vmem:[%s4868_s17 + $0x68] sm:$0xff] %vm705_vm6, %v3486_v29  ;;  %v3355_v18 = vmul.f32 %v5976_v27, %v3292_v2 }
 0x2b2   : > { %v3195_v45 = vpack.c.bf16 %v3179_v33, %v3178_v23 }
 0x2b3   : > { %v3391_v21 = vadd.f32 %v5982_v52, %v3355_v18 }
 0x2b4   : > { %3712 = vmatmul.msk.bf16.gmra.mxu1 %vm491_vm1, %v3195_v45  ;;  %v3433_v45 = vld [vmem:[%s4868_s17 + $0xc0] sm:$0xff] }
 0x2b5   : > { %v3455_v26 = vadd.f32 %v3423_v51, %v3391_v21 }
 0x2b7   : > { %v3487_v61 = vmax.f32 %v3455_v26, 0.0 }
 0x2b8   : > { %v3294_v41 = vpop.f32.mrf.mxu1 }
 0x2b9   : > { %3519 = vst.msk [vmem:[%s4868_s17 + $0x70] sm:$0xff] %vm705_vm6, %v3487_v61  ;;  %v3356_v20 = vmul.f32 %v5976_v27, %v3294_v41 }
 0x2bb   : > { %v3392_v55 = vadd.f32 %v5982_v52, %v3356_v20  ;;  %v3434_v20 = vld [vmem:[%s4868_s17 + $0xc8] sm:$0xff] }
 0x2bd   : > { %v3456_v56 = vadd.f32 %v3424_v50, %v3392_v55 }
 0x2bf   : > { %v3488_v49 = vmax.f32 %v3456_v56, 0.0 }
 0x2c1   : > { %3520 = vst.msk [vmem:[%s4868_s17 + $0x78] sm:$0xff] %vm705_vm6, %v3488_v49  ;;  %v3297_v15 = vpop.f32.mrf.mxu1 }
 0x2c2   : > { %v3357_v62 = vmul.f32 %v5976_v27, %v3297_v15 }
 0x2c4   : > { %v3393_v28 = vadd.f32 %v5982_v52, %v3357_v62  ;;  %v3435_v62 = vld [vmem:[%s4868_s17 + $0xd0] sm:$0xff] }
 0x2c6   : > { %v3457_v12 = vadd.f32 %v3425_v13, %v3393_v28 }
 0x2c8   : > { %v3489_v42 = vmax.f32 %v3457_v12, 0.0 }
 0x2c9   : > { %v3299_v0 = vpop.f32.mrf.mxu1 }
 0x2ca   : > { %3521 = vst.msk [vmem:[%s4868_s17 + $0x80] sm:$0xff] %vm705_vm6, %v3489_v42  ;;  %v3358_v60 = vmul.f32 %v5976_v27, %v3299_v0 }
 0x2cc   : > { %v3394_v34 = vadd.f32 %v5982_v52, %v3358_v60  ;;  %v3436_v60 = vld [vmem:[%s4868_s17 + $0xd8] sm:$0xff] }
 0x2ce   : > { %v3458_v59 = vadd.f32 %v3426_v3, %v3394_v34 }
 0x2d0   : > { %v3490_v43 = vmax.f32 %v3458_v59, 0.0 }
 0x2d1   : > { %v3302_v53 = vpop.f32.mrf.mxu1 }
 0x2d2   : > { %3522 = vst.msk [vmem:[%s4868_s17 + $0x88] sm:$0xff] %vm705_vm6, %v3490_v43  ;;  %v3359_v11 = vmul.f32 %v5976_v27, %v3302_v53 }
 0x2d4   : > { %v3395_v10 = vadd.f32 %v5982_v52, %v3359_v11  ;;  %v3437_v11 = vld [vmem:[%s4868_s17 + $0xe0] sm:$0xff] }
 0x2d6   : > { %v3459_v8 = vadd.f32 %v3427_v22, %v3395_v10 }
 0x2d8   : > { %v3491_v63 = vmax.f32 %v3459_v8, 0.0 }
 0x2d9   : > { %v3304_v35 = vpop.f32.mrf.mxu1 }
 0x2da   : > { %3523 = vst.msk [vmem:[%s4868_s17 + $0x90] sm:$0xff] %vm705_vm6, %v3491_v63  ;;  %v3360_v57 = vmul.f32 %v5976_v27, %v3304_v35 }
 0x2dc   : > { %v3396_v17 = vadd.f32 %v5982_v52, %v3360_v57  ;;  %v3438_v57 = vld [vmem:[%s4868_s17 + $0xe8] sm:$0xff] }
 0x2de   : > { %v3460_v14 = vadd.f32 %v3428_v16, %v3396_v17 }
 0x2e0   : > { %v3492_v48 = vmax.f32 %v3460_v14, 0.0 }
 0x2e1   : > { %v3307_v39 = vpop.f32.mrf.mxu1 }
 0x2e2   : > { %3524 = vst.msk [vmem:[%s4868_s17 + $0x98] sm:$0xff] %vm705_vm6, %v3492_v48  ;;  %v3361_v6 = vmul.f32 %v5976_v27, %v3307_v39 }
 0x2e4   : > { %v3397_v31 = vadd.f32 %v5982_v52, %v3361_v6  ;;  %v3439_v6 = vld [vmem:[%s4868_s17 + $0xf0] sm:$0xff] }
 0x2e6   : > { %v3461_v7 = vadd.f32 %v3429_v47, %v3397_v31 }
 0x2e8   : > { %v3493_v54 = vmax.f32 %v3461_v7, 0.0 }
 0x2e9   : > { %v3309_v9 = vpop.f32.mrf.mxu1 }
 0x2ea   : > { %3525 = vst.msk [vmem:[%s4868_s17 + $0xa0] sm:$0xff] %vm705_vm6, %v3493_v54  ;;  %v3362_v37 = vmul.f32 %v5976_v27, %v3309_v9 }
 0x2ec   : > { %v3398_v38 = vadd.f32 %v5982_v52, %v3362_v37  ;;  %v3440_v37 = vld [vmem:[%s4868_s17 + $0xf8] sm:$0xff] }
 0x2ee   : > { %v3462_v4 = vadd.f32 %v3430_v32, %v3398_v38 }
 0x2f0   : > { %v3494_v1 = vmax.f32 %v3462_v4, 0.0 }
 0x2f1   : > { %v3312_v40 = vpop.f32.mrf.mxu1 }
 0x2f2   : > { %3526 = vst.msk [vmem:[%s4868_s17 + $0xa8] sm:$0xff] %vm705_vm6, %v3494_v1  ;;  %v3363_v30 = vmul.f32 %v5976_v27, %v3312_v40 }
 0x2f4   : > { %v3399_v46 = vadd.f32 %v5982_v52, %v3363_v30 }
 0x2f6   : > { %v3463_v24 = vadd.f32 %v3431_v19, %v3399_v46 }
 0x2f8   : > { %v3495_v5 = vmax.f32 %v3463_v24, 0.0 }
 0x2f9   : > { %v3314_v58 = vpop.f32.mrf.mxu1 }
 0x2fa   : > { %3527 = vst.msk [vmem:[%s4868_s17 + $0xb0] sm:$0xff] %vm705_vm6, %v3495_v5  ;;  %v3364_v25 = vmul.f32 %v5976_v27, %v3314_v58 }
 0x2fc   : > { %v3400_v44 = vadd.f32 %v5982_v52, %v3364_v25 }
 0x2fe   : > { %v3464_v29 = vadd.f32 %v3432_v36, %v3400_v44 }
 0x300   : > { %v3496_v23 = vmax.f32 %v3464_v29, 0.0 }
 0x301   : > { %v3317_v33 = vpop.f32.mrf.mxu1 }
 0x302   : > { %3528 = vst.msk [vmem:[%s4868_s17 + $0xb8] sm:$0xff] %vm705_vm6, %v3496_v23  ;;  %v3365_v2 = vmul.f32 %v5976_v27, %v3317_v33 }
 0x304   : > { %v3401_v18 = vadd.f32 %v5982_v52, %v3365_v2 }
 0x306   : > { %v3465_v21 = vadd.f32 %v3433_v45, %v3401_v18 }
 0x308   : > { %v3497_v51 = vmax.f32 %v3465_v21, 0.0 }
 0x309   : > { %v3319_v26 = vpop.f32.mrf.mxu1 }
 0x30a   : > { %3529 = vst.msk [vmem:[%s4868_s17 + $0xc0] sm:$0xff] %vm705_vm6, %v3497_v51  ;;  %v3366_v61 = vmul.f32 %v5976_v27, %v3319_v26 }
 0x30c   : > { %v3402_v41 = vadd.f32 %v5982_v52, %v3366_v61 }
 0x30e   : > { %v3466_v55 = vadd.f32 %v3434_v20, %v3402_v41 }
 0x310   : > { %v3498_v50 = vmax.f32 %v3466_v55, 0.0 }
 0x311   : > { %v3322_v56 = vpop.f32.mrf.mxu1 }
 0x312   : > { %3530 = vst.msk [vmem:[%s4868_s17 + $0xc8] sm:$0xff] %vm705_vm6, %v3498_v50  ;;  %v3367_v49 = vmul.f32 %v5976_v27, %v3322_v56 }
 0x314   : > { %v3403_v15 = vadd.f32 %v5982_v52, %v3367_v49 }
 0x316   : > { %v3467_v28 = vadd.f32 %v3435_v62, %v3403_v15 }
 0x318   : > { %v3499_v13 = vmax.f32 %v3467_v28, 0.0 }
 0x319   : > { %v3324_v12 = vpop.f32.mrf.mxu1 }
 0x31a   : > { %3531 = vst.msk [vmem:[%s4868_s17 + $0xd0] sm:$0xff] %vm705_vm6, %v3499_v13  ;;  %v3368_v42 = vmul.f32 %v5976_v27, %v3324_v12 }
 0x31c   : > { %v3404_v0 = vadd.f32 %v5982_v52, %v3368_v42 }
 0x31e   : > { %v3468_v34 = vadd.f32 %v3436_v60, %v3404_v0 }
 0x320   : > { %v3500_v3 = vmax.f32 %v3468_v34, 0.0 }
 0x321   : > { %v3327_v59 = vpop.f32.mrf.mxu1 }
 0x322   : > { %3532 = vst.msk [vmem:[%s4868_s17 + $0xd8] sm:$0xff] %vm705_vm6, %v3500_v3  ;;  %v3369_v43 = vmul.f32 %v5976_v27, %v3327_v59 }
 0x324   : > { %v3405_v53 = vadd.f32 %v5982_v52, %v3369_v43 }
 0x326   : > { %v3469_v10 = vadd.f32 %v3437_v11, %v3405_v53 }
 0x328   : > { %v3501_v22 = vmax.f32 %v3469_v10, 0.0 }
 0x329   : > { %v3329_v8 = vpop.f32.mrf.mxu1 }
 0x32a   : > { %3533 = vst.msk [vmem:[%s4868_s17 + $0xe0] sm:$0xff] %vm705_vm6, %v3501_v22  ;;  %v3370_v63 = vmul.f32 %v5976_v27, %v3329_v8 }
 0x32c   : > { %v3406_v35 = vadd.f32 %v5982_v52, %v3370_v63 }
 0x32e   : > { %v3470_v17 = vadd.f32 %v3438_v57, %v3406_v35 }
 0x330   : > { %v3502_v16 = vmax.f32 %v3470_v17, 0.0 }
 0x331   : > { %v3332_v14 = vpop.f32.mrf.mxu1 }
 0x332   : > { %3534 = vst.msk [vmem:[%s4868_s17 + $0xe8] sm:$0xff] %vm705_vm6, %v3502_v16  ;;  %v3371_v48 = vmul.f32 %v5976_v27, %v3332_v14 }
 0x334   : > { %v3407_v39 = vadd.f32 %v5982_v52, %v3371_v48 }
 0x336   : > { %v3471_v31 = vadd.f32 %v3439_v6, %v3407_v39 }
 0x338   : > { %v3503_v47 = vmax.f32 %v3471_v31, 0.0 }
 0x339   : > { %v3334_v7 = vpop.f32.mrf.mxu1 }
 0x33a   : > { %3535 = vst.msk [vmem:[%s4868_s17 + $0xf0] sm:$0xff] %vm705_vm6, %v3503_v47  ;;  %v3372_v54 = vmul.f32 %v5976_v27, %v3334_v7 }
 0x33c   : > { %v3408_v9 = vadd.f32 %v5982_v52, %v3372_v54 }
 0x33e   : > { %v3472_v38 = vadd.f32 %v3440_v37, %v3408_v9 }
 0x340   : > { %v3504_v32 = vmax.f32 %v3472_v38, 0.0 }
 0x342   : > { %3536 = vst.msk [vmem:[%s4868_s17 + $0xf8] sm:$0xff] %vm705_vm6, %v3504_v32 }
 0x343 PF: > { %s23_s25 = sadd.s32 1, %s4261_s25  }
 0x344   : > { %p20_p4 = scmp.ge.s32.totalorder %s23_s25, 4  }
 0x346   :  { %22 = sbr.rel (!%p20_p4) target bundleno = 1 (0x1), region = 107 }

</bundles_post_ra>
